<compile_context>
chip_gen: v6e
topology: v6e:2x2x1
jax: 0.10.0
libtpu: 0.0.40
codegen_flags: <defaults>
</compile_context>

<pallas_src>
import functools

import jax
import jax.numpy as jnp
import numpy as np
from jax import lax
from jax.experimental import pallas as pl
from jax.experimental.pallas import tpu as pltpu


def convlstm_step_kernel(xconv_ref, wcat_ref, out_ref, hpp_ref, c_ref, patch_ref,
                         *, H, W, Hd, K, RPT):
    """One grid step = one ConvLSTM cell update for one (batch, time) pair.

    xconv_ref: (H*W, 4*Hd) bf16        precomputed conv(x_t, W_x) + bias for this t
    wcat_ref:  (K*K*Hd, 4*Hd) bf16     recurrent (h) weight in im2col layout
    out_ref:   (H*W, Hd) f32           final hidden state h_T (written at last t)
    hpp_ref:   (2, H+2P, W+2P, Hd) f32 ping-pong zero-halo h buffers
    c_ref:     (H*W, Hd) f32           cell state
    patch_ref: (RPT*W, K*K*Hd) bf16    im2col patch staging (MXU LHS)
    """
    t = pl.program_id(1)
    P = K // 2
    MT = RPT * W
    n_m = H // RPT

    # Fresh state at the first time step of every batch element (scratch persists
    # across grid steps; this also stays correct if B is split across cores).
    @pl.when(t == 0)
    def _():
        hpp_ref[...] = jnp.zeros_like(hpp_ref)
        c_ref[...] = jnp.zeros_like(c_ref)

    rb = lax.rem(t, 2)          # buffer holding h_{t-1} (interior) + zero halo
    wb = 1 - rb                 # buffer that receives h_t (halo stays zero)
    is_last = t == pl.num_programs(1) - 1

    def do_tile(m):
        static = isinstance(m, int)
        r0 = m * RPT if static else pl.multiple_of(m * RPT, RPT)
        row0 = m * MT if static else pl.multiple_of(m * MT, MT)

        # --- im2col: 9 shifted (RPT, W, Hd) windows of h_{t-1} -> (MT, 288) bf16 ---
        for dy in range(K):
            for dx in range(K):
                tap = dy * K + dx
                sl = hpp_ref[rb, pl.ds(r0 + dy, RPT), pl.ds(dx, W), :]
                patch_ref[:, tap * Hd:(tap + 1) * Hd] = (
                    sl.reshape(MT, Hd).astype(patch_ref.dtype))

        # --- one 288-deep bf16 matmul, f32 accumulation; init = x-conv (+bias) ---
        acc = xconv_ref[pl.ds(row0, MT), :].astype(jnp.float32)
        acc = acc + jnp.dot(patch_ref[...], wcat_ref[...],
                            preferred_element_type=jnp.float32)

        # --- gates: one 96-lane sigmoid for i/f/o, one tanh for g ---
        ifo = jax.nn.sigmoid(acc[:, :3 * Hd])
        i = ifo[:, 0 * Hd:1 * Hd]
        f = ifo[:, 1 * Hd:2 * Hd]
        o = ifo[:, 2 * Hd:3 * Hd]
        g = jnp.tanh(acc[:, 3 * Hd:4 * Hd])

        c_new = f * c_ref[pl.ds(row0, MT), :] + i * g
        h_new = o * jnp.tanh(c_new)
        c_ref[pl.ds(row0, MT), :] = c_new

        # Ping-pong: h_t goes straight into the interior of the "next" halo
        # buffer (no staging buffer, no end-of-step commit copy).
        hpp_ref[wb, pl.ds(P + r0, RPT), pl.ds(P, W), :] = h_new.reshape(RPT, W, Hd)

        @pl.when(is_last)
        def _():
            out_ref[pl.ds(row0, MT), :] = h_new

    if n_m <= 2:
        # Unrolled is fine for <= 2 tiles (live ranges stay within 64 vregs).
        for m in range(n_m):
            do_tile(m)
    else:
        # Larger spatial sizes: bound live ranges with a real loop to avoid spills.
        def _tile(m, carry):
            do_tile(m)
            return carry
        lax.fori_loop(0, n_m, _tile, 0)


def convlstm_net_pallas(x, w_oihw, b, wout_oihw, bout):
    """x: (B, T, C, H, W) like PyTorch; returns (B, 1, H, W)."""
    B, T, C, H, W = x.shape
    assert T >= 1, "the recurrence needs at least one time step"
    Hd = wout_oihw.shape[1]
    K = w_oihw.shape[2]
    HW = H * W
    P = K // 2

    # ---- x half of the cell conv is not recurrent: all T steps at once (XLA) ----
    x_nhwc = jnp.transpose(x, (0, 1, 3, 4, 2)).reshape(B * T, H, W, C)
    w_x = jnp.transpose(w_oihw[:, :C], (2, 3, 1, 0))              # (K, K, C, 4*Hd)
    xconv = lax.conv_general_dilated(
        x_nhwc, w_x, window_strides=(1, 1), padding="SAME",
        dimension_numbers=("NHWC", "HWIO", "NHWC"))               # default precision
    xconv = xconv + b.reshape(1, 1, 1, -1)                        # fold the bias here
    # bf16 slab halves HBM->VMEM DMA for the dominant input; f32 accum in-kernel.
    xconv = xconv.reshape(B, T, HW, 4 * Hd).astype(jnp.bfloat16)

    # ---- recurrent (h) weight in im2col layout: row = (dy*K+dx)*Hd + ci ----
    w_h = jnp.transpose(w_oihw[:, C:], (2, 3, 1, 0))              # (K, K, Hd, 4*Hd)
    wcat = w_h.reshape(K * K * Hd, 4 * Hd).astype(jnp.bfloat16)   # bf16 MXU operand

    # M tile = RPT image rows with RPT*W <= 128 so the f32 acc stays in vregs.
    RPT = 1
    for cand in range(min(H, max(1, 128 // W)), 0, -1):
        if H % cand == 0:
            RPT = cand
            break

    kernel = functools.partial(convlstm_step_kernel, H=H, W=W, Hd=Hd, K=K, RPT=RPT)

    h_last = pl.pallas_call(
        kernel,
        out_shape=jax.ShapeDtypeStruct((B, HW, Hd), jnp.float32),
        grid_spec=pltpu.PrefetchScalarGridSpec(
            num_scalar_prefetch=0,
            # B is independent ("parallel"); T carries the recurrence and must
            # stay sequential ("arbitrary").  VMEM use is now independent of T.
            grid=(B, T),
            in_specs=[
                pl.BlockSpec((None, None, HW, 4 * Hd), lambda bb, tt: (bb, tt, 0, 0)),
                pl.BlockSpec((K * K * Hd, 4 * Hd), lambda bb, tt: (0, 0)),
            ],
            out_specs=pl.BlockSpec((None, HW, Hd), lambda bb, tt: (bb, 0, 0)),
            scratch_shapes=[
                pltpu.VMEM((2, H + 2 * P, W + 2 * P, Hd), jnp.float32),  # ping-pong h halo
                pltpu.VMEM((HW, Hd), jnp.float32),                       # c state
                pltpu.VMEM((RPT * W, K * K * Hd), jnp.bfloat16),         # im2col patch
            ],
        ),
        # NOTE(v7x): keep B a multiple of 2 so both TensorCores get work; only
        # the batch axis is cheaply splittable because of the time recurrence.
        compiler_params=pltpu.CompilerParams(
            dimension_semantics=("parallel", "arbitrary")),
    )(xconv, wcat)

    # ---- 1x1 output conv + NCHW transpose: lane-dense, leave it to XLA ----
    wout = jnp.transpose(wout_oihw[:, :, 0, 0], (1, 0)).astype(jnp.float32)  # (Hd, 1)
    y = jnp.einsum("bmh,ho->bmo", h_last, wout) + bout.reshape(1, 1, 1)
    y = y.reshape(B, H, W, 1)
    return jnp.transpose(y, (0, 3, 1, 2))                         # (B, 1, H, W)


def convlstm_net_ref(x, w_oihw, b, wout_oihw, bout):
    """Pure-JAX f32 reference mirroring the PyTorch module."""
    B, T, C, H, W = x.shape
    Hd = wout_oihw.shape[1]
    w_hwio = jnp.transpose(w_oihw, (2, 3, 1, 0))
    h = jnp.zeros((B, H, W, Hd), jnp.float32)
    c = jnp.zeros((B, H, W, Hd), jnp.float32)
    for t in range(T):
        xt = jnp.transpose(x[:, t], (0, 2, 3, 1))                 # NHWC
        comb = jnp.concatenate([xt, h], axis=-1)
        conv = lax.conv_general_dilated(
            comb, w_hwio, window_strides=(1, 1), padding="SAME",
            dimension_numbers=("NHWC", "HWIO", "NHWC"),
            precision=lax.Precision.HIGHEST) + b.reshape(1, 1, 1, -1)
        i = jax.nn.sigmoid(conv[..., 0 * Hd:1 * Hd])
        f = jax.nn.sigmoid(conv[..., 1 * Hd:2 * Hd])
        o = jax.nn.sigmoid(conv[..., 2 * Hd:3 * Hd])
        g = jnp.tanh(conv[..., 3 * Hd:4 * Hd])
        c = f * c + i * g
        h = o * jnp.tanh(c)
    wout = jnp.transpose(wout_oihw[:, :, 0, 0], (1, 0))           # (Hd, 1)
    y = jnp.einsum("bhwc,co->bhwo", h, wout,
                   precision=lax.Precision.HIGHEST) + bout.reshape(1, 1, 1, 1)
    return jnp.transpose(y, (0, 3, 1, 2))


if __name__ == "__main__":
    B, T, C, H, W, Hd, K = 2, 8, 1, 16, 16, 32, 3

    key = jax.random.PRNGKey(0)
    k1, k2, k3, k4, k5 = jax.random.split(key, 5)
    x = jax.random.normal(k1, (B, T, C, H, W), jnp.float32)
    # Deterministic synthetic parameters in PyTorch layouts:
    w = 0.1 * jax.random.normal(k2, (4 * Hd, C + Hd, K, K), jnp.float32)   # Conv2d weight
    b = 0.1 * jax.random.normal(k3, (4 * Hd,), jnp.float32)                # Conv2d bias
    wout = 0.1 * jax.random.normal(k4, (1, Hd, 1, 1), jnp.float32)         # 1x1 conv weight
    bout = 0.1 * jax.random.normal(k5, (1,), jnp.float32)                  # 1x1 conv bias

    out = jax.jit(convlstm_net_pallas)(x, w, b, wout, bout)
    out = jax.block_until_ready(out)

    ref = convlstm_net_ref(x, w, b, wout, bout)
    assert out.shape == (B, 1, H, W), out.shape
    # bf16 MXU inputs / bf16 x-conv storage (f32 accumulation) vs. an f32 HIGHEST
    # reference: 2e-2 is a safe bound for this 8-step recurrence.
    np.testing.assert_allclose(np.asarray(out), np.asarray(ref), atol=2e-2, rtol=2e-2)

    print("KERNEL_OK")
</pallas_src>

<mosaic_0001>
module attributes {stable_mosaic.version = 11 : i64} {
  func.func @convlstm_step_kernel(%arg0: i32, %arg1: i32, %arg2: memref<1x1x256x128xbf16, #tpu.memory_space<vmem>>, %arg3: memref<288x128xbf16, #tpu.memory_space<vmem>>, %arg4: memref<1x256x32xf32, #tpu.memory_space<vmem>>, %arg5: memref<2x18x18x32xf32, #tpu.memory_space<vmem>>, %arg6: memref<256x32xf32, #tpu.memory_space<vmem>>, %arg7: memref<128x288xbf16, #tpu.memory_space<vmem>>) attributes {dimension_semantics = [#tpu.dimension_semantics<parallel>, #tpu.dimension_semantics<arbitrary>], iteration_bounds = array<i64: 2, 8>, scalar_prefetch = 0 : i64, scratch_operands = 3 : i64, tpu.core_type = #tpu.core_type<tc>, window_params = [{transform_indices = @transform_0, window_bounds = array<i64: 1, 1, 256, 128>}, {pipeline_mode = #tpu.pipeline_mode<synchronous>, transform_indices = @transform_1, window_bounds = array<i64: 288, 128>}, {transform_indices = @transform_2, window_bounds = array<i64: 1, 256, 32>}]} {
    %c0_i32 = arith.constant 0 : i32
    %0 = arith.cmpi eq, %arg1, %c0_i32 : i32
    %1 = arith.extui %0 : i1 to i32
    %c0_i32_0 = arith.constant 0 : i32
    %2 = arith.cmpi ne, %1, %c0_i32_0 : i32
    scf.if %2 {
      %cst_112 = arith.constant 0.000000e+00 : f32
      %178 = vector.broadcast %cst_112 : f32 to vector<2x18x18x32xf32>
      %c0_113 = arith.constant 0 : index
      %c0_114 = arith.constant 0 : index
      %c0_115 = arith.constant 0 : index
      %c0_116 = arith.constant 0 : index
      %179 = vector.load %arg5[%c0_113, %c0_114, %c0_115, %c0_116] : memref<2x18x18x32xf32, #tpu.memory_space<vmem>>, vector<2x18x18x32xf32>
      tpu.vector_store %arg5[%c0_113, %c0_114, %c0_115, %c0_116], %178 {strides = array<i32>} : memref<2x18x18x32xf32, #tpu.memory_space<vmem>>, vector<2x18x18x32xf32>,
      %cst_117 = arith.constant 0.000000e+00 : f32
      %180 = vector.broadcast %cst_117 : f32 to vector<256x32xf32>
      %c0_118 = arith.constant 0 : index
      %c0_119 = arith.constant 0 : index
      %181 = vector.load %arg6[%c0_118, %c0_119] : memref<256x32xf32, #tpu.memory_space<vmem>>, vector<256x32xf32>
      tpu.vector_store %arg6[%c0_118, %c0_119], %180 {strides = array<i32>} : memref<256x32xf32, #tpu.memory_space<vmem>>, vector<256x32xf32>,
    } else {
    }
    %c2_i32 = arith.constant 2 : i32
    %3 = arith.remsi %arg1, %c2_i32 : i32
    %c1_i32 = arith.constant 1 : i32
    %4 = arith.subi %c1_i32, %3 : i32
    %c7_i32 = arith.constant 7 : i32
    %5 = arith.cmpi eq, %arg1, %c7_i32 : i32
    %6 = arith.index_cast %3 : i32 to index
    %c0 = arith.constant 0 : index
    %c0_1 = arith.constant 0 : index
    %c0_2 = arith.constant 0 : index
    %7 = vector.load %arg5[%6, %c0, %c0_1, %c0_2] : memref<2x18x18x32xf32, #tpu.memory_space<vmem>>, vector<1x8x16x32xf32>
    %8 = vector.shape_cast %7 : vector<1x8x16x32xf32> to vector<8x16x32xf32>
    %9 = vector.shape_cast %8 : vector<8x16x32xf32> to vector<128x32xf32>
    %10 = arith.truncf %9 : vector<128x32xf32> to vector<128x32xbf16>
    %c0_3 = arith.constant 0 : index
    %c0_4 = arith.constant 0 : index
    %11 = vector.load %arg7[%c0_3, %c0_4] : memref<128x288xbf16, #tpu.memory_space<vmem>>, vector<128x32xbf16>
    tpu.vector_store %arg7[%c0_3, %c0_4], %10 {strides = array<i32>} : memref<128x288xbf16, #tpu.memory_space<vmem>>, vector<128x32xbf16>,
    %12 = arith.index_cast %3 : i32 to index
    %c0_5 = arith.constant 0 : index
    %c1 = arith.constant 1 : index
    %c0_6 = arith.constant 0 : index
    %13 = vector.load %arg5[%12, %c0_5, %c1, %c0_6] : memref<2x18x18x32xf32, #tpu.memory_space<vmem>>, vector<1x8x16x32xf32>
    %14 = vector.shape_cast %13 : vector<1x8x16x32xf32> to vector<8x16x32xf32>
    %15 = vector.shape_cast %14 : vector<8x16x32xf32> to vector<128x32xf32>
    %16 = arith.truncf %15 : vector<128x32xf32> to vector<128x32xbf16>
    %c0_7 = arith.constant 0 : index
    %c32 = arith.constant 32 : index
    %17 = vector.load %arg7[%c0_7, %c32] : memref<128x288xbf16, #tpu.memory_space<vmem>>, vector<128x32xbf16>
    tpu.vector_store %arg7[%c0_7, %c32], %16 {strides = array<i32>} : memref<128x288xbf16, #tpu.memory_space<vmem>>, vector<128x32xbf16>,
    %18 = arith.index_cast %3 : i32 to index
    %c0_8 = arith.constant 0 : index
    %c2 = arith.constant 2 : index
    %c0_9 = arith.constant 0 : index
    %19 = vector.load %arg5[%18, %c0_8, %c2, %c0_9] : memref<2x18x18x32xf32, #tpu.memory_space<vmem>>, vector<1x8x16x32xf32>
    %20 = vector.shape_cast %19 : vector<1x8x16x32xf32> to vector<8x16x32xf32>
    %21 = vector.shape_cast %20 : vector<8x16x32xf32> to vector<128x32xf32>
    %22 = arith.truncf %21 : vector<128x32xf32> to vector<128x32xbf16>
    %c0_10 = arith.constant 0 : index
    %c64 = arith.constant 64 : index
    %23 = vector.load %arg7[%c0_10, %c64] : memref<128x288xbf16, #tpu.memory_space<vmem>>, vector<128x32xbf16>
    tpu.vector_store %arg7[%c0_10, %c64], %22 {strides = array<i32>} : memref<128x288xbf16, #tpu.memory_space<vmem>>, vector<128x32xbf16>,
    %24 = arith.index_cast %3 : i32 to index
    %c1_11 = arith.constant 1 : index
    %c0_12 = arith.constant 0 : index
    %c0_13 = arith.constant 0 : index
    %25 = vector.load %arg5[%24, %c1_11, %c0_12, %c0_13] : memref<2x18x18x32xf32, #tpu.memory_space<vmem>>, vector<1x8x16x32xf32>
    %26 = vector.shape_cast %25 : vector<1x8x16x32xf32> to vector<8x16x32xf32>
    %27 = vector.shape_cast %26 : vector<8x16x32xf32> to vector<128x32xf32>
    %28 = arith.truncf %27 : vector<128x32xf32> to vector<128x32xbf16>
    %c0_14 = arith.constant 0 : index
    %c96 = arith.constant 96 : index
    %29 = vector.load %arg7[%c0_14, %c96] : memref<128x288xbf16, #tpu.memory_space<vmem>>, vector<128x32xbf16>
    tpu.vector_store %arg7[%c0_14, %c96], %28 {strides = array<i32>} : memref<128x288xbf16, #tpu.memory_space<vmem>>, vector<128x32xbf16>,
    %30 = arith.index_cast %3 : i32 to index
    %c1_15 = arith.constant 1 : index
    %c1_16 = arith.constant 1 : index
    %c0_17 = arith.constant 0 : index
    %31 = vector.load %arg5[%30, %c1_15, %c1_16, %c0_17] : memref<2x18x18x32xf32, #tpu.memory_space<vmem>>, vector<1x8x16x32xf32>
    %32 = vector.shape_cast %31 : vector<1x8x16x32xf32> to vector<8x16x32xf32>
    %33 = vector.shape_cast %32 : vector<8x16x32xf32> to vector<128x32xf32>
    %34 = arith.truncf %33 : vector<128x32xf32> to vector<128x32xbf16>
    %c0_18 = arith.constant 0 : index
    %c128 = arith.constant 128 : index
    %35 = vector.load %arg7[%c0_18, %c128] : memref<128x288xbf16, #tpu.memory_space<vmem>>, vector<128x32xbf16>
    tpu.vector_store %arg7[%c0_18, %c128], %34 {strides = array<i32>} : memref<128x288xbf16, #tpu.memory_space<vmem>>, vector<128x32xbf16>,
    %36 = arith.index_cast %3 : i32 to index
    %c1_19 = arith.constant 1 : index
    %c2_20 = arith.constant 2 : index
    %c0_21 = arith.constant 0 : index
    %37 = vector.load %arg5[%36, %c1_19, %c2_20, %c0_21] : memref<2x18x18x32xf32, #tpu.memory_space<vmem>>, vector<1x8x16x32xf32>
    %38 = vector.shape_cast %37 : vector<1x8x16x32xf32> to vector<8x16x32xf32>
    %39 = vector.shape_cast %38 : vector<8x16x32xf32> to vector<128x32xf32>
    %40 = arith.truncf %39 : vector<128x32xf32> to vector<128x32xbf16>
    %c0_22 = arith.constant 0 : index
    %c160 = arith.constant 160 : index
    %41 = vector.load %arg7[%c0_22, %c160] : memref<128x288xbf16, #tpu.memory_space<vmem>>, vector<128x32xbf16>
    tpu.vector_store %arg7[%c0_22, %c160], %40 {strides = array<i32>} : memref<128x288xbf16, #tpu.memory_space<vmem>>, vector<128x32xbf16>,
    %42 = arith.index_cast %3 : i32 to index
    %c2_23 = arith.constant 2 : index
    %c0_24 = arith.constant 0 : index
    %c0_25 = arith.constant 0 : index
    %43 = vector.load %arg5[%42, %c2_23, %c0_24, %c0_25] : memref<2x18x18x32xf32, #tpu.memory_space<vmem>>, vector<1x8x16x32xf32>
    %44 = vector.shape_cast %43 : vector<1x8x16x32xf32> to vector<8x16x32xf32>
    %45 = vector.shape_cast %44 : vector<8x16x32xf32> to vector<128x32xf32>
    %46 = arith.truncf %45 : vector<128x32xf32> to vector<128x32xbf16>
    %c0_26 = arith.constant 0 : index
    %c192 = arith.constant 192 : index
    %47 = vector.load %arg7[%c0_26, %c192] : memref<128x288xbf16, #tpu.memory_space<vmem>>, vector<128x32xbf16>
    tpu.vector_store %arg7[%c0_26, %c192], %46 {strides = array<i32>} : memref<128x288xbf16, #tpu.memory_space<vmem>>, vector<128x32xbf16>,
    %48 = arith.index_cast %3 : i32 to index
    %c2_27 = arith.constant 2 : index
    %c1_28 = arith.constant 1 : index
    %c0_29 = arith.constant 0 : index
    %49 = vector.load %arg5[%48, %c2_27, %c1_28, %c0_29] : memref<2x18x18x32xf32, #tpu.memory_space<vmem>>, vector<1x8x16x32xf32>
    %50 = vector.shape_cast %49 : vector<1x8x16x32xf32> to vector<8x16x32xf32>
    %51 = vector.shape_cast %50 : vector<8x16x32xf32> to vector<128x32xf32>
    %52 = arith.truncf %51 : vector<128x32xf32> to vector<128x32xbf16>
    %c0_30 = arith.constant 0 : index
    %c224 = arith.constant 224 : index
    %53 = vector.load %arg7[%c0_30, %c224] : memref<128x288xbf16, #tpu.memory_space<vmem>>, vector<128x32xbf16>
    tpu.vector_store %arg7[%c0_30, %c224], %52 {strides = array<i32>} : memref<128x288xbf16, #tpu.memory_space<vmem>>, vector<128x32xbf16>,
    %54 = arith.index_cast %3 : i32 to index
    %c2_31 = arith.constant 2 : index
    %c2_32 = arith.constant 2 : index
    %c0_33 = arith.constant 0 : index
    %55 = vector.load %arg5[%54, %c2_31, %c2_32, %c0_33] : memref<2x18x18x32xf32, #tpu.memory_space<vmem>>, vector<1x8x16x32xf32>
    %56 = vector.shape_cast %55 : vector<1x8x16x32xf32> to vector<8x16x32xf32>
    %57 = vector.shape_cast %56 : vector<8x16x32xf32> to vector<128x32xf32>
    %58 = arith.truncf %57 : vector<128x32xf32> to vector<128x32xbf16>
    %c0_34 = arith.constant 0 : index
    %c256 = arith.constant 256 : index
    %59 = vector.load %arg7[%c0_34, %c256] : memref<128x288xbf16, #tpu.memory_space<vmem>>, vector<128x32xbf16>
    tpu.vector_store %arg7[%c0_34, %c256], %58 {strides = array<i32>} : memref<128x288xbf16, #tpu.memory_space<vmem>>, vector<128x32xbf16>,
    %c0_35 = arith.constant 0 : index
    %c0_36 = arith.constant 0 : index
    %c0_37 = arith.constant 0 : index
    %c0_38 = arith.constant 0 : index
    %60 = vector.load %arg2[%c0_35, %c0_36, %c0_37, %c0_38] : memref<1x1x256x128xbf16, #tpu.memory_space<vmem>>, vector<1x1x128x128xbf16>
    %61 = vector.shape_cast %60 : vector<1x1x128x128xbf16> to vector<128x128xbf16>
    %62 = arith.extf %61 : vector<128x128xbf16> to vector<128x128xf32>
    %c0_39 = arith.constant 0 : index
    %c0_40 = arith.constant 0 : index
    %63 = vector.load %arg7[%c0_39, %c0_40] : memref<128x288xbf16, #tpu.memory_space<vmem>>, vector<128x288xbf16>
    %c0_41 = arith.constant 0 : index
    %c0_42 = arith.constant 0 : index
    %64 = vector.load %arg3[%c0_41, %c0_42] : memref<288x128xbf16, #tpu.memory_space<vmem>>, vector<288x128xbf16>
    %cst = arith.constant dense<0.000000e+00> : vector<128x128xf32>
    %65 = tpu.matmul %63, %64, %cst {dimension_numbers = #tpu.dot_dimension_numbers<[1], [0], [0], [1], [0, 0, 1, 1], [], []>} : vector<128x288xbf16>, vector<288x128xbf16>, vector<128x128xf32> -> vector<128x128xf32>
    %66 = arith.addf %62, %65 : vector<128x128xf32>
    %67 = vector.extract_strided_slice %66 {offsets = [0, 0], sizes = [128, 96], strides = [1, 1]} : vector<128x128xf32> to vector<128x96xf32>
    %68 = arith.negf %67 : vector<128x96xf32>
    %69 = math.exp %68 : vector<128x96xf32>
    %cst_43 = arith.constant 1.000000e+00 : f32
    %70 = vector.broadcast %cst_43 : f32 to vector<128x96xf32>
    %71 = arith.addf %70, %69 : vector<128x96xf32>
    %72 = arith.divf %70, %71 : vector<128x96xf32>
    %73 = vector.extract_strided_slice %72 {offsets = [0, 0], sizes = [128, 32], strides = [1, 1]} : vector<128x96xf32> to vector<128x32xf32>
    %74 = vector.extract_strided_slice %72 {offsets = [0, 32], sizes = [128, 32], strides = [1, 1]} : vector<128x96xf32> to vector<128x32xf32>
    %75 = vector.extract_strided_slice %72 {offsets = [0, 64], sizes = [128, 32], strides = [1, 1]} : vector<128x96xf32> to vector<128x32xf32>
    %76 = vector.extract_strided_slice %66 {offsets = [0, 96], sizes = [128, 32], strides = [1, 1]} : vector<128x128xf32> to vector<128x32xf32>
    %77 = math.tanh %76 : vector<128x32xf32>
    %c0_44 = arith.constant 0 : index
    %c0_45 = arith.constant 0 : index
    %78 = vector.load %arg6[%c0_44, %c0_45] : memref<256x32xf32, #tpu.memory_space<vmem>>, vector<128x32xf32>
    %79 = arith.mulf %74, %78 : vector<128x32xf32>
    %80 = arith.mulf %73, %77 : vector<128x32xf32>
    %81 = arith.addf %79, %80 : vector<128x32xf32>
    %82 = math.tanh %81 : vector<128x32xf32>
    %83 = arith.mulf %75, %82 : vector<128x32xf32>
    %c0_46 = arith.constant 0 : index
    %c0_47 = arith.constant 0 : index
    %84 = vector.load %arg6[%c0_46, %c0_47] : memref<256x32xf32, #tpu.memory_space<vmem>>, vector<128x32xf32>
    tpu.vector_store %arg6[%c0_46, %c0_47], %81 {strides = array<i32>} : memref<256x32xf32, #tpu.memory_space<vmem>>, vector<128x32xf32>,
    %85 = vector.shape_cast %83 : vector<128x32xf32> to vector<8x16x32xf32>
    %86 = arith.index_cast %4 : i32 to index
    %c1_48 = arith.constant 1 : index
    %c1_49 = arith.constant 1 : index
    %c0_50 = arith.constant 0 : index
    %87 = vector.load %arg5[%86, %c1_48, %c1_49, %c0_50] : memref<2x18x18x32xf32, #tpu.memory_space<vmem>>, vector<1x8x16x32xf32>
    %88 = vector.shape_cast %87 : vector<1x8x16x32xf32> to vector<8x16x32xf32>
    %89 = vector.shape_cast %85 : vector<8x16x32xf32> to vector<1x8x16x32xf32>
    tpu.vector_store %arg5[%86, %c1_48, %c1_49, %c0_50], %89 {strides = array<i32>} : memref<2x18x18x32xf32, #tpu.memory_space<vmem>>, vector<1x8x16x32xf32>,
    %90 = arith.extui %5 : i1 to i32
    %c0_i32_51 = arith.constant 0 : i32
    %91 = arith.cmpi ne, %90, %c0_i32_51 : i32
    scf.if %91 {
      %c0_112 = arith.constant 0 : index
      %c0_113 = arith.constant 0 : index
      %c0_114 = arith.constant 0 : index
      %178 = vector.load %arg4[%c0_112, %c0_113, %c0_114] : memref<1x256x32xf32, #tpu.memory_space<vmem>>, vector<1x128x32xf32>
      %179 = vector.shape_cast %178 : vector<1x128x32xf32> to vector<128x32xf32>
      %180 = vector.shape_cast %83 : vector<128x32xf32> to vector<1x128x32xf32>
      tpu.vector_store %arg4[%c0_112, %c0_113, %c0_114], %180 {strides = array<i32>} : memref<1x256x32xf32, #tpu.memory_space<vmem>>, vector<1x128x32xf32>,
    } else {
    }
    %92 = arith.index_cast %3 : i32 to index
    %c8 = arith.constant 8 : index
    %c0_52 = arith.constant 0 : index
    %c0_53 = arith.constant 0 : index
    %93 = vector.load %arg5[%92, %c8, %c0_52, %c0_53] : memref<2x18x18x32xf32, #tpu.memory_space<vmem>>, vector<1x8x16x32xf32>
    %94 = vector.shape_cast %93 : vector<1x8x16x32xf32> to vector<8x16x32xf32>
    %95 = vector.shape_cast %94 : vector<8x16x32xf32> to vector<128x32xf32>
    %96 = arith.truncf %95 : vector<128x32xf32> to vector<128x32xbf16>
    %c0_54 = arith.constant 0 : index
    %c0_55 = arith.constant 0 : index
    %97 = vector.load %arg7[%c0_54, %c0_55] : memref<128x288xbf16, #tpu.memory_space<vmem>>, vector<128x32xbf16>
    tpu.vector_store %arg7[%c0_54, %c0_55], %96 {strides = array<i32>} : memref<128x288xbf16, #tpu.memory_space<vmem>>, vector<128x32xbf16>,
    %98 = arith.index_cast %3 : i32 to index
    %c8_56 = arith.constant 8 : index
    %c1_57 = arith.constant 1 : index
    %c0_58 = arith.constant 0 : index
    %99 = vector.load %arg5[%98, %c8_56, %c1_57, %c0_58] : memref<2x18x18x32xf32, #tpu.memory_space<vmem>>, vector<1x8x16x32xf32>
    %100 = vector.shape_cast %99 : vector<1x8x16x32xf32> to vector<8x16x32xf32>
    %101 = vector.shape_cast %100 : vector<8x16x32xf32> to vector<128x32xf32>
    %102 = arith.truncf %101 : vector<128x32xf32> to vector<128x32xbf16>
    %c0_59 = arith.constant 0 : index
    %c32_60 = arith.constant 32 : index
    %103 = vector.load %arg7[%c0_59, %c32_60] : memref<128x288xbf16, #tpu.memory_space<vmem>>, vector<128x32xbf16>
    tpu.vector_store %arg7[%c0_59, %c32_60], %102 {strides = array<i32>} : memref<128x288xbf16, #tpu.memory_space<vmem>>, vector<128x32xbf16>,
    %104 = arith.index_cast %3 : i32 to index
    %c8_61 = arith.constant 8 : index
    %c2_62 = arith.constant 2 : index
    %c0_63 = arith.constant 0 : index
    %105 = vector.load %arg5[%104, %c8_61, %c2_62, %c0_63] : memref<2x18x18x32xf32, #tpu.memory_space<vmem>>, vector<1x8x16x32xf32>
    %106 = vector.shape_cast %105 : vector<1x8x16x32xf32> to vector<8x16x32xf32>
    %107 = vector.shape_cast %106 : vector<8x16x32xf32> to vector<128x32xf32>
    %108 = arith.truncf %107 : vector<128x32xf32> to vector<128x32xbf16>
    %c0_64 = arith.constant 0 : index
    %c64_65 = arith.constant 64 : index
    %109 = vector.load %arg7[%c0_64, %c64_65] : memref<128x288xbf16, #tpu.memory_space<vmem>>, vector<128x32xbf16>
    tpu.vector_store %arg7[%c0_64, %c64_65], %108 {strides = array<i32>} : memref<128x288xbf16, #tpu.memory_space<vmem>>, vector<128x32xbf16>,
    %110 = arith.index_cast %3 : i32 to index
    %c9 = arith.constant 9 : index
    %c0_66 = arith.constant 0 : index
    %c0_67 = arith.constant 0 : index
    %111 = vector.load %arg5[%110, %c9, %c0_66, %c0_67] : memref<2x18x18x32xf32, #tpu.memory_space<vmem>>, vector<1x8x16x32xf32>
    %112 = vector.shape_cast %111 : vector<1x8x16x32xf32> to vector<8x16x32xf32>
    %113 = vector.shape_cast %112 : vector<8x16x32xf32> to vector<128x32xf32>
    %114 = arith.truncf %113 : vector<128x32xf32> to vector<128x32xbf16>
    %c0_68 = arith.constant 0 : index
    %c96_69 = arith.constant 96 : index
    %115 = vector.load %arg7[%c0_68, %c96_69] : memref<128x288xbf16, #tpu.memory_space<vmem>>, vector<128x32xbf16>
    tpu.vector_store %arg7[%c0_68, %c96_69], %114 {strides = array<i32>} : memref<128x288xbf16, #tpu.memory_space<vmem>>, vector<128x32xbf16>,
    %116 = arith.index_cast %3 : i32 to index
    %c9_70 = arith.constant 9 : index
    %c1_71 = arith.constant 1 : index
    %c0_72 = arith.constant 0 : index
    %117 = vector.load %arg5[%116, %c9_70, %c1_71, %c0_72] : memref<2x18x18x32xf32, #tpu.memory_space<vmem>>, vector<1x8x16x32xf32>
    %118 = vector.shape_cast %117 : vector<1x8x16x32xf32> to vector<8x16x32xf32>
    %119 = vector.shape_cast %118 : vector<8x16x32xf32> to vector<128x32xf32>
    %120 = arith.truncf %119 : vector<128x32xf32> to vector<128x32xbf16>
    %c0_73 = arith.constant 0 : index
    %c128_74 = arith.constant 128 : index
    %121 = vector.load %arg7[%c0_73, %c128_74] : memref<128x288xbf16, #tpu.memory_space<vmem>>, vector<128x32xbf16>
    tpu.vector_store %arg7[%c0_73, %c128_74], %120 {strides = array<i32>} : memref<128x288xbf16, #tpu.memory_space<vmem>>, vector<128x32xbf16>,
    %122 = arith.index_cast %3 : i32 to index
    %c9_75 = arith.constant 9 : index
    %c2_76 = arith.constant 2 : index
    %c0_77 = arith.constant 0 : index
    %123 = vector.load %arg5[%122, %c9_75, %c2_76, %c0_77] : memref<2x18x18x32xf32, #tpu.memory_space<vmem>>, vector<1x8x16x32xf32>
    %124 = vector.shape_cast %123 : vector<1x8x16x32xf32> to vector<8x16x32xf32>
    %125 = vector.shape_cast %124 : vector<8x16x32xf32> to vector<128x32xf32>
    %126 = arith.truncf %125 : vector<128x32xf32> to vector<128x32xbf16>
    %c0_78 = arith.constant 0 : index
    %c160_79 = arith.constant 160 : index
    %127 = vector.load %arg7[%c0_78, %c160_79] : memref<128x288xbf16, #tpu.memory_space<vmem>>, vector<128x32xbf16>
    tpu.vector_store %arg7[%c0_78, %c160_79], %126 {strides = array<i32>} : memref<128x288xbf16, #tpu.memory_space<vmem>>, vector<128x32xbf16>,
    %128 = arith.index_cast %3 : i32 to index
    %c10 = arith.constant 10 : index
    %c0_80 = arith.constant 0 : index
    %c0_81 = arith.constant 0 : index
    %129 = vector.load %arg5[%128, %c10, %c0_80, %c0_81] : memref<2x18x18x32xf32, #tpu.memory_space<vmem>>, vector<1x8x16x32xf32>
    %130 = vector.shape_cast %129 : vector<1x8x16x32xf32> to vector<8x16x32xf32>
    %131 = vector.shape_cast %130 : vector<8x16x32xf32> to vector<128x32xf32>
    %132 = arith.truncf %131 : vector<128x32xf32> to vector<128x32xbf16>
    %c0_82 = arith.constant 0 : index
    %c192_83 = arith.constant 192 : index
    %133 = vector.load %arg7[%c0_82, %c192_83] : memref<128x288xbf16, #tpu.memory_space<vmem>>, vector<128x32xbf16>
    tpu.vector_store %arg7[%c0_82, %c192_83], %132 {strides = array<i32>} : memref<128x288xbf16, #tpu.memory_space<vmem>>, vector<128x32xbf16>,
    %134 = arith.index_cast %3 : i32 to index
    %c10_84 = arith.constant 10 : index
    %c1_85 = arith.constant 1 : index
    %c0_86 = arith.constant 0 : index
    %135 = vector.load %arg5[%134, %c10_84, %c1_85, %c0_86] : memref<2x18x18x32xf32, #tpu.memory_space<vmem>>, vector<1x8x16x32xf32>
    %136 = vector.shape_cast %135 : vector<1x8x16x32xf32> to vector<8x16x32xf32>
    %137 = vector.shape_cast %136 : vector<8x16x32xf32> to vector<128x32xf32>
    %138 = arith.truncf %137 : vector<128x32xf32> to vector<128x32xbf16>
    %c0_87 = arith.constant 0 : index
    %c224_88 = arith.constant 224 : index
    %139 = vector.load %arg7[%c0_87, %c224_88] : memref<128x288xbf16, #tpu.memory_space<vmem>>, vector<128x32xbf16>
    tpu.vector_store %arg7[%c0_87, %c224_88], %138 {strides = array<i32>} : memref<128x288xbf16, #tpu.memory_space<vmem>>, vector<128x32xbf16>,
    %140 = arith.index_cast %3 : i32 to index
    %c10_89 = arith.constant 10 : index
    %c2_90 = arith.constant 2 : index
    %c0_91 = arith.constant 0 : index
    %141 = vector.load %arg5[%140, %c10_89, %c2_90, %c0_91] : memref<2x18x18x32xf32, #tpu.memory_space<vmem>>, vector<1x8x16x32xf32>
    %142 = vector.shape_cast %141 : vector<1x8x16x32xf32> to vector<8x16x32xf32>
    %143 = vector.shape_cast %142 : vector<8x16x32xf32> to vector<128x32xf32>
    %144 = arith.truncf %143 : vector<128x32xf32> to vector<128x32xbf16>
    %c0_92 = arith.constant 0 : index
    %c256_93 = arith.constant 256 : index
    %145 = vector.load %arg7[%c0_92, %c256_93] : memref<128x288xbf16, #tpu.memory_space<vmem>>, vector<128x32xbf16>
    tpu.vector_store %arg7[%c0_92, %c256_93], %144 {strides = array<i32>} : memref<128x288xbf16, #tpu.memory_space<vmem>>, vector<128x32xbf16>,
    %c0_94 = arith.constant 0 : index
    %c0_95 = arith.constant 0 : index
    %c128_96 = arith.constant 128 : index
    %c0_97 = arith.constant 0 : index
    %146 = vector.load %arg2[%c0_94, %c0_95, %c128_96, %c0_97] : memref<1x1x256x128xbf16, #tpu.memory_space<vmem>>, vector<1x1x128x128xbf16>
    %147 = vector.shape_cast %146 : vector<1x1x128x128xbf16> to vector<128x128xbf16>
    %148 = arith.extf %147 : vector<128x128xbf16> to vector<128x128xf32>
    %c0_98 = arith.constant 0 : index
    %c0_99 = arith.constant 0 : index
    %149 = vector.load %arg7[%c0_98, %c0_99] : memref<128x288xbf16, #tpu.memory_space<vmem>>, vector<128x288xbf16>
    %c0_100 = arith.constant 0 : index
    %c0_101 = arith.constant 0 : index
    %150 = vector.load %arg3[%c0_100, %c0_101] : memref<288x128xbf16, #tpu.memory_space<vmem>>, vector<288x128xbf16>
    %cst_102 = arith.constant dense<0.000000e+00> : vector<128x128xf32>
    %151 = tpu.matmul %149, %150, %cst_102 {dimension_numbers = #tpu.dot_dimension_numbers<[1], [0], [0], [1], [0, 0, 1, 1], [], []>} : vector<128x288xbf16>, vector<288x128xbf16>, vector<128x128xf32> -> vector<128x128xf32>
    %152 = arith.addf %148, %151 : vector<128x128xf32>
    %153 = vector.extract_strided_slice %152 {offsets = [0, 0], sizes = [128, 96], strides = [1, 1]} : vector<128x128xf32> to vector<128x96xf32>
    %154 = arith.negf %153 : vector<128x96xf32>
    %155 = math.exp %154 : vector<128x96xf32>
    %cst_103 = arith.constant 1.000000e+00 : f32
    %156 = vector.broadcast %cst_103 : f32 to vector<128x96xf32>
    %157 = arith.addf %156, %155 : vector<128x96xf32>
    %158 = arith.divf %156, %157 : vector<128x96xf32>
    %159 = vector.extract_strided_slice %158 {offsets = [0, 0], sizes = [128, 32], strides = [1, 1]} : vector<128x96xf32> to vector<128x32xf32>
    %160 = vector.extract_strided_slice %158 {offsets = [0, 32], sizes = [128, 32], strides = [1, 1]} : vector<128x96xf32> to vector<128x32xf32>
    %161 = vector.extract_strided_slice %158 {offsets = [0, 64], sizes = [128, 32], strides = [1, 1]} : vector<128x96xf32> to vector<128x32xf32>
    %162 = vector.extract_strided_slice %152 {offsets = [0, 96], sizes = [128, 32], strides = [1, 1]} : vector<128x128xf32> to vector<128x32xf32>
    %163 = math.tanh %162 : vector<128x32xf32>
    %c128_104 = arith.constant 128 : index
    %c0_105 = arith.constant 0 : index
    %164 = vector.load %arg6[%c128_104, %c0_105] : memref<256x32xf32, #tpu.memory_space<vmem>>, vector<128x32xf32>
    %165 = arith.mulf %160, %164 : vector<128x32xf32>
    %166 = arith.mulf %159, %163 : vector<128x32xf32>
    %167 = arith.addf %165, %166 : vector<128x32xf32>
    %168 = math.tanh %167 : vector<128x32xf32>
    %169 = arith.mulf %161, %168 : vector<128x32xf32>
    %c128_106 = arith.constant 128 : index
    %c0_107 = arith.constant 0 : index
    %170 = vector.load %arg6[%c128_106, %c0_107] : memref<256x32xf32, #tpu.memory_space<vmem>>, vector<128x32xf32>
    tpu.vector_store %arg6[%c128_106, %c0_107], %167 {strides = array<i32>} : memref<256x32xf32, #tpu.memory_space<vmem>>, vector<128x32xf32>,
    %171 = vector.shape_cast %169 : vector<128x32xf32> to vector<8x16x32xf32>
    %172 = arith.index_cast %4 : i32 to index
    %c9_108 = arith.constant 9 : index
    %c1_109 = arith.constant 1 : index
    %c0_110 = arith.constant 0 : index
    %173 = vector.load %arg5[%172, %c9_108, %c1_109, %c0_110] : memref<2x18x18x32xf32, #tpu.memory_space<vmem>>, vector<1x8x16x32xf32>
    %174 = vector.shape_cast %173 : vector<1x8x16x32xf32> to vector<8x16x32xf32>
    %175 = vector.shape_cast %171 : vector<8x16x32xf32> to vector<1x8x16x32xf32>
    tpu.vector_store %arg5[%172, %c9_108, %c1_109, %c0_110], %175 {strides = array<i32>} : memref<2x18x18x32xf32, #tpu.memory_space<vmem>>, vector<1x8x16x32xf32>,
    %176 = arith.extui %5 : i1 to i32
    %c0_i32_111 = arith.constant 0 : i32
    %177 = arith.cmpi ne, %176, %c0_i32_111 : i32
    scf.if %177 {
      %c0_112 = arith.constant 0 : index
      %c128_113 = arith.constant 128 : index
      %c0_114 = arith.constant 0 : index
      %178 = vector.load %arg4[%c0_112, %c128_113, %c0_114] : memref<1x256x32xf32, #tpu.memory_space<vmem>>, vector<1x128x32xf32>
      %179 = vector.shape_cast %178 : vector<1x128x32xf32> to vector<128x32xf32>
      %180 = vector.shape_cast %169 : vector<128x32xf32> to vector<1x128x32xf32>
      tpu.vector_store %arg4[%c0_112, %c128_113, %c0_114], %180 {strides = array<i32>} : memref<1x256x32xf32, #tpu.memory_space<vmem>>, vector<1x128x32xf32>,
    } else {
    }
    return
  }
  func.func @transform_0(%arg0: i32, %arg1: i32) -> (i32, i32, i32, i32) {
    %c0_i32 = arith.constant 0 : i32
    %c0_i32_0 = arith.constant 0 : i32
    %c0_i32_1 = arith.constant 0 : i32
    return %arg0, %arg1, %c0_i32, %c0_i32_0 : i32, i32, i32, i32
  }
  func.func @transform_1(%arg0: i32, %arg1: i32) -> (i32, i32) {
    %c0_i32 = arith.constant 0 : i32
    %c0_i32_0 = arith.constant 0 : i32
    %c0_i32_1 = arith.constant 0 : i32
    return %c0_i32, %c0_i32_0 : i32, i32
  }
  func.func @transform_2(%arg0: i32, %arg1: i32) -> (i32, i32, i32) {
    %c0_i32 = arith.constant 0 : i32
    %c0_i32_0 = arith.constant 0 : i32
    %c0_i32_1 = arith.constant 0 : i32
    return %arg0, %c0_i32, %c0_i32_0 : i32, i32, i32
  }
}

</mosaic_0001>

<bundles_post_ra>
// kernel: convlstm_net_pallas.1
= control target key start
LH: loop header
LB: loop body
LE: loop exit
PB: predicated region body
PF: predicated region fallthrough
CT: control target
= control target key end

     0   :  { %s6682_s9 = smov 0   ;;  %s6684_s10 = smov 0   ;;  %s9007_s0 = inlined_call_operand.vmem [shape: bf16[2,8,256,128], index: 0, kind: input, shape index: {}]   ;;  %s9008_s1 = inlined_call_operand.vmem [shape: bf16[288,128], index: 1, kind: input, shape index: {}]   ;;  %s9009_s2 = inlined_call_operand.vmem [shape: f32[2,256,32], index: 2, kind: output, shape index: {}]  }
   0x1   :  { %s6686_s11 = smov 0   ;;  %s6688_s12 = smov 0  }
   0x2   :  { %s6690_s13 = smov 0  }
   0x3 LB: > { %s21_s14 = sadd.s32 1, %s6653_s11  ;;  %s24_s15 = sadd.s32 1, %s6657_s12  ;;  %s6661_s13 = sphi %s6690_s13, %s12_s13   ;;  %s6657_s12 = sphi %s6688_s12, %s9013_s12   ;;  %s6653_s11 = sphi %s6686_s11, %s9012_s11   ;;  %s6649_s10 = sphi %s6684_s10, %s9011_s10   ;;  %s6645_s9 = sphi %s6682_s9, %s9010_s9  }
   0x4   : > { %p22_p0 = scmp.ge.s32.totalorder %s21_s14, 8  ;;  %p4971_p1 = scmp.ge.s32.totalorder %s6661_s13, 1 }
   0x5   : > { %p130_p2 = scmp.lt.s32.totalorder %s6661_s13, 17 }
   0x6   : > { %s9015_s14 = smov (%p22_p0, %s21_s14), 0  ;;  %s9017_s15 = smov (!%p22_p0, %s24_s15), %s6657_s12 }
   0x7   : > { %p131_p3 = pnand %p4971_p1, %p130_p2  ;;  %p26_p4 = scmp.ge.s32.totalorder %s9017_s15, 2 }
   0x8   : > { %p156_p5 = scmp.lt.s32.totalorder (!%p131_p3), %s6649_s10, 1  ;;  %p158_p6 = scmp.lt.s32.totalorder (!%p131_p3), %s6645_s9, 7 }
   0x9   : > { %s9019_s15 = smov (%p26_p4, %s9017_s15), 0  ;;  %134 = sbr.rel (%p131_p3) target bundleno = 2174 (0x87e), region = 28 }
   0xa   : > { %p4977_p7 = scmp.ne.s32.totalorder (!%p131_p3), %s6645_s9, 0 }
   0xe   : > { %s9021_s10 = smov (!%p156_p5, %s6649_s10), 1 }
   0xf   : > { %s159_s16 = scalar_select %p158_p6, %s6645_s9, 7 }
  0x10   : > { %s4973_s17 = sshll.u32 %s9021_s10, 8  ;;  %174 = sbr.rel (%p4977_p7) target bundleno = 92 (0x5c), region = 32 }
  0x11   : > { %s4972_s18 = sshll.u32 %s159_s16, 5  ;;  %s6719_s21 = scalar_lea.vmem %s9009_s2, %s4973_s17 }
  0x12   : > { %s162_s22 = sadd.s32 %s4973_s17, %s4972_s18 }
  0x13   : > { %s4974_s23 = sshll.u32 %s162_s22, 2 }
  0x14   : > { %s6724_s26 = scalar_lea.vmem %s9007_s0, %s4974_s23 }
  0x15   : > { %vm175_vm0 = vcmask 261120   ;;  %vm178_vm1 = vcmask 254976   ;;  %v6663_v0 = vmov 0.0  }
  0x16   : > { %176 = vst.msk [vmem:[#allocation2] sm:$0xff] %vm175_vm0, %v6663_v0  ;;  %177 = vst.msk [vmem:[#allocation2 + $0x8] sm:$0xff] %vm175_vm0, %v6663_v0 }
  0x17   : > { %180 = vst.msk [vmem:[#allocation2 + $0x18] sm:$0xff] %vm175_vm0, %v6663_v0  ;;  %181 = vst.msk [vmem:[#allocation2 + $0x20] sm:$0xff] %vm175_vm0, %v6663_v0 }
  0x18   : > { %183 = vst.msk [vmem:[#allocation2 + $0x30] sm:$0xff] %vm175_vm0, %v6663_v0  ;;  %184 = vst.msk [vmem:[#allocation2 + $0x38] sm:$0xff] %vm175_vm0, %v6663_v0 }
  0x19   : > { %186 = vst.msk [vmem:[#allocation2 + $0x48] sm:$0xff] %vm175_vm0, %v6663_v0  ;;  %187 = vst.msk [vmem:[#allocation2 + $0x50] sm:$0xff] %vm175_vm0, %v6663_v0 }
  0x1a   : > { %189 = vst.msk [vmem:[#allocation2 + $0x60] sm:$0xff] %vm175_vm0, %v6663_v0  ;;  %190 = vst.msk [vmem:[#allocation2 + $0x68] sm:$0xff] %vm175_vm0, %v6663_v0 }
  0x1b   : > { %192 = vst.msk [vmem:[#allocation2 + $0x78] sm:$0xff] %vm175_vm0, %v6663_v0  ;;  %193 = vst.msk [vmem:[#allocation2 + $0x80] sm:$0xff] %vm175_vm0, %v6663_v0 }
  0x1c   : > { %195 = vst.msk [vmem:[#allocation2 + $0x90] sm:$0xff] %vm175_vm0, %v6663_v0  ;;  %196 = vst.msk [vmem:[#allocation2 + $0x98] sm:$0xff] %vm175_vm0, %v6663_v0 }
  0x1d   : > { %198 = vst.msk [vmem:[#allocation2 + $0xa8] sm:$0xff] %vm175_vm0, %v6663_v0  ;;  %199 = vst.msk [vmem:[#allocation2 + $0xb0] sm:$0xff] %vm175_vm0, %v6663_v0 }
  0x1e   : > { %201 = vst.msk [vmem:[#allocation2 + $0xc0] sm:$0xff] %vm175_vm0, %v6663_v0  ;;  %202 = vst.msk [vmem:[#allocation2 + $0xc8] sm:$0xff] %vm175_vm0, %v6663_v0 }
  0x1f   : > { %204 = vst.msk [vmem:[#allocation2 + $0xd8] sm:$0xff] %vm175_vm0, %v6663_v0  ;;  %205 = vst.msk [vmem:[#allocation2 + $0xe0] sm:$0xff] %vm175_vm0, %v6663_v0 }
  0x20   : > { %207 = vst.msk [vmem:[#allocation2 + $0xf0] sm:$0xff] %vm175_vm0, %v6663_v0  ;;  %208 = vst.msk [vmem:[#allocation2 + $0xf8] sm:$0xff] %vm175_vm0, %v6663_v0 }
  0x21   : > { %210 = vst.msk [vmem:[#allocation2 + $0x108] sm:$0xff] %vm175_vm0, %v6663_v0  ;;  %211 = vst.msk [vmem:[#allocation2 + $0x110] sm:$0xff] %vm175_vm0, %v6663_v0 }
  0x22   : > { %213 = vst.msk [vmem:[#allocation2 + $0x120] sm:$0xff] %vm175_vm0, %v6663_v0  ;;  %214 = vst.msk [vmem:[#allocation2 + $0x128] sm:$0xff] %vm175_vm0, %v6663_v0 }
  0x23   : > { %216 = vst.msk [vmem:[#allocation2 + $0x138] sm:$0xff] %vm175_vm0, %v6663_v0  ;;  %217 = vst.msk [vmem:[#allocation2 + $0x140] sm:$0xff] %vm175_vm0, %v6663_v0 }
  0x24   : > { %219 = vst.msk [vmem:[#allocation2 + $0x150] sm:$0xff] %vm175_vm0, %v6663_v0  ;;  %220 = vst.msk [vmem:[#allocation2 + $0x158] sm:$0xff] %vm175_vm0, %v6663_v0 }
  0x25   : > { %222 = vst.msk [vmem:[#allocation2 + $0x168] sm:$0xff] %vm175_vm0, %v6663_v0  ;;  %223 = vst.msk [vmem:[#allocation2 + $0x170] sm:$0xff] %vm175_vm0, %v6663_v0 }
  0x26   : > { %225 = vst.msk [vmem:[#allocation2 + $0x180] sm:$0xff] %vm175_vm0, %v6663_v0  ;;  %226 = vst.msk [vmem:[#allocation2 + $0x188] sm:$0xff] %vm175_vm0, %v6663_v0 }
  0x27   : > { %228 = vst.msk [vmem:[#allocation2 + $0x198] sm:$0xff] %vm175_vm0, %v6663_v0  ;;  %229 = vst.msk [vmem:[#allocation2 + $0x1a0] sm:$0xff] %vm175_vm0, %v6663_v0 }
  0x28   : > { %231 = vst.msk [vmem:[#allocation2 + $0x1b0] sm:$0xff] %vm175_vm0, %v6663_v0  ;;  %232 = vst.msk [vmem:[#allocation2 + $0x1b8] sm:$0xff] %vm175_vm0, %v6663_v0 }
  0x29   : > { %234 = vst.msk [vmem:[#allocation2 + $0x1c8] sm:$0xff] %vm175_vm0, %v6663_v0  ;;  %235 = vst.msk [vmem:[#allocation2 + $0x1d0] sm:$0xff] %vm175_vm0, %v6663_v0 }
  0x2a   : > { %237 = vst.msk [vmem:[#allocation2 + $0x1e0] sm:$0xff] %vm175_vm0, %v6663_v0  ;;  %238 = vst.msk [vmem:[#allocation2 + $0x1e8] sm:$0xff] %vm175_vm0, %v6663_v0 }
  0x2b   : > { %240 = vst.msk [vmem:[#allocation2 + $0x1f8] sm:$0xff] %vm175_vm0, %v6663_v0  ;;  %241 = vst.msk [vmem:[#allocation2 + $0x200] sm:$0xff] %vm175_vm0, %v6663_v0 }
  0x2c   : > { %243 = vst.msk [vmem:[#allocation2 + $0x210] sm:$0xff] %vm175_vm0, %v6663_v0  ;;  %244 = vst.msk [vmem:[#allocation2 + $0x218] sm:$0xff] %vm175_vm0, %v6663_v0 }
  0x2d   : > { %246 = vst.msk [vmem:[#allocation2 + $0x228] sm:$0xff] %vm175_vm0, %v6663_v0  ;;  %247 = vst.msk [vmem:[#allocation2 + $0x230] sm:$0xff] %vm175_vm0, %v6663_v0 }
  0x2e   : > { %249 = vst.msk [vmem:[#allocation2 + $0x240] sm:$0xff] %vm175_vm0, %v6663_v0  ;;  %250 = vst.msk [vmem:[#allocation2 + $0x248] sm:$0xff] %vm175_vm0, %v6663_v0 }
  0x2f   : > { %252 = vst.msk [vmem:[#allocation2 + $0x258] sm:$0xff] %vm175_vm0, %v6663_v0  ;;  %253 = vst.msk [vmem:[#allocation2 + $0x260] sm:$0xff] %vm175_vm0, %v6663_v0 }
  0x30   : > { %255 = vst.msk [vmem:[#allocation2 + $0x270] sm:$0xff] %vm175_vm0, %v6663_v0  ;;  %256 = vst.msk [vmem:[#allocation2 + $0x278] sm:$0xff] %vm175_vm0, %v6663_v0 }
  0x31   : > { %258 = vst.msk [vmem:[#allocation2 + $0x288] sm:$0xff] %vm175_vm0, %v6663_v0  ;;  %259 = vst.msk [vmem:[#allocation2 + $0x290] sm:$0xff] %vm175_vm0, %v6663_v0 }
  0x32   : > { %261 = vst.msk [vmem:[#allocation2 + $0x2a0] sm:$0xff] %vm175_vm0, %v6663_v0  ;;  %262 = vst.msk [vmem:[#allocation2 + $0x2a8] sm:$0xff] %vm175_vm0, %v6663_v0 }
  0x33   : > { %264 = vst.msk [vmem:[#allocation2 + $0x2b8] sm:$0xff] %vm175_vm0, %v6663_v0  ;;  %265 = vst.msk [vmem:[#allocation2 + $0x2c0] sm:$0xff] %vm175_vm0, %v6663_v0 }
  0x34   : > { %267 = vst.msk [vmem:[#allocation2 + $0x2d0] sm:$0xff] %vm175_vm0, %v6663_v0  ;;  %268 = vst.msk [vmem:[#allocation2 + $0x2d8] sm:$0xff] %vm175_vm0, %v6663_v0 }
  0x35   : > { %270 = vst.msk [vmem:[#allocation2 + $0x2e8] sm:$0xff] %vm175_vm0, %v6663_v0  ;;  %271 = vst.msk [vmem:[#allocation2 + $0x2f0] sm:$0xff] %vm175_vm0, %v6663_v0 }
  0x36   : > { %273 = vst.msk [vmem:[#allocation2 + $0x300] sm:$0xff] %vm175_vm0, %v6663_v0  ;;  %274 = vst.msk [vmem:[#allocation2 + $0x308] sm:$0xff] %vm175_vm0, %v6663_v0 }
  0x37   : > { %276 = vst.msk [vmem:[#allocation2 + $0x318] sm:$0xff] %vm175_vm0, %v6663_v0  ;;  %277 = vst.msk [vmem:[#allocation2 + $0x320] sm:$0xff] %vm175_vm0, %v6663_v0 }
  0x38   : > { %279 = vst.msk [vmem:[#allocation2 + $0x330] sm:$0xff] %vm175_vm0, %v6663_v0  ;;  %280 = vst.msk [vmem:[#allocation2 + $0x338] sm:$0xff] %vm175_vm0, %v6663_v0 }
  0x39   : > { %282 = vst.msk [vmem:[#allocation2 + $0x348] sm:$0xff] %vm175_vm0, %v6663_v0  ;;  %283 = vst.msk [vmem:[#allocation2 + $0x350] sm:$0xff] %vm175_vm0, %v6663_v0 }
  0x3a   : > { %285 = vst.msk [vmem:[#allocation3] sm:$0xff] %vm175_vm0, %v6663_v0  ;;  %286 = vst.msk [vmem:[#allocation3 + $0x8] sm:$0xff] %vm175_vm0, %v6663_v0 }
  0x3b   : > { %287 = vst.msk [vmem:[#allocation3 + $0x10] sm:$0xff] %vm175_vm0, %v6663_v0  ;;  %288 = vst.msk [vmem:[#allocation3 + $0x18] sm:$0xff] %vm175_vm0, %v6663_v0 }
  0x3c   : > { %289 = vst.msk [vmem:[#allocation3 + $0x20] sm:$0xff] %vm175_vm0, %v6663_v0  ;;  %290 = vst.msk [vmem:[#allocation3 + $0x28] sm:$0xff] %vm175_vm0, %v6663_v0 }
  0x3d   : > { %291 = vst.msk [vmem:[#allocation3 + $0x30] sm:$0xff] %vm175_vm0, %v6663_v0  ;;  %292 = vst.msk [vmem:[#allocation3 + $0x38] sm:$0xff] %vm175_vm0, %v6663_v0 }
  0x3e   : > { %293 = vst.msk [vmem:[#allocation3 + $0x40] sm:$0xff] %vm175_vm0, %v6663_v0  ;;  %294 = vst.msk [vmem:[#allocation3 + $0x48] sm:$0xff] %vm175_vm0, %v6663_v0 }
  0x3f   : > { %295 = vst.msk [vmem:[#allocation3 + $0x50] sm:$0xff] %vm175_vm0, %v6663_v0  ;;  %296 = vst.msk [vmem:[#allocation3 + $0x58] sm:$0xff] %vm175_vm0, %v6663_v0 }
  0x40   : > { %297 = vst.msk [vmem:[#allocation3 + $0x60] sm:$0xff] %vm175_vm0, %v6663_v0  ;;  %298 = vst.msk [vmem:[#allocation3 + $0x68] sm:$0xff] %vm175_vm0, %v6663_v0 }
  0x41   : > { %299 = vst.msk [vmem:[#allocation3 + $0x70] sm:$0xff] %vm175_vm0, %v6663_v0  ;;  %300 = vst.msk [vmem:[#allocation3 + $0x78] sm:$0xff] %vm175_vm0, %v6663_v0 }
  0x42   : > { %301 = vst.msk [vmem:[#allocation3 + $0x80] sm:$0xff] %vm175_vm0, %v6663_v0  ;;  %302 = vst.msk [vmem:[#allocation3 + $0x88] sm:$0xff] %vm175_vm0, %v6663_v0 }
  0x43   : > { %303 = vst.msk [vmem:[#allocation3 + $0x90] sm:$0xff] %vm175_vm0, %v6663_v0  ;;  %304 = vst.msk [vmem:[#allocation3 + $0x98] sm:$0xff] %vm175_vm0, %v6663_v0 }
  0x44   : > { %305 = vst.msk [vmem:[#allocation3 + $0xa0] sm:$0xff] %vm175_vm0, %v6663_v0  ;;  %306 = vst.msk [vmem:[#allocation3 + $0xa8] sm:$0xff] %vm175_vm0, %v6663_v0 }
  0x45   : > { %307 = vst.msk [vmem:[#allocation3 + $0xb0] sm:$0xff] %vm175_vm0, %v6663_v0  ;;  %308 = vst.msk [vmem:[#allocation3 + $0xb8] sm:$0xff] %vm175_vm0, %v6663_v0 }
  0x46   : > { %309 = vst.msk [vmem:[#allocation3 + $0xc0] sm:$0xff] %vm175_vm0, %v6663_v0  ;;  %310 = vst.msk [vmem:[#allocation3 + $0xc8] sm:$0xff] %vm175_vm0, %v6663_v0 }
  0x47   : > { %311 = vst.msk [vmem:[#allocation3 + $0xd0] sm:$0xff] %vm175_vm0, %v6663_v0  ;;  %312 = vst.msk [vmem:[#allocation3 + $0xd8] sm:$0xff] %vm175_vm0, %v6663_v0 }
  0x48   : > { %313 = vst.msk [vmem:[#allocation3 + $0xe0] sm:$0xff] %vm175_vm0, %v6663_v0  ;;  %314 = vst.msk [vmem:[#allocation3 + $0xe8] sm:$0xff] %vm175_vm0, %v6663_v0 }
  0x49   : > { %315 = vst.msk [vmem:[#allocation3 + $0xf0] sm:$0xff] %vm175_vm0, %v6663_v0  ;;  %316 = vst.msk [vmem:[#allocation3 + $0xf8] sm:$0xff] %vm175_vm0, %v6663_v0 }
  0x4a   : > { %179 = vst.msk [vmem:[#allocation2 + $0x10] sm:$0x3] %vm178_vm1, %v6663_v0  ;;  %182 = vst.msk [vmem:[#allocation2 + $0x28] sm:$0x3] %vm178_vm1, %v6663_v0 }
  0x4b   : > { %185 = vst.msk [vmem:[#allocation2 + $0x40] sm:$0x3] %vm178_vm1, %v6663_v0  ;;  %188 = vst.msk [vmem:[#allocation2 + $0x58] sm:$0x3] %vm178_vm1, %v6663_v0 }
  0x4c   : > { %191 = vst.msk [vmem:[#allocation2 + $0x70] sm:$0x3] %vm178_vm1, %v6663_v0  ;;  %194 = vst.msk [vmem:[#allocation2 + $0x88] sm:$0x3] %vm178_vm1, %v6663_v0 }
  0x4d   : > { %197 = vst.msk [vmem:[#allocation2 + $0xa0] sm:$0x3] %vm178_vm1, %v6663_v0  ;;  %200 = vst.msk [vmem:[#allocation2 + $0xb8] sm:$0x3] %vm178_vm1, %v6663_v0 }
  0x4e   : > { %203 = vst.msk [vmem:[#allocation2 + $0xd0] sm:$0x3] %vm178_vm1, %v6663_v0  ;;  %206 = vst.msk [vmem:[#allocation2 + $0xe8] sm:$0x3] %vm178_vm1, %v6663_v0 }
  0x4f   : > { %209 = vst.msk [vmem:[#allocation2 + $0x100] sm:$0x3] %vm178_vm1, %v6663_v0  ;;  %212 = vst.msk [vmem:[#allocation2 + $0x118] sm:$0x3] %vm178_vm1, %v6663_v0 }
  0x50   : > { %215 = vst.msk [vmem:[#allocation2 + $0x130] sm:$0x3] %vm178_vm1, %v6663_v0  ;;  %218 = vst.msk [vmem:[#allocation2 + $0x148] sm:$0x3] %vm178_vm1, %v6663_v0 }
  0x51   : > { %221 = vst.msk [vmem:[#allocation2 + $0x160] sm:$0x3] %vm178_vm1, %v6663_v0  ;;  %224 = vst.msk [vmem:[#allocation2 + $0x178] sm:$0x3] %vm178_vm1, %v6663_v0 }
  0x52   : > { %227 = vst.msk [vmem:[#allocation2 + $0x190] sm:$0x3] %vm178_vm1, %v6663_v0  ;;  %230 = vst.msk [vmem:[#allocation2 + $0x1a8] sm:$0x3] %vm178_vm1, %v6663_v0 }
  0x53   : > { %233 = vst.msk [vmem:[#allocation2 + $0x1c0] sm:$0x3] %vm178_vm1, %v6663_v0  ;;  %236 = vst.msk [vmem:[#allocation2 + $0x1d8] sm:$0x3] %vm178_vm1, %v6663_v0 }
  0x54   : > { %239 = vst.msk [vmem:[#allocation2 + $0x1f0] sm:$0x3] %vm178_vm1, %v6663_v0  ;;  %242 = vst.msk [vmem:[#allocation2 + $0x208] sm:$0x3] %vm178_vm1, %v6663_v0 }
  0x55   : > { %245 = vst.msk [vmem:[#allocation2 + $0x220] sm:$0x3] %vm178_vm1, %v6663_v0  ;;  %248 = vst.msk [vmem:[#allocation2 + $0x238] sm:$0x3] %vm178_vm1, %v6663_v0 }
  0x56   : > { %251 = vst.msk [vmem:[#allocation2 + $0x250] sm:$0x3] %vm178_vm1, %v6663_v0  ;;  %254 = vst.msk [vmem:[#allocation2 + $0x268] sm:$0x3] %vm178_vm1, %v6663_v0 }
  0x57   : > { %257 = vst.msk [vmem:[#allocation2 + $0x280] sm:$0x3] %vm178_vm1, %v6663_v0  ;;  %260 = vst.msk [vmem:[#allocation2 + $0x298] sm:$0x3] %vm178_vm1, %v6663_v0 }
  0x58   : > { %263 = vst.msk [vmem:[#allocation2 + $0x2b0] sm:$0x3] %vm178_vm1, %v6663_v0  ;;  %266 = vst.msk [vmem:[#allocation2 + $0x2c8] sm:$0x3] %vm178_vm1, %v6663_v0 }
  0x59   : > { %269 = vst.msk [vmem:[#allocation2 + $0x2e0] sm:$0x3] %vm178_vm1, %v6663_v0  ;;  %272 = vst.msk [vmem:[#allocation2 + $0x2f8] sm:$0x3] %vm178_vm1, %v6663_v0 }
  0x5a   : > { %275 = vst.msk [vmem:[#allocation2 + $0x310] sm:$0x3] %vm178_vm1, %v6663_v0  ;;  %278 = vst.msk [vmem:[#allocation2 + $0x328] sm:$0x3] %vm178_vm1, %v6663_v0 }
  0x5b   : > { %281 = vst.msk [vmem:[#allocation2 + $0x340] sm:$0x3] %vm178_vm1, %v6663_v0  ;;  %284 = vst.msk [vmem:[#allocation2 + $0x358] sm:$0x3] %vm178_vm1, %v6663_v0 }
  0x5c PF: > { %p317_p8 = scmp.lt.s32.totalorder %s6645_s9, 0  ;;  %s318_s27 = ssub.s32 0, %s6645_s9  ;;  %v6279_v1 = vld [vmem:[%s9008_s1 + $0x78] sm:$0xff]   ;;  %v6281_v3 = vld [vmem:[%s9008_s1 + $0x70] sm:$0xff]   ;;  %v6283_v5 = vld [vmem:[%s9008_s1 + $0x68] sm:$0xff]   ;;  %vm407_vm2 = vcmask 257024  }
  0x5d   : > { %s4978_s28 = smin.u32 %s6645_s9, %s318_s27  ;;  %v6280_v2 = vld [vmem:[%s9008_s1 + $0x38] sm:$0xff]   ;;  %6043 = vmatprep.subr.bf16.mxu0 %v6279_v1  ;;  %v6282_v4 = vld [vmem:[%s9008_s1 + $0x30] sm:$0xff]   ;;  %v6284_v6 = vld [vmem:[%s9008_s1 + $0x28] sm:$0xff]   ;;  %s6664_s29 = smov 32   ;;  %vm1719_vm3 = vcmask 261120   ;;  %vm536_vm4 = vcmask 519424  }
  0x5e   : > { %s320_s3 = sand.u32 1, %s4978_s28   ;;  %6044 = vmatpush3.bf16.msra.mxu0 %v6280_v2  ;;  %v6285_v7 = vld [vmem:[%s9008_s1 + $0x60] sm:$0xff]   ;;  %s6665_s30 = smov 64   ;;  %vm665_vm5 = vcmask 781824   ;;  %vm796_vm6 = vcmask 1044224  }
  0x5f   : > { %s321_s8 = ssub.s32 0, %s320_s3  ;;  %6045 = vmatprep.subr.bf16.mxu0 %v6281_v3  ;;  %v6286_v21 = vld [vmem:[%s9008_s1 + $0x20] sm:$0xff]   ;;  %s6666_s16 = smov 96  }
  0x60   : > { %s9023_s8 = smov (!%p317_p8, %s321_s8), %s320_s3  ;;  %p5301_p9 = scmp.ne.s32.totalorder %s6645_s9, 7 }
  0x61   : > { %s325_s19 = smul.u32 432, %s9023_s8  ;;  %s323_s10 = ssub.s32 1, %s9023_s8 }
  0x62   : > { %6046 = vmatpush3.bf16.msra.mxu0 %v6282_v4  ;;  %s4917_s17 = smul.u32 432, %s323_s10 }
  0x63   : > { %s7034_s25 = scalar_lea.vmem [#allocation2], %s325_s19  ;;  %6047 = vmatprep.subr.bf16.mxu0 %v6283_v5 }
  0x64   : > { %v5091_v8 = vld [vmem:[%s7034_s25 + $0x1a] sm:$0xff]  ;;  %v5092_v10 = vld [vmem:[%s7034_s25 + $0x22] sm:$0xff]  ;;  %v7043_v14 = vld [vmem:[%s7034_s25 + $0xa] sm:$0xff]  ;;  %s7930_s18 = scalar_lea.vmem [#allocation2], %s4917_s17 }
  0x65   : > { %v424_v9 = vld [vmem:[%s7034_s25 + $0x1] sm:$0xff]  ;;  %v7039_v11 = vpack.c.bf16 %v5091_v8, %v5091_v8  ;;  %v425_v13 = vld [vmem:[%s7034_s25 + $0x9] sm:$0xff]  ;;  %v7048_v16 = vpack.c.bf16 %v5092_v10, %v5092_v10  ;;  %v5124_v18 = vld [vmem:[%s7034_s25 + $0x38] sm:$0xff]  ;;  %v5709_v32 = vpack.c.bf16 %v7043_v14, %v7043_v14 }
  0x66   : > { %v5692_v12 = vpack.c.bf16 %v424_v9, %v424_v9  ;;  %v7046_v15 = vld [vmem:[%s7034_s25 + $0x2] sm:$0xff]  ;;  %v5693_v17 = vpack.c.bf16 %v425_v13, %v425_v13  ;;  %v5123_v19 = vld [vmem:[%s7034_s25 + $0x30] sm:$0xff]  ;;  %v7059_v22 = vpack.c.bf16 %v5124_v18, %v5124_v18  ;;  %v5027_v25 = vld [vmem:[%s7034_s25 + $0x18] sm:$0xff]  ;;  %6048 = vmatpush3.bf16.msra.mxu0 %v6284_v6 }
  0x67   : > { %v5028_v20 = vld [vmem:[%s7034_s25 + $0x20] sm:$0xff]  ;;  %973 = vrot.lane.b32.xlu1 %v7039_v11, %s6664_s29  ;;  %v7061_v23 = vpack.c.bf16 %v5123_v19, %v5123_v19  ;;  %v7067_v27 = vpack.c.bf16 %v5027_v25, %v5027_v25  ;;  %v5155_v29 = vld [vmem:[%s7034_s25 + $0x31] sm:$0xff]  ;;  %6049 = vmatprep.subr.bf16.mxu0 %v6285_v7  ;;  %v5708_v39 = vpack.c.bf16 %v7046_v15, %v7046_v15  ;;  %v5125_v43 = vld [vmem:[%s7034_s25 + $0x48] sm:$0xff] }
  0x68   : > { %488 = vrot.lane.b32.xlu0 %v5692_v12, %s6664_s29  ;;  %v7063_v24 = vpack.c.bf16 %v5028_v20, %v5028_v20  ;;  %v5156_v26 = vld [vmem:[%s7034_s25 + $0x39] sm:$0xff]  ;;  %v427_v30 = vld [vmem:[%s7034_s25 + $0x21] sm:$0xff]  ;;  %v7076_v33 = vpack.c.bf16 %v5155_v29, %v5155_v29  ;;  %v5126_v38 = vld [vmem:[%s7034_s25 + $0x50] sm:$0xff]  ;;  %413 = vst.msk [vmem:[#allocation4 + $0x3c] sm:$0xf] %vm407_vm2, %v7059_v22  ;;  %v7109_v46 = vpack.c.bf16 %v5125_v43, %v5125_v43 }
  0x69   : > { %v7069_v28 = vpack.c.bf16 %v5156_v26, %v5156_v26  ;;  %v426_v31 = vld [vmem:[%s7034_s25 + $0x19] sm:$0xff]  ;;  %v7078_v34 = vpack.c.bf16 %v427_v30, %v427_v30  ;;  %412 = vst.msk [vmem:[#allocation4 + $0x30] sm:$0xf] %vm407_vm2, %v7061_v23  ;;  %v7097_v42 = vpack.c.bf16 %v5126_v38, %v5126_v38  ;;  %v5158_v44 = vld [vmem:[%s7034_s25 + $0x51] sm:$0xff]  ;;  %v5157_v45 = vld [vmem:[%s7034_s25 + $0x49] sm:$0xff] }
  0x6a   : > { %v7080_v35 = vpack.c.bf16 %v426_v31, %v426_v31  ;;  %v5094_v36 = vld [vmem:[%s7034_s25 + $0x3a] sm:$0xff]  ;;  %v5093_v37 = vld [vmem:[%s7034_s25 + $0x32] sm:$0xff]  ;;  %411 = vst.msk [vmem:[#allocation4 + $0x24] sm:$0xf] %vm407_vm2, %v7063_v24  ;;  %410 = vst.msk [vmem:[#allocation4 + $0x18] sm:$0xf] %vm407_vm2, %v7067_v27  ;;  %v7111_v47 = vpack.c.bf16 %v5158_v44, %v5158_v44  ;;  %v7113_v48 = vpack.c.bf16 %v5157_v45, %v5157_v45  ;;  %6050 = vmatpush3.bf16.msra.mxu0 %v6286_v21 }
  0x6b   : > { %v7093_v40 = vpack.c.bf16 %v5094_v36, %v5094_v36  ;;  %v7095_v41 = vpack.c.bf16 %v5093_v37, %v5093_v37  ;;  %896 = vst.msk [vmem:[#allocation4 + $0x28] sm:$0xf] %vm407_vm2, %v7069_v28  ;;  %975 = vrot.lane.b32.xlu1 %v7048_v16, %s6664_s29  ;;  %v5096_v49 = vld [vmem:[%s7034_s25 + $0x52] sm:$0xff]  ;;  %v5095_v50 = vld [vmem:[%s7034_s25 + $0x4a] sm:$0xff]  ;;  %894 = vst.msk [vmem:[#allocation4 + $0x10] sm:$0xf] %vm407_vm2, %v7078_v34 }
  0x6c   : > { %490 = vrot.lane.b32.xlu0 %v5693_v17, %s6664_s29  ;;  %893 = vst.msk [vmem:[#allocation4 + $0x4] sm:$0xf] %vm407_vm2, %v7080_v35  ;;  %895 = vst.msk [vmem:[#allocation4 + $0x1c] sm:$0xf] %vm407_vm2, %v7076_v33  ;;  %v7123_v51 = vpack.c.bf16 %v5096_v49, %v5096_v49  ;;  %v7125_v52 = vpack.c.bf16 %v5095_v50, %v5095_v50  ;;  %v5128_v53 = vld [vmem:[%s7034_s25 + $0x68] sm:$0xff]  ;;  %v5127_v54 = vld [vmem:[%s7034_s25 + $0x60] sm:$0xff] }
  0x6d   : > { %v5160_v55 = vld [vmem:[%s7034_s25 + $0x69] sm:$0xff]  ;;  %1375 = vst.msk [vmem:[#allocation4 + $0x8] sm:$0xf] %vm407_vm2, %v7095_v41  ;;  %1376 = vst.msk [vmem:[#allocation4 + $0x14] sm:$0xf] %vm407_vm2, %v7093_v40  ;;  %v7136_v56 = vpack.c.bf16 %v5128_v53, %v5128_v53  ;;  %v7138_v57 = vpack.c.bf16 %v5127_v54, %v5127_v54  ;;  %v5159_v59 = vld [vmem:[%s7034_s25 + $0x61] sm:$0xff] }
  0x6e   : > { %415 = vst.msk [vmem:[#allocation4 + $0x54] sm:$0xf] %vm407_vm2, %v7097_v42  ;;  %v7140_v58 = vpack.c.bf16 %v5160_v55, %v5160_v55  ;;  %v5098_v60 = vld [vmem:[%s7034_s25 + $0x6a] sm:$0xff]  ;;  %v5097_v61 = vld [vmem:[%s7034_s25 + $0x62] sm:$0xff]  ;;  %898 = vst.msk [vmem:[#allocation4 + $0x40] sm:$0xf] %vm407_vm2, %v7111_v47  ;;  %v7151_v62 = vpack.c.bf16 %v5159_v59, %v5159_v59 }
  0x6f   : > { %897 = vst.msk [vmem:[#allocation4 + $0x34] sm:$0xf] %vm407_vm2, %v7113_v48  ;;  %414 = vst.msk [vmem:[#allocation4 + $0x48] sm:$0xf] %vm407_vm2, %v7109_v46  ;;  %v7153_v63 = vpack.c.bf16 %v5098_v60, %v5098_v60  ;;  %v7155_v0 = vpack.c.bf16 %v5097_v61, %v5097_v61  ;;  %v5130_v1 = vld [vmem:[%s7034_s25 + $0x80] sm:$0xff]  ;;  %v5129_v2 = vld [vmem:[%s7034_s25 + $0x78] sm:$0xff]  ;;  %619 = vrot.lane.b32.xlu1 %v5709_v32, %s6665_s30 }
  0x70   : > { %v5162_v3 = vld [vmem:[%s7034_s25 + $0x81] sm:$0xff]  ;;  %1377 = vst.msk [vmem:[#allocation4 + $0x20] sm:$0xf] %vm407_vm2, %v7125_v52  ;;  %1378 = vst.msk [vmem:[#allocation4 + $0x2c] sm:$0xf] %vm407_vm2, %v7123_v51  ;;  %617 = vrot.lane.b32.xlu0 %v5708_v39, %s6665_s30  ;;  %v7166_v4 = vpack.c.bf16 %v5130_v1, %v5130_v1  ;;  %v7168_v5 = vpack.c.bf16 %v5129_v2, %v5129_v2  ;;  %v5161_v7 = vld [vmem:[%s7034_s25 + $0x79] sm:$0xff] }
  0x71   : > { %v7170_v6 = vpack.c.bf16 %v5162_v3, %v5162_v3  ;;  %v5100_v8 = vld [vmem:[%s7034_s25 + $0x82] sm:$0xff]  ;;  %900 = vst.msk [vmem:[#allocation4 + $0x58] sm:$0xf] %vm407_vm2, %v7140_v58  ;;  %417 = vst.msk [vmem:[#allocation4 + $0x6c] sm:$0xf] %vm407_vm2, %v7136_v56  ;;  %v7180_v9 = vpack.c.bf16 %v5161_v7, %v5161_v7  ;;  %v5099_v12 = vld [vmem:[%s7034_s25 + $0x7a] sm:$0xff] }
  0x72   : > { %416 = vst.msk [vmem:[#allocation4 + $0x60] sm:$0xf] %vm407_vm2, %v7138_v57  ;;  %v7182_v10 = vpack.c.bf16 %v5100_v8, %v5100_v8  ;;  %v5132_v13 = vld [vmem:[%s7034_s25 + $0x98] sm:$0xff]  ;;  %899 = vst.msk [vmem:[#allocation4 + $0x4c] sm:$0xf] %vm407_vm2, %v7151_v62  ;;  %v7192_v14 = vpack.c.bf16 %v5099_v12, %v5099_v12  ;;  %v327_v17 = vld [vmem:[%s7034_s25] sm:$0xff] }
  0x73   : > { %1379 = vst.msk [vmem:[#allocation4 + $0x38] sm:$0xf] %vm407_vm2, %v7155_v0  ;;  %1380 = vst.msk [vmem:[#allocation4 + $0x44] sm:$0xf] %vm407_vm2, %v7153_v63  ;;  %v7194_v15 = vpack.c.bf16 %v5132_v13, %v5132_v13  ;;  %v5164_v18 = vld [vmem:[%s7034_s25 + $0x99] sm:$0xff]  ;;  %v5163_v19 = vld [vmem:[%s7034_s25 + $0x91] sm:$0xff]  ;;  %v5676_v20 = vpack.c.bf16 %v327_v17, %v327_v17  ;;  %1105 = vrot.lane.b32.xlu1 %v7059_v22, %s6665_s30 }
  0x74   : > { %902 = vst.msk [vmem:[#allocation4 + $0x70] sm:$0xf] %vm407_vm2, %v7170_v6  ;;  %419 = vst.msk [vmem:[#allocation4 + $0x84] sm:$0xf] %vm407_vm2, %v7166_v4  ;;  %v7205_v21 = vpack.c.bf16 %v5164_v18, %v5164_v18  ;;  %v7207_v25 = vpack.c.bf16 %v5163_v19, %v5163_v19  ;;  %v328_v26 = vld [vmem:[%s7034_s25 + $0x8] sm:$0xff]  ;;  %v5102_v29 = vld [vmem:[%s7034_s25 + $0x9a] sm:$0xff]  ;;  %1103 = vrot.lane.b32.xlu0 %v7061_v23, %s6665_s30 }
  0x75   : > { %418 = vst.msk [vmem:[#allocation4 + $0x78] sm:$0xf] %vm407_vm2, %v7168_v5  ;;  %v5101_v30 = vld [vmem:[%s7034_s25 + $0x92] sm:$0xff]  ;;  %1382 = vst.msk [vmem:[#allocation4 + $0x5c] sm:$0xf] %vm407_vm2, %v7182_v10  ;;  %v5677_v31 = vpack.c.bf16 %v328_v26, %v328_v26  ;;  %v7220_v32 = vpack.c.bf16 %v5102_v29, %v5102_v29  ;;  %v5133_v43 = vld [vmem:[%s7034_s25 + $0xa8] sm:$0xff] }
  0x76   : > { %901 = vst.msk [vmem:[#allocation4 + $0x64] sm:$0xf] %vm407_vm2, %v7180_v9  ;;  %v7222_v36 = vpack.c.bf16 %v5101_v30, %v5101_v30  ;;  %1381 = vst.msk [vmem:[#allocation4 + $0x50] sm:$0xf] %vm407_vm2, %v7192_v14  ;;  %v6287_v37 = vld [vmem:[%s9008_s1 + $0x58] sm:$0xff]   ;;  %v5134_v39 = vld [vmem:[%s7034_s25 + $0xb0] sm:$0xff]  ;;  %v7248_v45 = vpack.c.bf16 %v5133_v43, %v5133_v43 }
  0x77   : > { %421 = vst.msk [vmem:[#allocation4 + $0x9c] sm:$0xf] %vm407_vm2, %v7194_v15  ;;  %408 = vst.msk [vmem:[#allocation4] sm:$0xf] %vm407_vm2, %v5676_v20  ;;  %v6288_v38 = vld [vmem:[%s9008_s1 + $0x18] sm:$0xff]   ;;  %6051 = vmatprep.subr.bf16.mxu0 %v6287_v37  ;;  %v7246_v44 = vpack.c.bf16 %v5134_v39, %v5134_v39  ;;  %v6289_v49 = vld [vmem:[%s9008_s1 + $0x50] sm:$0xff]   ;;  %750 = vrot.lane.b32.xlu1 %v7063_v24, %s6666_s16 }
  0x78   : > { %904 = vst.msk [vmem:[#allocation4 + $0x88] sm:$0xf] %vm407_vm2, %v7205_v21  ;;  %903 = vst.msk [vmem:[#allocation4 + $0x7c] sm:$0xf] %vm407_vm2, %v7207_v25  ;;  %748 = vrot.lane.b32.xlu0 %v7067_v27, %s6666_s16  ;;  %6052 = vmatpush3.bf16.msra.mxu0 %v6288_v38  ;;  %v6290_v50 = vld [vmem:[%s9008_s1 + $0x10] sm:$0xff]   ;;  %v6291_v24 = vld [vmem:[%s9008_s1 + $0x48] sm:$0xff]  }
  0x79   : > { %409 = vst.msk [vmem:[#allocation4 + $0xc] sm:$0xf] %vm407_vm2, %v5677_v31  ;;  %1383 = vst.msk [vmem:[#allocation4 + $0x68] sm:$0xf] %vm407_vm2, %v7222_v36  ;;  %6053 = vmatprep.subr.bf16.mxu0 %v6289_v49  ;;  %v6292_v27 = vld [vmem:[%s9008_s1 + $0x8] sm:$0xff]   ;;  %v6294_v1 = vld [vmem:[%s9008_s1 + $0x40] sm:$0xff]  }
  0x7a   : > { %1384 = vst.msk [vmem:[#allocation4 + $0x74] sm:$0xf] %vm407_vm2, %v7220_v32  ;;  %423 = vst.msk [vmem:[#allocation4 + $0xb4] sm:$0xf] %vm407_vm2, %v7246_v44  ;;  %v6293_v53 = vld [vmem:[%s9008_s1 + $0x88] sm:$0xff]   ;;  %v6296_v2 = vld [vmem:[%s9008_s1 + $0x80] sm:$0xff]  }
  0x7b   : > { %422 = vst.msk [vmem:[#allocation4 + $0xa8] sm:$0xf] %vm407_vm2, %v7248_v45  ;;  %1233 = vrot.lane.b32.xlu1 %v7069_v28, %s6666_s16  ;;  %v5166_v54 = vld [vmem:[%s7034_s25 + $0xb1] sm:$0xff]  ;;  %v5165_v60 = vld [vmem:[%s7034_s25 + $0xa9] sm:$0xff]  ;;  %6191 = vmatprep.subr.bf16.mxu1 %v6293_v53  ;;  %v5167_v17 = vld [vmem:[%s7034_s25 + $0xc1] sm:$0xff] }
  0x7c   : > { %1231 = vrot.lane.b32.xlu0 %v7076_v33, %s6666_s16  ;;  %v6300_v55 = vld [vmem:[#allocation4 + $0x8] ss:$12 sps:$4 sm:$0xff]   ;;  %6054 = vmatpush3.bf16.msra.mxu0 %v6290_v50  ;;  %v7278_v59 = vpack.c.bf16 %v5166_v54, %v5166_v54  ;;  %v7281_v61 = vpack.c.bf16 %v5165_v60, %v5165_v60  ;;  %v6295_v3 = vld [vmem:[%s9008_s1] sm:$0xff]   ;;  %v7324_v19 = vpack.c.bf16 %v5167_v17, %v5167_v17 }
  0x7d   : > { %6055 = vmatprep.subr.bf16.mxu0 %v6291_v24  ;;  %6192 = vmatpush3.bf16.msra.mxu1 %v6293_v53  ;;  %v5104_v7 = vld [vmem:[%s7034_s25 + $0xb2] sm:$0xff]  ;;  %v5103_v8 = vld [vmem:[%s7034_s25 + $0xaa] sm:$0xff]  ;;  %v5135_v37 = vld [vmem:[%s7034_s25 + $0xc0] sm:$0xff] }
  0x7e   : > { %6195 = vmatprep.mubr.msk.bf16.mxu1 %vm1719_vm3, %v6300_v55  ;;  %906 = vst.msk [vmem:[#allocation4 + $0xa0] sm:$0xf] %vm407_vm2, %v7278_v59  ;;  %905 = vst.msk [vmem:[#allocation4 + $0x94] sm:$0xf] %vm407_vm2, %v7281_v61  ;;  %6193 = vmatprep.subr.bf16.mxu1 %v6296_v2  ;;  %v7305_v12 = vpack.c.bf16 %v5103_v8, %v5103_v8  ;;  %v5168_v13 = vld [vmem:[%s7034_s25 + $0xc9] sm:$0xff]  ;;  %v7489_v43 = vpack.c.bf16 %v5135_v37, %v5135_v37  ;;  %v5201_v49 = vld [vmem:[%s7034_s25 + $0xda] sm:$0xff] }
  0x7f   : > { %494 = vrot.lane.b32.xlu1 %v7078_v34, %s6664_s29  ;;  %v6301_v34 = vld [vmem:[#allocation4 + $0x20] ss:$12 sps:$4 sm:$0xff]   ;;  %v7322_v18 = vpack.c.bf16 %v5168_v13, %v5168_v13  ;;  %907 = vst.msk [vmem:[#allocation4 + $0xac] sm:$0xf] %vm407_vm2, %v7324_v19  ;;  %v5818_v24 = vpack.c.bf16 %v5201_v49, %v5201_v49 }
  0x80   : > { %492 = vrot.lane.b32.xlu0 %v7080_v35, %s6664_s29  ;;  %6056 = vmatpush3.bf16.msra.mxu0 %v6292_v27  ;;  %v7303_v35 = vpack.c.bf16 %v5104_v7, %v5104_v7  ;;  %1385 = vst.msk [vmem:[#allocation4 + $0x80] sm:$0xf] %vm407_vm2, %v7305_v12  ;;  %v5202_v50 = vld [vmem:[%s7034_s25 + $0xe2] sm:$0xff] }
  0x81   : > { %6057 = vmatprep.subr.bf16.mxu0 %v6294_v1  ;;  %6194 = vmatpush3.bf16.msra.mxu1 %v6296_v2  ;;  %908 = vst.msk [vmem:[#allocation4 + $0xb8] sm:$0xf] %vm407_vm2, %v7322_v18  ;;  %v5819_v27 = vpack.c.bf16 %v5202_v50, %v5202_v50  ;;  %1389 = vst.msk [vmem:[#allocation4 + $0xb0] sm:$0xf] %vm407_vm2, %v5818_v24 }
  0x82   : > { %1386 = vst.msk [vmem:[#allocation4 + $0x8c] sm:$0xf] %vm407_vm2, %v7303_v35 }
  0x83   : > { %979 = vrot.lane.b32.xlu1 %v7093_v40, %s6664_s29  ;;  %1390 = vst.msk [vmem:[#allocation4 + $0xbc] sm:$0xf] %vm407_vm2, %v5819_v27 }
  0x84   : > { %977 = vrot.lane.b32.xlu0 %v7095_v41, %s6664_s29  ;;  %6058 = vmatpush3.bf16.msra.mxu0 %v6295_v3 }
  0x85   : > { %6196 = vmatmul.mubr.msk.bf16.vlgmr.msra.gmra.mxu1 %vm1719_vm3, %v6301_v34 }
  0x87   : > { %623 = vrot.lane.b32.xlu1 %v7048_v16, %s6665_s30  ;;  %v5105_v16 = vld [vmem:[%s7034_s25 + $0xc2] sm:$0xff] }
  0x88   : > { %621 = vrot.lane.b32.xlu0 %v7039_v11, %s6665_s30  ;;  %v5106_v11 = vld [vmem:[%s7034_s25 + $0xca] sm:$0xff]  ;;  %v7342_v26 = vpack.c.bf16 %v5105_v16, %v5105_v16 }
  0x89   : > { %v7340_v20 = vpack.c.bf16 %v5106_v11, %v5106_v11 }
  0x8a   : > { %1387 = vst.msk [vmem:[#allocation4 + $0x98] sm:$0xf] %vm407_vm2, %v7342_v26  ;;  %v6319_v2 = vld [vmem:[#allocation4 + $0xb0] ss:$12 sps:$4 sm:$0xff]  }
  0x8b   : > { %1109 = vrot.lane.b32.xlu1 %v7097_v42, %s6665_s30  ;;  %1388 = vst.msk [vmem:[#allocation4 + $0xa4] sm:$0xf] %vm407_vm2, %v7340_v20 }
  0x8c   : > { %1107 = vrot.lane.b32.xlu0 %v7109_v46, %s6665_s30 }
  0x8f   : > { %754 = vrot.lane.b32.xlu1 %v7059_v22, %s6666_s16  ;;  %v6306_v22 = vld [vmem:[#allocation4 + $0x38] ss:$12 sps:$4 sm:$0xff]  }
  0x90   : > { %752 = vrot.lane.b32.xlu0 %v7061_v23, %s6666_s16  ;;  %v6307_v23 = vld [vmem:[#allocation4 + $0x50] ss:$12 sps:$4 sm:$0xff]   ;;  %6199 = vmatprep.mubr.msk.bf16.mxu1 %vm1719_vm3, %v6306_v22 }
  0x91   : > { %6200 = vmatmul.mubr.msk.bf16.gmra.mxu1 %vm1719_vm3, %v6307_v23  ;;  %v5170_v22 = vld [vmem:[%s7034_s25 + $0xe1] sm:$0xff]  ;;  %v5169_v23 = vld [vmem:[%s7034_s25 + $0xd9] sm:$0xff] }
  0x92   : > { %v6318_v55 = vld [vmem:[#allocation4 + $0x98] ss:$12 sps:$4 sm:$0xff]  }
  0x93   : > { %1237 = vrot.lane.b32.xlu1 %v7111_v47, %s6666_s16 }
  0x94   : > { %1235 = vrot.lane.b32.xlu0 %v7113_v48, %s6666_s16 }
  0x97   : > { %498 = vrot.lane.b32.xlu1 %v7069_v28, %s6664_s29  ;;  %v5131_v28 = vld [vmem:[%s7034_s25 + $0x90] sm:$0xff] }
  0x98   : > { %496 = vrot.lane.b32.xlu0 %v7076_v33, %s6664_s29  ;;  %v5780_v33 = vpack.c.bf16 %v5131_v28, %v5131_v28 }
  0x9b   : > { %983 = vrot.lane.b32.xlu1 %v7123_v51, %s6664_s29 }
  0x9c   : > { %981 = vrot.lane.b32.xlu0 %v7125_v52, %s6664_s29 }
  0x9f   : > { %627 = vrot.lane.b32.xlu1 %v7093_v40, %s6665_s30  ;;  %v6312_v40 = vld [vmem:[#allocation4 + $0x68] ss:$12 sps:$4 sm:$0xff]  }
  0xa0   : > { %625 = vrot.lane.b32.xlu0 %v7095_v41, %s6665_s30  ;;  %6203 = vmatprep.mubr.msk.bf16.mxu1 %vm1719_vm3, %v6312_v40 }
  0xa3   : > { %1113 = vrot.lane.b32.xlu1 %v7136_v56, %s6665_s30 }
  0xa4   : > { %1111 = vrot.lane.b32.xlu0 %v7138_v57, %s6665_s30 }
  0xa7   : > { %758 = vrot.lane.b32.xlu1 %v7097_v42, %s6666_s16 }
  0xa8   : > { %756 = vrot.lane.b32.xlu0 %v7109_v46, %s6666_s16  ;;  %v6313_v46 = vld [vmem:[#allocation4 + $0x80] ss:$12 sps:$4 sm:$0xff]  }
  0xa9   : > { %6204 = vmatmul.mubr.msk.bf16.gmra.mxu1 %vm1719_vm3, %v6313_v46  ;;  %v2067_v46 = vld [vmem:[#allocation3 + $0x8] sm:$0xff] }
  0xaa   : > { %6207 = vmatprep.mubr.msk.bf16.mxu1 %vm1719_vm3, %v6318_v55 }
  0xab   : > { %1241 = vrot.lane.b32.xlu1 %v7140_v58, %s6666_s16 }
  0xac   : > { %1239 = vrot.lane.b32.xlu0 %v7151_v62, %s6666_s16 }
  0xaf   : > { %502 = vrot.lane.b32.xlu1 %v7111_v47, %s6664_s29 }
  0xb0   : > { %500 = vrot.lane.b32.xlu0 %v7113_v48, %s6664_s29 }
  0xb1   : > { %6208 = vmatmul.mubr.msk.bf16.gmra.mxu1 %vm1719_vm3, %v6319_v2 }
  0xb3   : > { %987 = vrot.lane.b32.xlu1 %v7153_v63, %s6664_s29 }
  0xb4   : > { %985 = vrot.lane.b32.xlu0 %v7155_v0, %s6664_s29 }
  0xb7   : > { %631 = vrot.lane.b32.xlu1 %v7123_v51, %s6665_s30 }
  0xb8   : > { %629 = vrot.lane.b32.xlu0 %v7125_v52, %s6665_s30 }
  0xbb   : > { %1117 = vrot.lane.b32.xlu1 %v7166_v4, %s6665_s30 }
  0xbc   : > { %1115 = vrot.lane.b32.xlu0 %v7168_v5, %s6665_s30 }
  0xbf   : > { %762 = vrot.lane.b32.xlu1 %v7136_v56, %s6666_s16 }
  0xc0   : > { %760 = vrot.lane.b32.xlu0 %v7138_v57, %s6666_s16 }
  0xc3   : > { %1245 = vrot.lane.b32.xlu1 %v7170_v6, %s6666_s16 }
  0xc4   : > { %1243 = vrot.lane.b32.xlu0 %v7180_v9, %s6666_s16 }
  0xc7   : > { %506 = vrot.lane.b32.xlu1 %v7140_v58, %s6664_s29  ;;  %v339_v58 = vld [vmem:[%s7034_s25 + $0x90] sm:$0xff] }
  0xc8   : > { %504 = vrot.lane.b32.xlu0 %v7151_v62, %s6664_s29  ;;  %v5688_v62 = vpack.c.bf16 %v339_v58, %v339_v58 }
  0xca   : > { %420 = vst.msk [vmem:[#allocation4 + $0x90] sm:$0xf] %vm407_vm2, %v5688_v62 }
  0xcb   : > { %991 = vrot.lane.b32.xlu1 %v7182_v10, %s6664_s29 }
  0xcc   : > { %989 = vrot.lane.b32.xlu0 %v7192_v14, %s6664_s29 }
  0xcf   : > { %635 = vrot.lane.b32.xlu1 %v7153_v63, %s6665_s30 }
  0xd0   : > { %633 = vrot.lane.b32.xlu0 %v7155_v0, %s6665_s30 }
  0xd3   : > { %1121 = vrot.lane.b32.xlu1 %v7194_v15, %s6665_s30 }
  0xd4   : > { %1119 = vrot.lane.b32.xlu0 %v5780_v33, %s6665_s30 }
  0xd7   : > { %766 = vrot.lane.b32.xlu1 %v7166_v4, %s6666_s16 }
  0xd8   : > { %764 = vrot.lane.b32.xlu0 %v7168_v5, %s6666_s16 }
  0xd9   : > { %v974_v41 = vpop.permute.xlu1 %973 }
  0xda   : > { %v489_v42 = vpop.permute.xlu0 %488  ;;  %1021 = vst.msk [vmem:[#allocation4 + $0x4] sm:$0xf] %vm536_vm4, %v974_v41 }
  0xdb   : > { %537 = vst.msk [vmem:[#allocation4] sm:$0xf] %vm536_vm4, %v489_v42  ;;  %1249 = vrot.lane.b32.xlu1 %v7205_v21, %s6666_s16  ;;  %v2066_v42 = vld [vmem:[#allocation3] sm:$0xff] }
  0xdc   : > { %1247 = vrot.lane.b32.xlu0 %v7207_v25, %s6666_s16 }
  0xdd   : > { %v976_v47 = vpop.permute.xlu1 %975 }
  0xde   : > { %v491_v48 = vpop.permute.xlu0 %490  ;;  %1022 = vst.msk [vmem:[#allocation4 + $0x10] sm:$0xf] %vm536_vm4, %v976_v47 }
  0xdf   : > { %538 = vst.msk [vmem:[#allocation4 + $0xc] sm:$0xf] %vm536_vm4, %v491_v48  ;;  %510 = vrot.lane.b32.xlu1 %v7170_v6, %s6664_s29 }
  0xe0   : > { %508 = vrot.lane.b32.xlu0 %v7180_v9, %s6664_s29 }
  0xe1   : > { %v620_v51 = vpop.permute.xlu1 %619 }
  0xe2   : > { %v618_v52 = vpop.permute.xlu0 %617  ;;  %667 = vst.msk [vmem:[#allocation4 + $0xc] sm:$0xf] %vm665_vm5, %v620_v51 }
  0xe3   : > { %666 = vst.msk [vmem:[#allocation4] sm:$0xf] %vm665_vm5, %v618_v52  ;;  %995 = vrot.lane.b32.xlu1 %v7220_v32, %s6664_s29 }
  0xe4   : > { %993 = vrot.lane.b32.xlu0 %v7222_v36, %s6664_s29 }
  0xe5   : > { %v1106_v56 = vpop.permute.xlu1 %1105 }
  0xe6   : > { %v1104_v57 = vpop.permute.xlu0 %1103  ;;  %1152 = vst.msk [vmem:[#allocation4 + $0x10] sm:$0xf] %vm665_vm5, %v1106_v56 }
  0xe7   : > { %1151 = vst.msk [vmem:[#allocation4 + $0x4] sm:$0xf] %vm665_vm5, %v1104_v57  ;;  %639 = vrot.lane.b32.xlu1 %v7182_v10, %s6665_s30 }
  0xe8   : > { %637 = vrot.lane.b32.xlu0 %v7192_v14, %s6665_s30 }
  0xe9   : > { %v751_v63 = vpop.permute.xlu1 %750 }
  0xea   : > { %v749_v0 = vpop.permute.xlu0 %748  ;;  %798 = vst.msk [vmem:[#allocation4 + $0xc] sm:$0xf] %vm796_vm6, %v751_v63 }
  0xeb   : > { %797 = vst.msk [vmem:[#allocation4] sm:$0xf] %vm796_vm6, %v749_v0  ;;  %1125 = vrot.lane.b32.xlu1 %v7246_v44, %s6665_s30 }
  0xec   : > { %1123 = vrot.lane.b32.xlu0 %v7248_v45, %s6665_s30 }
  0xed   : > { %v1234_v4 = vpop.permute.xlu1 %1233 }
  0xee   : > { %v1232_v5 = vpop.permute.xlu0 %1231  ;;  %1280 = vst.msk [vmem:[#allocation4 + $0x10] sm:$0xf] %vm796_vm6, %v1234_v4 }
  0xef   : > { %1279 = vst.msk [vmem:[#allocation4 + $0x4] sm:$0xf] %vm796_vm6, %v1232_v5  ;;  %770 = vrot.lane.b32.xlu1 %v7194_v15, %s6666_s16 }
  0xf0   : > { %768 = vrot.lane.b32.xlu0 %v5780_v33, %s6666_s16 }
  0xf1   : > { %v495_v6 = vpop.permute.xlu1 %494 }
  0xf2   : > { %v493_v9 = vpop.permute.xlu0 %492  ;;  %540 = vst.msk [vmem:[#allocation4 + $0x24] sm:$0xf] %vm536_vm4, %v495_v6  ;;  %v6297_v29 = vld [vmem:[#allocation4] ss:$12 sps:$4 sm:$0xff]  }
  0xf3   : > { %539 = vst.msk [vmem:[#allocation4 + $0x18] sm:$0xf] %vm536_vm4, %v493_v9  ;;  %1253 = vrot.lane.b32.xlu1 %v7278_v59, %s6666_s16 }
  0xf4   : > { %1251 = vrot.lane.b32.xlu0 %v7281_v61, %s6666_s16 }
  0xf5   : > { %v980_v10 = vpop.permute.xlu1 %979 }
  0xf6   : > { %v978_v14 = vpop.permute.xlu0 %977  ;;  %1024 = vst.msk [vmem:[#allocation4 + $0x28] sm:$0xf] %vm536_vm4, %v980_v10  ;;  %v6299_v15 = vld [vmem:[#allocation4 + $0x4] ss:$12 sps:$4 sm:$0xff]  }
  0xf7   : > { %1023 = vst.msk [vmem:[#allocation4 + $0x1c] sm:$0xf] %vm536_vm4, %v978_v14  ;;  %514 = vrot.lane.b32.xlu1 %v7205_v21, %s6664_s29  ;;  %1776 = vmatprep.mubr.bf16.mxu0 %v6299_v15  ;;  %v5136_v21 = vld [vmem:[%s7034_s25 + $0xc8] sm:$0xff] }
  0xf8   : > { %512 = vrot.lane.b32.xlu0 %v7207_v25, %s6664_s29  ;;  %1777 = vmatmul.mubr.bf16.vlgmr.msra.gmra.mxu0 %v6297_v29  ;;  %v7487_v39 = vpack.c.bf16 %v5136_v21, %v5136_v21 }
  0xf9   : > { %v624_v30 = vpop.permute.xlu1 %623 }
  0xfa   : > { %v622_v31 = vpop.permute.xlu0 %621  ;;  %669 = vst.msk [vmem:[#allocation4 + $0x24] sm:$0xf] %vm665_vm5, %v624_v30 }
  0xfb   : > { %668 = vst.msk [vmem:[#allocation4 + $0x18] sm:$0xf] %vm665_vm5, %v622_v31  ;;  %999 = vrot.lane.b32.xlu1 %v7303_v35, %s6664_s29 }
  0xfc   : > { %997 = vrot.lane.b32.xlu0 %v7305_v12, %s6664_s29 }
  0xfd   : > { %v1110_v38 = vpop.permute.xlu1 %1109 }
  0xfe   : > { %v1108_v25 = vpop.permute.xlu0 %1107  ;;  %1154 = vst.msk [vmem:[#allocation4 + $0x28] sm:$0xf] %vm665_vm5, %v1110_v38 }
  0xff   : > { %1153 = vst.msk [vmem:[#allocation4 + $0x1c] sm:$0xf] %vm665_vm5, %v1108_v25  ;;  %643 = vrot.lane.b32.xlu1 %v7220_v32, %s6665_s30 }
 0x100   : > { %641 = vrot.lane.b32.xlu0 %v7222_v36, %s6665_s30 }
 0x101   : > { %v755_v53 = vpop.permute.xlu1 %754 }
 0x102   : > { %v753_v54 = vpop.permute.xlu0 %752  ;;  %800 = vst.msk [vmem:[#allocation4 + $0x24] sm:$0xf] %vm796_vm6, %v755_v53 }
 0x103   : > { %799 = vst.msk [vmem:[#allocation4 + $0x18] sm:$0xf] %vm796_vm6, %v753_v54  ;;  %1129 = vrot.lane.b32.xlu1 %v7487_v39, %s6665_s30 }
 0x104   : > { %1127 = vrot.lane.b32.xlu0 %v7489_v43, %s6665_s30 }
 0x105   : > { %v1238_v32 = vpop.permute.xlu1 %1237 }
 0x106   : > { %v1236_v36 = vpop.permute.xlu0 %1235  ;;  %1282 = vst.msk [vmem:[#allocation4 + $0x28] sm:$0xf] %vm796_vm6, %v1238_v32 }
 0x107   : > { %1281 = vst.msk [vmem:[#allocation4 + $0x1c] sm:$0xf] %vm796_vm6, %v1236_v36  ;;  %774 = vrot.lane.b32.xlu1 %v7246_v44, %s6666_s16 }
 0x108   : > { %772 = vrot.lane.b32.xlu0 %v7248_v45, %s6666_s16 }
 0x109   : > { %v499_v60 = vpop.permute.xlu1 %498 }
 0x10a   : > { %v497_v1 = vpop.permute.xlu0 %496  ;;  %542 = vst.msk [vmem:[#allocation4 + $0x3c] sm:$0xf] %vm536_vm4, %v499_v60 }
 0x10b   : > { %541 = vst.msk [vmem:[#allocation4 + $0x30] sm:$0xf] %vm536_vm4, %v497_v1  ;;  %1257 = vrot.lane.b32.xlu1 %v7322_v18, %s6666_s16  ;;  %v5138_v18 = vld [vmem:[%s7034_s25 + $0xe0] sm:$0xff] }
 0x10c   : > { %1255 = vrot.lane.b32.xlu0 %v7324_v19, %s6666_s16  ;;  %v5787_v11 = vpack.c.bf16 %v5138_v18, %v5138_v18 }
 0x10d   : > { %v984_v44 = vpop.permute.xlu1 %983  ;;  %v1429_v7 = vld [vmem:[#allocation4 + $0x24] sm:$0xff] }
 0x10e   : > { %v982_v45 = vpop.permute.xlu0 %981  ;;  %v1427_v3 = vld [vmem:[#allocation4 + $0x18] sm:$0xff]  ;;  %1026 = vst.msk [vmem:[#allocation4 + $0x40] sm:$0xf] %vm536_vm4, %v984_v44 }
 0x10f   : > { %v6302_v8 = vld [vmem:[#allocation4 + $0x1c] ss:$12 sps:$4 sm:$0xff]   ;;  %1025 = vst.msk [vmem:[#allocation4 + $0x34] sm:$0xf] %vm536_vm4, %v982_v45  ;;  %v5222_v34 = vcombine.low %v1427_v3, %v1429_v7  ;;  %518 = vrot.lane.b32.xlu1 %v7278_v59, %s6664_s29 }
 0x110   : > { %516 = vrot.lane.b32.xlu0 %v7281_v61, %s6664_s29  ;;  %1784 = vmatprep.mubr.bf16.mxu0 %v6302_v8  ;;  %v5137_v59 = vld [vmem:[%s7034_s25 + $0xd8] sm:$0xff] }
 0x111   : > { %v628_v13 = vpop.permute.xlu1 %627  ;;  %1785 = vmatmul.mubr.bf16.gmra.mxu0 %v5222_v34  ;;  %v5786_v16 = vpack.c.bf16 %v5137_v59, %v5137_v59 }
 0x112   : > { %v626_v17 = vpop.permute.xlu0 %625  ;;  %671 = vst.msk [vmem:[#allocation4 + $0x3c] sm:$0xf] %vm665_vm5, %v628_v13 }
 0x113   : > { %670 = vst.msk [vmem:[#allocation4 + $0x30] sm:$0xf] %vm665_vm5, %v626_v17  ;;  %1003 = vrot.lane.b32.xlu1 %v7340_v20, %s6664_s29 }
 0x114   : > { %1001 = vrot.lane.b32.xlu0 %v7342_v26, %s6664_s29 }
 0x115   : > { %v1114_v19 = vpop.permute.xlu1 %1113 }
 0x116   : > { %v1112_v61 = vpop.permute.xlu0 %1111  ;;  %1156 = vst.msk [vmem:[#allocation4 + $0x40] sm:$0xf] %vm665_vm5, %v1114_v19 }
 0x117   : > { %1155 = vst.msk [vmem:[#allocation4 + $0x34] sm:$0xf] %vm665_vm5, %v1112_v61  ;;  %647 = vrot.lane.b32.xlu1 %v7303_v35, %s6665_s30  ;;  %v5803_v35 = vpack.c.bf16 %v5170_v22, %v5170_v22 }
 0x118   : > { %645 = vrot.lane.b32.xlu0 %v7305_v12, %s6665_s30  ;;  %v5802_v12 = vpack.c.bf16 %v5169_v23, %v5169_v23 }
 0x119   : > { %v759_v20 = vpop.permute.xlu1 %758 }
 0x11a   : > { %v757_v26 = vpop.permute.xlu0 %756  ;;  %802 = vst.msk [vmem:[#allocation4 + $0x3c] sm:$0xf] %vm796_vm6, %v759_v20 }
 0x11b   : > { %801 = vst.msk [vmem:[#allocation4 + $0x30] sm:$0xf] %vm796_vm6, %v757_v26  ;;  %1133 = vrot.lane.b32.xlu1 %v5787_v11, %s6665_s30 }
 0x11c   : > { %1131 = vrot.lane.b32.xlu0 %v5786_v16, %s6665_s30 }
 0x11d   : > { %v1242_v28 = vpop.permute.xlu1 %1241 }
 0x11e   : > { %v1240_v33 = vpop.permute.xlu0 %1239  ;;  %1284 = vst.msk [vmem:[#allocation4 + $0x40] sm:$0xf] %vm796_vm6, %v1242_v28 }
 0x11f   : > { %1283 = vst.msk [vmem:[#allocation4 + $0x34] sm:$0xf] %vm796_vm6, %v1240_v33  ;;  %778 = vrot.lane.b32.xlu1 %v7487_v39, %s6666_s16 }
 0x120   : > { %776 = vrot.lane.b32.xlu0 %v7489_v43, %s6666_s16 }
 0x121   : > { %v503_v40 = vpop.permute.xlu1 %502 }
 0x122   : > { %v501_v41 = vpop.permute.xlu0 %500  ;;  %544 = vst.msk [vmem:[#allocation4 + $0x54] sm:$0xf] %vm536_vm4, %v503_v40 }
 0x123   : > { %543 = vst.msk [vmem:[#allocation4 + $0x48] sm:$0xf] %vm536_vm4, %v501_v41  ;;  %1261 = vrot.lane.b32.xlu1 %v5803_v35, %s6666_s16 }
 0x124   : > { %1259 = vrot.lane.b32.xlu0 %v5802_v12, %s6666_s16 }
 0x125   : > { %v988_v47 = vpop.permute.xlu1 %987  ;;  %v1433_v52 = vld [vmem:[#allocation4 + $0x3c] sm:$0xff] }
 0x126   : > { %v986_v48 = vpop.permute.xlu0 %985  ;;  %v1431_v51 = vld [vmem:[#allocation4 + $0x30] sm:$0xff]  ;;  %1028 = vst.msk [vmem:[#allocation4 + $0x58] sm:$0xf] %vm536_vm4, %v988_v47 }
 0x127   : > { %v6304_v56 = vld [vmem:[#allocation4 + $0x34] ss:$12 sps:$4 sm:$0xff]   ;;  %1027 = vst.msk [vmem:[#allocation4 + $0x4c] sm:$0xf] %vm536_vm4, %v986_v48  ;;  %v5225_v57 = vcombine.low %v1431_v51, %v1433_v52  ;;  %2100 = vrot.lane.b32.xlu1 %v2067_v46, %s6664_s29 }
 0x128   : > { %1792 = vmatprep.mubr.bf16.mxu0 %v6304_v56  ;;  %2098 = vrot.lane.b32.xlu0 %v2066_v42, %s6664_s29 }
 0x129   : > { %1793 = vmatmul.mubr.bf16.gmra.mxu0 %v5225_v57  ;;  %v632_v58 = vpop.permute.xlu1 %631 }
 0x12a   : > { %v630_v62 = vpop.permute.xlu0 %629  ;;  %673 = vst.msk [vmem:[#allocation4 + $0x54] sm:$0xf] %vm665_vm5, %v632_v58 }
 0x12b   : > { %672 = vst.msk [vmem:[#allocation4 + $0x48] sm:$0xf] %vm665_vm5, %v630_v62 }
 0x12d   : > { %v1118_v63 = vpop.permute.xlu1 %1117 }
 0x12e   : > { %v1116_v0 = vpop.permute.xlu0 %1115  ;;  %1158 = vst.msk [vmem:[#allocation4 + $0x58] sm:$0xf] %vm665_vm5, %v1118_v63 }
 0x12f   : > { %1157 = vst.msk [vmem:[#allocation4 + $0x4c] sm:$0xf] %vm665_vm5, %v1116_v0 }
 0x131   : > { %v763_v4 = vpop.permute.xlu1 %762 }
 0x132   : > { %v761_v5 = vpop.permute.xlu0 %760  ;;  %804 = vst.msk [vmem:[#allocation4 + $0x54] sm:$0xf] %vm796_vm6, %v763_v4 }
 0x133   : > { %803 = vst.msk [vmem:[#allocation4 + $0x48] sm:$0xf] %vm796_vm6, %v761_v5 }
 0x135   : > { %v1246_v6 = vpop.permute.xlu1 %1245 }
 0x136   : > { %v1244_v9 = vpop.permute.xlu0 %1243  ;;  %1286 = vst.msk [vmem:[#allocation4 + $0x58] sm:$0xf] %vm796_vm6, %v1246_v6 }
 0x137   : > { %1285 = vst.msk [vmem:[#allocation4 + $0x4c] sm:$0xf] %vm796_vm6, %v1244_v9 }
 0x139   : > { %v507_v10 = vpop.permute.xlu1 %506 }
 0x13a   : > { %v505_v14 = vpop.permute.xlu0 %504  ;;  %546 = vst.msk [vmem:[#allocation4 + $0x6c] sm:$0xf] %vm536_vm4, %v507_v10 }
 0x13b   : > { %545 = vst.msk [vmem:[#allocation4 + $0x60] sm:$0xf] %vm536_vm4, %v505_v14 }
 0x13d   : > { %v992_v29 = vpop.permute.xlu1 %991  ;;  %v1437_v31 = vld [vmem:[#allocation4 + $0x54] sm:$0xff] }
 0x13e   : > { %v990_v15 = vpop.permute.xlu0 %989  ;;  %v1435_v30 = vld [vmem:[#allocation4 + $0x48] sm:$0xff]  ;;  %1030 = vst.msk [vmem:[#allocation4 + $0x70] sm:$0xf] %vm536_vm4, %v992_v29 }
 0x13f   : > { %v6308_v21 = vld [vmem:[#allocation4 + $0x4c] ss:$12 sps:$4 sm:$0xff]   ;;  %1029 = vst.msk [vmem:[#allocation4 + $0x64] sm:$0xf] %vm536_vm4, %v990_v15  ;;  %v5228_v37 = vcombine.low %v1435_v30, %v1437_v31  ;;  %v5965_v31 = vld [vmem:[%s6724_s26] sm:$0xff]  }
 0x140   : > { %1800 = vmatprep.mubr.bf16.mxu0 %v6308_v21 }
 0x141   : > { %1801 = vmatmul.mubr.bf16.gmra.mxu0 %v5228_v37  ;;  %v636_v38 = vpop.permute.xlu1 %635 }
 0x142   : > { %v634_v25 = vpop.permute.xlu0 %633  ;;  %675 = vst.msk [vmem:[#allocation4 + $0x6c] sm:$0xf] %vm665_vm5, %v636_v38 }
 0x143   : > { %674 = vst.msk [vmem:[#allocation4 + $0x60] sm:$0xf] %vm665_vm5, %v634_v25  ;;  %v5966_v25 = vunpack.c.l.bf16 %v5965_v31 }
 0x145   : > { %v1122_v39 = vpop.permute.xlu1 %1121  ;;  %v6197_v29 = vpop.f32.mrf.mxu1 }
 0x146   : > { %v1120_v43 = vpop.permute.xlu0 %1119  ;;  %1160 = vst.msk [vmem:[#allocation4 + $0x70] sm:$0xf] %vm665_vm5, %v1122_v39 }
 0x147   : > { %1159 = vst.msk [vmem:[#allocation4 + $0x64] sm:$0xf] %vm665_vm5, %v1120_v43  ;;  %v1875_v15 = vpop.f32.mrf.mxu1 }
 0x149   : > { %v767_v49 = vpop.permute.xlu1 %766  ;;  %v6198_v37 = vpop.f32.mrf.mxu1 }
 0x14a   : > { %v765_v50 = vpop.permute.xlu0 %764  ;;  %806 = vst.msk [vmem:[#allocation4 + $0x6c] sm:$0xf] %vm796_vm6, %v767_v49 }
 0x14b   : > { %805 = vst.msk [vmem:[#allocation4 + $0x60] sm:$0xf] %vm796_vm6, %v765_v50  ;;  %v1878_v50 = vpop.f32.mrf.mxu1 }
 0x14d   : > { %v1250_v24 = vpop.permute.xlu1 %1249 }
 0x14e   : > { %v1248_v27 = vpop.permute.xlu0 %1247  ;;  %1288 = vst.msk [vmem:[#allocation4 + $0x70] sm:$0xf] %vm796_vm6, %v1250_v24 }
 0x14f   : > { %1287 = vst.msk [vmem:[#allocation4 + $0x64] sm:$0xf] %vm796_vm6, %v1248_v27 }
 0x151   : > { %v511_v53 = vpop.permute.xlu1 %510 }
 0x152   : > { %v509_v54 = vpop.permute.xlu0 %508  ;;  %548 = vst.msk [vmem:[#allocation4 + $0x84] sm:$0xf] %vm536_vm4, %v511_v53  ;;  %v5967_v53 = vunpack.c.h.bf16 %v5965_v31 }
 0x153   : > { %547 = vst.msk [vmem:[#allocation4 + $0x78] sm:$0xf] %vm536_vm4, %v509_v54 }
 0x155   : > { %v996_v32 = vpop.permute.xlu1 %995  ;;  %v1441_v60 = vld [vmem:[#allocation4 + $0x6c] sm:$0xff] }
 0x156   : > { %v994_v36 = vpop.permute.xlu0 %993  ;;  %v1439_v55 = vld [vmem:[#allocation4 + $0x60] sm:$0xff]  ;;  %1032 = vst.msk [vmem:[#allocation4 + $0x88] sm:$0xf] %vm536_vm4, %v996_v32 }
 0x157   : > { %v6310_v1 = vld [vmem:[#allocation4 + $0x64] ss:$12 sps:$4 sm:$0xff]   ;;  %1031 = vst.msk [vmem:[#allocation4 + $0x7c] sm:$0xf] %vm536_vm4, %v994_v36  ;;  %v5231_v2 = vcombine.low %v1439_v55, %v1441_v60  ;;  %v6028_v60 = vld [vmem:[%s6724_s26 + $0x8] sm:$0xff]  }
 0x158   : > { %1808 = vmatprep.mubr.bf16.mxu0 %v6310_v1 }
 0x159   : > { %1809 = vmatmul.mubr.bf16.gmra.mxu0 %v5231_v2  ;;  %v640_v44 = vpop.permute.xlu1 %639 }
 0x15a   : > { %v638_v45 = vpop.permute.xlu0 %637  ;;  %677 = vst.msk [vmem:[#allocation4 + $0x84] sm:$0xf] %vm665_vm5, %v640_v44  ;;  %v5970_v44 = vunpack.c.l.bf16 %v6028_v60 }
 0x15b   : > { %676 = vst.msk [vmem:[#allocation4 + $0x78] sm:$0xf] %vm665_vm5, %v638_v45 }
 0x15d   : > { %v1126_v3 = vpop.permute.xlu1 %1125 }
 0x15e   : > { %v1124_v7 = vpop.permute.xlu0 %1123  ;;  %1162 = vst.msk [vmem:[#allocation4 + $0x88] sm:$0xf] %vm665_vm5, %v1126_v3 }
 0x15f   : > { %1161 = vst.msk [vmem:[#allocation4 + $0x7c] sm:$0xf] %vm665_vm5, %v1124_v7 }
 0x161   : > { %v771_v8 = vpop.permute.xlu1 %770 }
 0x162   : > { %v769_v34 = vpop.permute.xlu0 %768  ;;  %808 = vst.msk [vmem:[#allocation4 + $0x84] sm:$0xf] %vm796_vm6, %v771_v8 }
 0x163   : > { %807 = vst.msk [vmem:[#allocation4 + $0x78] sm:$0xf] %vm796_vm6, %v769_v34 }
 0x165   : > { %v1254_v13 = vpop.permute.xlu1 %1253 }
 0x166   : > { %v1252_v17 = vpop.permute.xlu0 %1251  ;;  %1290 = vst.msk [vmem:[#allocation4 + $0x88] sm:$0xf] %vm796_vm6, %v1254_v13  ;;  %v5971_v13 = vunpack.c.h.bf16 %v6028_v60 }
 0x167   : > { %1289 = vst.msk [vmem:[#allocation4 + $0x7c] sm:$0xf] %vm796_vm6, %v1252_v17 }
 0x169   : > { %v515_v18 = vpop.permute.xlu1 %514 }
 0x16a   : > { %v513_v59 = vpop.permute.xlu0 %512  ;;  %550 = vst.msk [vmem:[#allocation4 + $0x9c] sm:$0xf] %vm536_vm4, %v515_v18 }
 0x16b   : > { %549 = vst.msk [vmem:[#allocation4 + $0x90] sm:$0xf] %vm536_vm4, %v513_v59 }
 0x16d   : > { %v1000_v19 = vpop.permute.xlu1 %999  ;;  %v1445_v16 = vld [vmem:[#allocation4 + $0x84] sm:$0xff] }
 0x16e   : > { %v998_v61 = vpop.permute.xlu0 %997  ;;  %v1443_v11 = vld [vmem:[#allocation4 + $0x78] sm:$0xff]  ;;  %1034 = vst.msk [vmem:[#allocation4 + $0xa0] sm:$0xf] %vm536_vm4, %v1000_v19  ;;  %v6201_v19 = vpop.f32.mrf.mxu1 }
 0x16f   : > { %v6314_v20 = vld [vmem:[#allocation4 + $0x7c] ss:$12 sps:$4 sm:$0xff]   ;;  %1033 = vst.msk [vmem:[#allocation4 + $0x94] sm:$0xf] %vm536_vm4, %v998_v61  ;;  %v5234_v26 = vcombine.low %v1443_v11, %v1445_v16 }
 0x170   : > { %1816 = vmatprep.mubr.bf16.mxu0 %v6314_v20  ;;  %v1891_v61 = vpop.f32.mrf.mxu1  ;;  %v6029_v20 = vld [vmem:[%s6724_s26 + $0x10] sm:$0xff]  }
 0x171   : > { %1817 = vmatmul.mubr.bf16.gmra.mxu0 %v5234_v26  ;;  %v644_v22 = vpop.permute.xlu1 %643 }
 0x172   : > { %v642_v23 = vpop.permute.xlu0 %641  ;;  %679 = vst.msk [vmem:[#allocation4 + $0x9c] sm:$0xf] %vm665_vm5, %v644_v22  ;;  %v6202_v22 = vpop.f32.mrf.mxu1 }
 0x173   : > { %678 = vst.msk [vmem:[#allocation4 + $0x90] sm:$0xf] %vm665_vm5, %v642_v23 }
 0x175   : > { %v1130_v28 = vpop.permute.xlu1 %1129 }
 0x176   : > { %v1128_v33 = vpop.permute.xlu0 %1127  ;;  %1164 = vst.msk [vmem:[#allocation4 + $0xa0] sm:$0xf] %vm665_vm5, %v1130_v28 }
 0x177   : > { %1163 = vst.msk [vmem:[#allocation4 + $0x94] sm:$0xf] %vm665_vm5, %v1128_v33  ;;  %v5974_v33 = vunpack.c.l.bf16 %v6029_v20 }
 0x179   : > { %v775_v35 = vpop.permute.xlu1 %774 }
 0x17a   : > { %v773_v12 = vpop.permute.xlu0 %772  ;;  %810 = vst.msk [vmem:[#allocation4 + $0x9c] sm:$0xf] %vm796_vm6, %v775_v35 }
 0x17b   : > { %809 = vst.msk [vmem:[#allocation4 + $0x90] sm:$0xf] %vm796_vm6, %v773_v12 }
 0x17d   : > { %v1258_v40 = vpop.permute.xlu1 %1257 }
 0x17e   : > { %v1256_v41 = vpop.permute.xlu0 %1255  ;;  %1292 = vst.msk [vmem:[#allocation4 + $0xa0] sm:$0xf] %vm796_vm6, %v1258_v40 }
 0x17f   : > { %1291 = vst.msk [vmem:[#allocation4 + $0x94] sm:$0xf] %vm796_vm6, %v1256_v41  ;;  %v1894_v41 = vpop.f32.mrf.mxu1 }
 0x181   : > { %v519_v42 = vpop.permute.xlu1 %518 }
 0x182   : > { %v517_v46 = vpop.permute.xlu0 %516  ;;  %552 = vst.msk [vmem:[#allocation4 + $0xb4] sm:$0xf] %vm536_vm4, %v519_v42 }
 0x183   : > { %551 = vst.msk [vmem:[#allocation4 + $0xa8] sm:$0xf] %vm536_vm4, %v517_v46 }
 0x185   : > { %v1004_v47 = vpop.permute.xlu1 %1003  ;;  %v1449_v52 = vld [vmem:[#allocation4 + $0x9c] sm:$0xff] }
 0x186   : > { %v1002_v48 = vpop.permute.xlu0 %1001  ;;  %v1447_v51 = vld [vmem:[#allocation4 + $0x90] sm:$0xff]  ;;  %1036 = vst.msk [vmem:[#allocation4 + $0xb8] sm:$0xf] %vm536_vm4, %v1004_v47  ;;  %v5975_v47 = vunpack.c.h.bf16 %v6029_v20 }
 0x187   : > { %v6316_v56 = vld [vmem:[#allocation4 + $0x94] ss:$12 sps:$4 sm:$0xff]   ;;  %1035 = vst.msk [vmem:[#allocation4 + $0xac] sm:$0xf] %vm536_vm4, %v1002_v48  ;;  %v5237_v57 = vcombine.low %v1447_v51, %v1449_v52 }
 0x188   : > { %1824 = vmatprep.mubr.bf16.mxu0 %v6316_v56 }
 0x189   : > { %1825 = vmatmul.mubr.bf16.gmra.mxu0 %v5237_v57  ;;  %v648_v58 = vpop.permute.xlu1 %647  ;;  %v6030_v57 = vld [vmem:[%s6724_s26 + $0x18] sm:$0xff]  }
 0x18a   : > { %v646_v62 = vpop.permute.xlu0 %645  ;;  %681 = vst.msk [vmem:[#allocation4 + $0xb4] sm:$0xf] %vm665_vm5, %v648_v58 }
 0x18b   : > { %680 = vst.msk [vmem:[#allocation4 + $0xa8] sm:$0xf] %vm665_vm5, %v646_v62 }
 0x18d   : > { %v1134_v63 = vpop.permute.xlu1 %1133 }
 0x18e   : > { %v1132_v0 = vpop.permute.xlu0 %1131  ;;  %1166 = vst.msk [vmem:[#allocation4 + $0xb8] sm:$0xf] %vm665_vm5, %v1134_v63  ;;  %v5978_v63 = vunpack.c.l.bf16 %v6030_v57 }
 0x18f   : > { %1165 = vst.msk [vmem:[#allocation4 + $0xac] sm:$0xf] %vm665_vm5, %v1132_v0 }
 0x191   : > { %v779_v4 = vpop.permute.xlu1 %778 }
 0x192   : > { %v777_v5 = vpop.permute.xlu0 %776  ;;  %812 = vst.msk [vmem:[#allocation4 + $0xb4] sm:$0xf] %vm796_vm6, %v779_v4 }
 0x193   : > { %811 = vst.msk [vmem:[#allocation4 + $0xa8] sm:$0xf] %vm796_vm6, %v777_v5 }
 0x195   : > { %v1262_v6 = vpop.permute.xlu1 %1261 }
 0x196   : > { %v1260_v9 = vpop.permute.xlu0 %1259  ;;  %1294 = vst.msk [vmem:[#allocation4 + $0xb8] sm:$0xf] %vm796_vm6, %v1262_v6 }
 0x197   : > { %1293 = vst.msk [vmem:[#allocation4 + $0xac] sm:$0xf] %vm796_vm6, %v1260_v9 }
 0x19a   : > { %v6322_v14 = vld [vmem:[#allocation4 + $0xa8] ss:$12 sps:$4 sm:$0xff]  }
 0x19e   : > { %v6320_v10 = vld [vmem:[#allocation4 + $0xac] ss:$12 sps:$4 sm:$0xff]  }
 0x19f   : > { %1832 = vmatprep.mubr.bf16.mxu0 %v6320_v10  ;;  %v5979_v10 = vunpack.c.h.bf16 %v6030_v57 }
 0x1a0   : > { %1833 = vmatmul.mubr.bf16.gmra.mxu0 %v6322_v14 }
 0x1b8   : > { %v6059_v30 = vpop.f32.mrf.mxu0 }
 0x1ba   : > { %v6060_v21 = vpop.f32.mrf.mxu0 }
 0x1bb   : > { %v6061_v38 = vadd.f32 %v6060_v21, %v6059_v30  ;;  %v6205_v30 = vpop.f32.mrf.mxu1 }
 0x1bc   : > { %v6062_v39 = vpop.f32.mrf.mxu0 }
 0x1bd   : > { %v1876_v43 = vadd.f32 %v6061_v38, %v1875_v15  ;;  %v1907_v21 = vpop.f32.mrf.mxu1  ;;  %v6031_v38 = vld [vmem:[%s6724_s26 + $0x20] sm:$0xff]  }
 0x1be   : > { %v6063_v49 = vpop.f32.mrf.mxu0 }
 0x1bf   : > { %v7612_v24 = vadd.f32 %v5966_v25, %v1876_v43  ;;  %v6064_v27 = vadd.f32 %v6063_v49, %v6062_v39  ;;  %v6206_v43 = vpop.f32.mrf.mxu1 }
 0x1c1   : > { %6323 = vtanh.f32 %v7612_v24  ;;  %v1879_v54 = vadd.f32 %v6064_v27, %v1878_v50  ;;  %v5982_v50 = vunpack.c.l.bf16 %v6031_v38 }
 0x1c3   : > { %v7615_v32 = vadd.f32 %v5967_v53, %v1879_v54 }
 0x1c5   : > { %6325 = vtanh.f32 %v7615_v32 }
 0x1ce   : > { %v6324_v36 = vpop.eup %6323 }
 0x1cf   : > { %2178 = vrot.lane.b32.xlu0 %v6324_v36, %s6664_s29  ;;  %v1910_v36 = vpop.f32.mrf.mxu1 }
 0x1d1   : > { %v6065_v55 = vpop.f32.mrf.mxu0 }
 0x1d2   : > { %v6326_v1 = vpop.eup %6325 }
 0x1d3   : > { %v6066_v2 = vpop.f32.mrf.mxu0  ;;  %2180 = vrot.lane.b32.xlu1 %v6326_v1, %s6664_s29  ;;  %v5983_v1 = vunpack.c.h.bf16 %v6031_v38 }
 0x1d4   : > { %v6067_v45 = vadd.f32 %v6066_v2, %v6065_v55 }
 0x1d5   : > { %v6068_v3 = vpop.f32.mrf.mxu0 }
 0x1d6   : > { %v1884_v7 = vadd.f32 %v6197_v29, %v6067_v45 }
 0x1d7   : > { %v6069_v8 = vpop.f32.mrf.mxu0 }
 0x1d8   : > { %v7621_v34 = vadd.f32 %v5970_v44, %v1884_v7  ;;  %v6070_v17 = vadd.f32 %v6069_v8, %v6068_v3  ;;  %v6032_v7 = vld [vmem:[%s6724_s26 + $0x28] sm:$0xff]  }
 0x1d9   : > { %v5987_v20 = vunpack.c.h.bf16 %v6032_v7 }
 0x1da   : > { %6327 = vtanh.f32 %v7621_v34  ;;  %v1887_v18 = vadd.f32 %v6198_v37, %v6070_v17  ;;  %v5986_v17 = vunpack.c.l.bf16 %v6032_v7 }
 0x1dc   : > { %v7624_v59 = vadd.f32 %v5971_v13, %v1887_v18 }
 0x1de   : > { %6329 = vtanh.f32 %v7624_v59 }
 0x1e7   : > { %v6328_v11 = vpop.eup %6327 }
 0x1e8   : > { %2182 = vrot.lane.b32.xlu0 %v6328_v11, %s6664_s29 }
 0x1e9   : > { %v6071_v16 = vpop.f32.mrf.mxu0 }
 0x1eb   : > { %v6072_v26 = vpop.f32.mrf.mxu0  ;;  %v6330_v23 = vpop.eup %6329 }
 0x1ec   : > { %v6073_v28 = vadd.f32 %v6072_v26, %v6071_v16  ;;  %2184 = vrot.lane.b32.xlu1 %v6330_v23, %s6664_s29 }
 0x1ed   : > { %v6074_v35 = vpop.f32.mrf.mxu0 }
 0x1ee   : > { %v1892_v12 = vadd.f32 %v6073_v28, %v1891_v61  ;;  %v6209_v28 = vpop.f32.mrf.mxu1 }
 0x1ef   : > { %v6075_v40 = vpop.f32.mrf.mxu0 }
 0x1f0   : > { %v7630_v42 = vadd.f32 %v5974_v33, %v1892_v12  ;;  %v6076_v46 = vadd.f32 %v6075_v40, %v6074_v35  ;;  %v1923_v35 = vpop.f32.mrf.mxu1  ;;  %v6033_v40 = vld [vmem:[%s6724_s26 + $0x30] sm:$0xff]  }
 0x1f2   : > { %6331 = vtanh.f32 %v7630_v42  ;;  %v1895_v48 = vadd.f32 %v6076_v46, %v1894_v41 }
 0x1f4   : > { %v7633_v51 = vadd.f32 %v5975_v47, %v1895_v48  ;;  %v6210_v47 = vpop.f32.mrf.mxu1 }
 0x1f6   : > { %6333 = vtanh.f32 %v7633_v51 }
 0x1ff   : > { %v6332_v52 = vpop.eup %6331 }
 0x200   : > { %2186 = vrot.lane.b32.xlu0 %v6332_v52, %s6664_s29  ;;  %v5990_v52 = vunpack.c.l.bf16 %v6033_v40 }
 0x201   : > { %v6077_v56 = vpop.f32.mrf.mxu0 }
 0x203   : > { %v6334_v58 = vpop.eup %6333  ;;  %v6078_v62 = vpop.f32.mrf.mxu0 }
 0x204   : > { %v6079_v0 = vadd.f32 %v6078_v62, %v6077_v56  ;;  %2188 = vrot.lane.b32.xlu1 %v6334_v58, %s6664_s29  ;;  %v1926_v62 = vpop.f32.mrf.mxu1 }
 0x205   : > { %v6080_v4 = vpop.f32.mrf.mxu0 }
 0x206   : > { %v1900_v5 = vadd.f32 %v6201_v19, %v6079_v0 }
 0x207   : > { %v6081_v6 = vpop.f32.mrf.mxu0 }
 0x208   : > { %v7639_v9 = vadd.f32 %v5978_v63, %v1900_v5  ;;  %v6082_v14 = vadd.f32 %v6081_v6, %v6080_v4  ;;  %v5991_v4 = vunpack.c.h.bf16 %v6033_v40 }
 0x20a   : > { %6335 = vtanh.f32 %v7639_v9  ;;  %v1903_v29 = vadd.f32 %v6202_v22, %v6082_v14 }
 0x20c   : > { %v7642_v15 = vadd.f32 %v5979_v10, %v1903_v29  ;;  %v6034_v29 = vld [vmem:[%s6724_s26 + $0x38] sm:$0xff]  }
 0x20e   : > { %6337 = vtanh.f32 %v7642_v15 }
 0x217   : > { %v6336_v31 = vpop.eup %6335 }
 0x218   : > { %2190 = vrot.lane.b32.xlu0 %v6336_v31, %s6664_s29 }
 0x219   : > { %v6083_v37 = vpop.f32.mrf.mxu0 }
 0x21b   : > { %v6338_v25 = vpop.eup %6337  ;;  %v6084_v39 = vpop.f32.mrf.mxu0 }
 0x21c   : > { %v6085_v49 = vadd.f32 %v6084_v39, %v6083_v37  ;;  %2192 = vrot.lane.b32.xlu1 %v6338_v25, %s6664_s29 }
 0x21d   : > { %v6086_v27 = vpop.f32.mrf.mxu0 }
 0x21e   : > { %v1908_v53 = vadd.f32 %v6085_v49, %v1907_v21  ;;  %v5994_v21 = vunpack.c.l.bf16 %v6034_v29  ;;  %v5995_v49 = vunpack.c.h.bf16 %v6034_v29 }
 0x21f   : > { %v6087_v54 = vpop.f32.mrf.mxu0 }
 0x220   : > { %v7648_v55 = vadd.f32 %v5982_v50, %v1908_v53  ;;  %v6088_v60 = vadd.f32 %v6087_v54, %v6086_v27  ;;  %v5269_v54 = vmul.f32 -1.442695, %v7612_v24  ;;  %v5275_v24 = vmul.f32 -1.442695, %v7639_v9 }
 0x222   : > { %6339 = vtanh.f32 %v7648_v55  ;;  %v1911_v2 = vadd.f32 %v6088_v60, %v1910_v36  ;;  %v5270_v36 = vmul.f32 -1.442695, %v7615_v32  ;;  %v5271_v60 = vmul.f32 -1.442695, %v7621_v34  ;;  %v2069_v32 = vld [vmem:[#allocation3 + $0x18] sm:$0xff]  ;;  %v2070_v34 = vld [vmem:[#allocation3 + $0x20] sm:$0xff] }
 0x224   : > { %v7651_v44 = vadd.f32 %v5983_v1, %v1911_v2  ;;  %v5272_v2 = vmul.f32 -1.442695, %v7624_v59  ;;  %v5276_v59 = vmul.f32 -1.442695, %v7642_v15 }
 0x226   : > { %6341 = vtanh.f32 %v7651_v44  ;;  %v5278_v9 = vmul.f32 -1.442695, %v7651_v44 }
 0x22f   : > { %v6340_v45 = vpop.eup %6339 }
 0x230   : > { %2194 = vrot.lane.b32.xlu0 %v6340_v45, %s6664_s29  ;;  %v5273_v45 = vmul.f32 -1.442695, %v7630_v42  ;;  %v5277_v42 = vmul.f32 -1.442695, %v7648_v55  ;;  %v2074_v55 = vld [vmem:[#allocation3 + $0x40] sm:$0xff] }
 0x231   : > { %v6089_v3 = vpop.f32.mrf.mxu0 }
 0x233   : > { %v6342_v8 = vpop.eup %6341  ;;  %v6090_v13 = vpop.f32.mrf.mxu0 }
 0x234   : > { %v6091_v18 = vadd.f32 %v6090_v13, %v6089_v3  ;;  %2196 = vrot.lane.b32.xlu1 %v6342_v8, %s6664_s29  ;;  %v2068_v3 = vld [vmem:[#allocation3 + $0x10] sm:$0xff]  ;;  %v5274_v8 = vmul.f32 -1.442695, %v7633_v51  ;;  %v2071_v13 = vld [vmem:[#allocation3 + $0x28] sm:$0xff] }
 0x235   : > { %v6092_v19 = vpop.f32.mrf.mxu0 }
 0x236   : > { %v1916_v61 = vadd.f32 %v6205_v30, %v6091_v18 }
 0x237   : > { %v6093_v11 = vpop.f32.mrf.mxu0 }
 0x238   : > { %v7657_v16 = vadd.f32 %v5986_v17, %v1916_v61  ;;  %v6094_v26 = vadd.f32 %v6093_v11, %v6092_v19  ;;  %v2072_v17 = vld [vmem:[#allocation3 + $0x30] sm:$0xff]  ;;  %v2073_v61 = vld [vmem:[#allocation3 + $0x38] sm:$0xff] }
 0x23a   : > { %6343 = vtanh.f32 %v7657_v16  ;;  %v1919_v22 = vadd.f32 %v6206_v43, %v6094_v26 }
 0x23c   : > { %v7660_v23 = vadd.f32 %v5987_v20, %v1919_v22  ;;  %v2075_v22 = vld [vmem:[#allocation3 + $0x48] sm:$0xff] }
 0x23e   : > { %6345 = vtanh.f32 %v7660_v23 }
 0x247   : > { %v6344_v33 = vpop.eup %6343 }
 0x248   : > { %2198 = vrot.lane.b32.xlu0 %v6344_v33, %s6664_s29 }
 0x249   : > { %v6095_v12 = vpop.f32.mrf.mxu0 }
 0x24b   : > { %v6346_v41 = vpop.eup %6345  ;;  %v6096_v46 = vpop.f32.mrf.mxu0 }
 0x24c   : > { %v6097_v48 = vadd.f32 %v6096_v46, %v6095_v12  ;;  %2200 = vrot.lane.b32.xlu1 %v6346_v41, %s6664_s29  ;;  %v2077_v41 = vld [vmem:[#allocation3 + $0x58] sm:$0xff]  ;;  %v2078_v46 = vld [vmem:[#allocation3 + $0x60] sm:$0xff] }
 0x24d   : > { %v6098_v56 = vpop.f32.mrf.mxu0 }
 0x24e   : > { %v1924_v57 = vadd.f32 %v6097_v48, %v1923_v35 }
 0x24f   : > { %v6099_v58 = vpop.f32.mrf.mxu0 }
 0x250   : > { %v7666_v63 = vadd.f32 %v5990_v52, %v1924_v57  ;;  %v6100_v0 = vadd.f32 %v6099_v58, %v6098_v56  ;;  %v2079_v58 = vld [vmem:[#allocation3 + $0x68] sm:$0xff] }
 0x252   : > { %6347 = vtanh.f32 %v7666_v63  ;;  %v1927_v5 = vadd.f32 %v6100_v0, %v1926_v62  ;;  %v2080_v62 = vld [vmem:[#allocation3 + $0x70] sm:$0xff]  ;;  %v7706_v0 = vpop.permute.xlu1 %2100 }
 0x254   : > { %v7669_v6 = vadd.f32 %v5991_v4, %v1927_v5 }
 0x256   : > { %6349 = vtanh.f32 %v7669_v6 }
 0x25f   : > { %v6348_v10 = vpop.eup %6347 }
 0x260   : > { %2202 = vrot.lane.b32.xlu0 %v6348_v10, %s6664_s29  ;;  %v6101_v14 = vpop.f32.mrf.mxu0 }
 0x262   : > { %v6102_v31 = vpop.f32.mrf.mxu0 }
 0x263   : > { %v6350_v30 = vpop.eup %6349  ;;  %v6103_v37 = vadd.f32 %v6102_v31, %v6101_v14  ;;  %v2081_v31 = vld [vmem:[#allocation3 + $0x78] sm:$0xff] }
 0x264   : > { %2204 = vrot.lane.b32.xlu1 %v6350_v30, %s6664_s29  ;;  %v6104_v38 = vpop.f32.mrf.mxu0  ;;  %v5279_v30 = vmul.f32 -1.442695, %v7657_v16 }
 0x265   : > { %v1932_v25 = vadd.f32 %v6209_v28, %v6103_v37  ;;  %v2076_v28 = vld [vmem:[#allocation3 + $0x50] sm:$0xff] }
 0x266   : > { %v6105_v39 = vpop.f32.mrf.mxu0 }
 0x267   : > { %v7675_v43 = vadd.f32 %v5994_v21, %v1932_v25  ;;  %v6106_v50 = vadd.f32 %v6105_v39, %v6104_v38  ;;  %v2181_v38 = vpop.permute.xlu1 %2180 }
 0x269   : > { %6351 = vtanh.f32 %v7675_v43  ;;  %v1935_v27 = vadd.f32 %v6210_v47, %v6106_v50  ;;  %v7702_v47 = vpop.permute.xlu0 %2098 }
 0x26b   : > { %v7678_v53 = vadd.f32 %v5995_v49, %v1935_v27  ;;  %v5280_v49 = vmul.f32 -1.442695, %v7660_v23 }
 0x26d   : > { %6353 = vtanh.f32 %v7678_v53  ;;  %v2179_v5 = vpop.permute.xlu0 %2178 }
 0x26e   : > { %6355 = vpow2.f32 %v5269_v54  ;;  %v2185_v54 = vpop.permute.xlu1 %2184 }
 0x26f   : > { %6357 = vpow2.f32 %v5270_v36 }
 0x270   : > { %6359 = vpow2.f32 %v5271_v60 }
 0x271   : > { %6361 = vpow2.f32 %v5272_v2  ;;  %v2183_v25 = vpop.permute.xlu0 %2182 }
 0x272   : > { %6363 = vpow2.f32 %v5273_v45 }
 0x273   : > { %6365 = vpow2.f32 %v5274_v8 }
 0x274   : > { %6367 = vpow2.f32 %v5275_v24 }
 0x275   : > { %6369 = vpow2.f32 %v5276_v59  ;;  %v2187_v36 = vpop.permute.xlu0 %2186 }
 0x276   : > { %v6352_v1 = vpop.eup %6351  ;;  %6371 = vpow2.f32 %v5277_v42  ;;  %v2189_v45 = vpop.permute.xlu1 %2188 }
 0x277   : > { %2206 = vrot.lane.b32.xlu0 %v6352_v1, %s6664_s29  ;;  %6373 = vpow2.f32 %v5278_v9 }
 0x27a   : > { %v6354_v7 = vpop.eup %6353 }
 0x27b   : > { %2208 = vrot.lane.b32.xlu1 %v6354_v7, %s6664_s29  ;;  %2102 = vrot.lane.b32.xlu0 %v2068_v3, %s6664_s29  ;;  %v6356_v51 = vpop.eup %6355 }
 0x27c   : > { %v6358_v18 = vpop.eup %6357  ;;  %v2002_v19 = vadd.f32 1.0, %v6356_v51 }
 0x27d   : > { %v6360_v15 = vpop.eup %6359  ;;  %v2003_v11 = vadd.f32 1.0, %v6358_v18 }
 0x27e   : > { %v6362_v20 = vpop.eup %6361  ;;  %6375 = vrcp.f32 %v2002_v19  ;;  %v2004_v26 = vadd.f32 1.0, %v6360_v15 }
 0x27f   : > { %2104 = vrot.lane.b32.xlu1 %v2069_v32, %s6664_s29  ;;  %2106 = vrot.lane.b32.xlu0 %v2070_v34, %s6664_s29  ;;  %v6364_v44 = vpop.eup %6363  ;;  %6377 = vrcp.f32 %v2003_v11  ;;  %v2005_v33 = vadd.f32 1.0, %v6362_v20  ;;  %v5281_v20 = vmul.f32 -1.442695, %v7666_v63 }
 0x280   : > { %v6366_v35 = vpop.eup %6365  ;;  %6379 = vrcp.f32 %v2004_v26  ;;  %v2006_v12 = vadd.f32 1.0, %v6364_v44  ;;  %v5282_v26 = vmul.f32 -1.442695, %v7669_v6 }
 0x281   : > { %v6368_v40 = vpop.eup %6367  ;;  %6381 = vrcp.f32 %v2005_v33  ;;  %v2007_v48 = vadd.f32 1.0, %v6366_v35 }
 0x282   : > { %v6370_v52 = vpop.eup %6369  ;;  %6383 = vrcp.f32 %v2006_v12  ;;  %v2008_v56 = vadd.f32 1.0, %v6368_v40 }
 0x283   : > { %2108 = vrot.lane.b32.xlu1 %v2071_v13, %s6664_s29  ;;  %2110 = vrot.lane.b32.xlu0 %v2072_v17, %s6664_s29  ;;  %v6372_v57 = vpop.eup %6371  ;;  %6385 = vrcp.f32 %v2007_v48  ;;  %v2009_v4 = vadd.f32 1.0, %v6370_v52  ;;  %v5284_v48 = vmul.f32 -1.442695, %v7678_v53 }
 0x284   : > { %v6374_v10 = vpop.eup %6373  ;;  %6387 = vrcp.f32 %v2008_v56  ;;  %v2010_v14 = vadd.f32 1.0, %v6372_v57 }
 0x285   : > { %6389 = vrcp.f32 %v2009_v4  ;;  %v2011_v37 = vadd.f32 1.0, %v6374_v10 }
 0x286   : > { %6391 = vrcp.f32 %v2010_v14 }
 0x287   : > { %2112 = vrot.lane.b32.xlu1 %v2073_v61, %s6664_s29  ;;  %2114 = vrot.lane.b32.xlu0 %v2074_v55, %s6664_s29  ;;  %6393 = vpow2.f32 %v5279_v30 }
 0x288   : > { %6395 = vrcp.f32 %v2011_v37 }
 0x289   : > { %6397 = vpow2.f32 %v5280_v49 }
 0x28a   : > { %v2191_v3 = vpop.permute.xlu0 %2190 }
 0x28b   : > { %2116 = vrot.lane.b32.xlu1 %v2075_v22, %s6664_s29  ;;  %2118 = vrot.lane.b32.xlu0 %v2076_v28, %s6664_s29  ;;  %v7710_v29 = vpop.eup %6375 }
 0x28c   : > { %v2226_v21 = vmul.f32 %v7710_v29, %v2179_v5  ;;  %v7714_v39 = vpop.eup %6377 }
 0x28d   : > { %v7719_v50 = vpop.eup %6379  ;;  %v2227_v16 = vmul.f32 %v7714_v39, %v2181_v38 }
 0x28e   : > { %v2228_v27 = vmul.f32 %v7719_v50, %v2183_v25  ;;  %v7723_v60 = vpop.eup %6381  ;;  %v2193_v34 = vpop.permute.xlu1 %2192 }
 0x28f   : > { %2120 = vrot.lane.b32.xlu1 %v2077_v41, %s6664_s29  ;;  %2122 = vrot.lane.b32.xlu0 %v2078_v46, %s6664_s29  ;;  %v7727_v23 = vpop.eup %6383  ;;  %v2229_v1 = vmul.f32 %v7723_v60, %v2185_v54  ;;  %v5283_v46 = vmul.f32 -1.442695, %v7675_v43 }
 0x290   : > { %v2230_v2 = vmul.f32 %v7727_v23, %v2187_v36  ;;  %v7731_v7 = vpop.eup %6385 }
 0x291   : > { %v7735_v8 = vpop.eup %6387  ;;  %v2231_v24 = vmul.f32 %v7731_v7, %v2189_v45 }
 0x292   : > { %v2232_v32 = vmul.f32 %v7735_v8, %v2191_v3  ;;  %v7739_v42 = vpop.eup %6389 }
 0x293   : > { %2124 = vrot.lane.b32.xlu1 %v2079_v58, %s6664_s29  ;;  %2126 = vrot.lane.b32.xlu0 %v2080_v62, %s6664_s29  ;;  %v7743_v51 = vpop.eup %6391  ;;  %v2233_v17 = vmul.f32 %v7739_v42, %v2193_v34 }
 0x294   : > { %v6394_v13 = vpop.eup %6393 }
 0x295   : > { %v7747_v19 = vpop.eup %6395  ;;  %v2012_v61 = vadd.f32 1.0, %v6394_v13 }
 0x296   : > { %v6398_v15 = vpop.eup %6397 }
 0x297   : > { %2128 = vrot.lane.b32.xlu1 %v2081_v31, %s6664_s29  ;;  %2258 = vrot.lane.b32.xlu0 %v2226_v21, %s6664_s29  ;;  %v2013_v11 = vadd.f32 1.0, %v6398_v15  ;;  %6399 = vrcp.f32 %v2012_v61 }
 0x299   : > { %6401 = vrcp.f32 %v2013_v11 }
 0x29a   : > { %6403 = vpow2.f32 %v5281_v20 }
 0x29b   : > { %2260 = vrot.lane.b32.xlu1 %v2227_v16, %s6664_s29  ;;  %2262 = vrot.lane.b32.xlu0 %v2228_v27, %s6664_s29  ;;  %6405 = vpow2.f32 %v5282_v26 }
 0x29f   : > { %2264 = vrot.lane.b32.xlu1 %v2229_v1, %s6664_s29  ;;  %2266 = vrot.lane.b32.xlu0 %v2230_v2, %s6664_s29 }
 0x2a2   : > { %v2195_v59 = vpop.permute.xlu0 %2194 }
 0x2a3   : > { %2268 = vrot.lane.b32.xlu1 %v2231_v24, %s6664_s29  ;;  %2270 = vrot.lane.b32.xlu0 %v2232_v32, %s6664_s29  ;;  %v2234_v9 = vmul.f32 %v7743_v51, %v2195_v59  ;;  %v2146_v59 = vmul.f32 %v7710_v29, %v7702_v47 }
 0x2a4   : > { %v7755_v44 = vpop.eup %6399 }
 0x2a6   : > { %v2197_v18 = vpop.permute.xlu1 %2196  ;;  %v7758_v33 = vpop.eup %6401 }
 0x2a7   : > { %2272 = vrot.lane.b32.xlu1 %v2233_v17, %s6664_s29  ;;  %2274 = vrot.lane.b32.xlu0 %v2234_v9, %s6664_s29  ;;  %v2235_v55 = vmul.f32 %v7747_v19, %v2197_v18  ;;  %v6404_v35 = vpop.eup %6403  ;;  %v2147_v18 = vmul.f32 %v7714_v39, %v7706_v0 }
 0x2a8   : > { %v6406_v41 = vpop.eup %6405  ;;  %v2014_v63 = vadd.f32 1.0, %v6404_v35 }
 0x2a9   : > { %v2015_v6 = vadd.f32 1.0, %v6406_v41 }
 0x2aa   : > { %6407 = vrcp.f32 %v2014_v63 }
 0x2ab   : > { %2276 = vrot.lane.b32.xlu1 %v2235_v55, %s6664_s29  ;;  %6409 = vrcp.f32 %v2015_v6 }
 0x2ac   : > { %6411 = vpow2.f32 %v5283_v46 }
 0x2ad   : > { %6413 = vpow2.f32 %v5284_v48 }
 0x2b7   : > { %v7765_v52 = vpop.eup %6407 }
 0x2b8   : > { %v7768_v58 = vpop.eup %6409 }
 0x2b9   : > { %v6412_v62 = vpop.eup %6411 }
 0x2ba   : > { %v2199_v22 = vpop.permute.xlu0 %2198  ;;  %v2016_v10 = vadd.f32 1.0, %v6412_v62  ;;  %v6414_v43 = vpop.eup %6413 }
 0x2bb   : > { %v2236_v28 = vmul.f32 %v7755_v44, %v2199_v22  ;;  %v2017_v53 = vadd.f32 1.0, %v6414_v43 }
 0x2bc   : > { %6415 = vrcp.f32 %v2016_v10 }
 0x2bd   : > { %2278 = vrot.lane.b32.xlu0 %v2236_v28, %s6664_s29  ;;  %6417 = vrcp.f32 %v2017_v53 }
 0x2be   : > { %v2201_v12 = vpop.permute.xlu1 %2200 }
 0x2bf   : > { %v2237_v40 = vmul.f32 %v7758_v33, %v2201_v12 }
 0x2c1   : > { %2280 = vrot.lane.b32.xlu1 %v2237_v40, %s6664_s29 }
 0x2c9   : > { %v7773_v14 = vpop.eup %6415 }
 0x2ca   : > { %v7777_v21 = vpop.eup %6417 }
 0x2d2   : > { %v2203_v56 = vpop.permute.xlu0 %2202 }
 0x2d3   : > { %v2238_v57 = vmul.f32 %v7765_v52, %v2203_v56 }
 0x2d5   : > { %2282 = vrot.lane.b32.xlu0 %v2238_v57, %s6664_s29 }
 0x2d6   : > { %v2205_v4 = vpop.permute.xlu1 %2204 }
 0x2d7   : > { %v2239_v5 = vmul.f32 %v7768_v58, %v2205_v4 }
 0x2d9   : > { %2284 = vrot.lane.b32.xlu1 %v2239_v5, %s6664_s29 }
 0x2e9   : > { %v2207_v30 = vpop.permute.xlu0 %2206 }
 0x2ea   : > { %v2240_v31 = vmul.f32 %v7773_v14, %v2207_v30 }
 0x2ec   : > { %2286 = vrot.lane.b32.xlu0 %v2240_v31, %s6664_s29 }
 0x2ed   : > { %v2209_v37 = vpop.permute.xlu1 %2208  ;;  %v2103_v38 = vpop.permute.xlu0 %2102 }
 0x2ee   : > { %v2241_v25 = vmul.f32 %v7777_v21, %v2209_v37  ;;  %v2148_v15 = vmul.f32 %v7719_v50, %v2103_v38 }
 0x2f0   : > { %2288 = vrot.lane.b32.xlu1 %v2241_v25, %s6664_s29 }
 0x2f1   : > { %v2105_v49 = vpop.permute.xlu1 %2104  ;;  %v2107_v16 = vpop.permute.xlu0 %2106 }
 0x2f2   : > { %v2149_v26 = vmul.f32 %v7723_v60, %v2105_v49  ;;  %v2150_v47 = vmul.f32 %v7727_v23, %v2107_v16 }
 0x2f5   : > { %v2109_v27 = vpop.permute.xlu1 %2108  ;;  %v2111_v54 = vpop.permute.xlu0 %2110 }
 0x2f6   : > { %v2151_v12 = vmul.f32 %v7731_v7, %v2109_v27  ;;  %v2152_v40 = vmul.f32 %v7735_v8, %v2111_v54 }
 0x2f9   : > { %v2113_v36 = vpop.permute.xlu1 %2112  ;;  %v2115_v1 = vpop.permute.xlu0 %2114 }
 0x2fa   : > { %v2153_v48 = vmul.f32 %v7739_v42, %v2113_v36  ;;  %v2154_v56 = vmul.f32 %v7743_v51, %v2115_v1 }
 0x2fd   : > { %v2117_v2 = vpop.permute.xlu1 %2116  ;;  %v7781_v45 = vpop.permute.xlu0 %2118 }
 0x2fe   : > { %v2155_v43 = vmul.f32 %v7747_v19, %v2117_v2  ;;  %v2156_v1 = vmul.f32 %v7755_v44, %v7781_v45 }
 0x301   : > { %v7783_v3 = vpop.permute.xlu1 %2120  ;;  %v7785_v24 = vpop.permute.xlu0 %2122 }
 0x302   : > { %v2158_v45 = vmul.f32 %v7765_v52, %v7785_v24 }
 0x305   : > { %v7787_v32 = vpop.permute.xlu1 %2124  ;;  %v7789_v34 = vpop.permute.xlu0 %2126 }
 0x309   : > { %v7793_v13 = vpop.permute.xlu1 %2128  ;;  %v2259_v17 = vpop.permute.xlu0 %2258 }
 0x30a   : > { %v2306_v9 = vadd.f32 %v2259_v17, %v2146_v59  ;;  %v2157_v17 = vmul.f32 %v7758_v33, %v7783_v3 }
 0x30c   : > { %6419 = vtanh.f32 %v2306_v9  ;;  %2434 = vrot.lane.b32.xlu0 %v2306_v9, %s6666_s16 }
 0x30d   : > { %v2261_v61 = vpop.permute.xlu1 %2260  ;;  %v2263_v55 = vpop.permute.xlu0 %2262 }
 0x30e   : > { %v2307_v11 = vadd.f32 %v2261_v61, %v2147_v18  ;;  %v7799_v20 = vadd.f32 %v2263_v55, %v2148_v15 }
 0x310   : > { %6421 = vtanh.f32 %v2307_v11  ;;  %2436 = vrot.lane.b32.xlu1 %v2307_v11, %s6666_s16 }
 0x311   : > { %6423 = vtanh.f32 %v7799_v20  ;;  %v2265_v0 = vpop.permute.xlu1 %2264  ;;  %v2267_v22 = vpop.permute.xlu0 %2266 }
 0x312   : > { %v7805_v28 = vadd.f32 %v2265_v0, %v2149_v26  ;;  %v7807_v35 = vadd.f32 %v2267_v22, %v2150_v47  ;;  %v2159_v26 = vmul.f32 %v7768_v58, %v7787_v32 }
 0x314   : > { %6425 = vtanh.f32 %v7805_v28 }
 0x315   : > { %6427 = vtanh.f32 %v7807_v35  ;;  %v2269_v41 = vpop.permute.xlu1 %2268  ;;  %v2271_v63 = vpop.permute.xlu0 %2270 }
 0x316   : > { %v7813_v6 = vadd.f32 %v2269_v41, %v2151_v12  ;;  %v7815_v46 = vadd.f32 %v2271_v63, %v2152_v40  ;;  %v2160_v12 = vmul.f32 %v7773_v14, %v7789_v34  ;;  %v2161_v41 = vmul.f32 %v7777_v21, %v7793_v13 }
 0x318   : > { %6429 = vtanh.f32 %v7813_v6 }
 0x319   : > { %v6420_v57 = vpop.eup %6419  ;;  %6431 = vtanh.f32 %v7815_v46  ;;  %v2273_v62 = vpop.permute.xlu1 %2272 }
 0x31a   : > { %v2275_v4 = vpop.permute.xlu0 %2274  ;;  %v7821_v5 = vadd.f32 %v2273_v62, %v2153_v48  ;;  %2354 = vrot.lane.b32.xlu0 %v6420_v57, %s6664_s29 }
 0x31b   : > { %v7823_v10 = vadd.f32 %v2275_v4, %v2154_v56 }
 0x31c   : > { %6433 = vtanh.f32 %v7821_v5 }
 0x31d   : > { %v6422_v53 = vpop.eup %6421  ;;  %6435 = vtanh.f32 %v7823_v10  ;;  %v2277_v30 = vpop.permute.xlu1 %2276 }
 0x31e   : > { %v6424_v31 = vpop.eup %6423  ;;  %v7829_v37 = vadd.f32 %v2277_v30, %v2155_v43  ;;  %2356 = vrot.lane.b32.xlu1 %v6422_v53, %s6664_s29 }
 0x31f   : > { %2358 = vrot.lane.b32.xlu0 %v6424_v31, %s6664_s29 }
 0x320   : > { %6437 = vtanh.f32 %v7829_v37 }
 0x321   : > { %v6426_v38 = vpop.eup %6425 }
 0x322   : > { %v6428_v25 = vpop.eup %6427  ;;  %2360 = vrot.lane.b32.xlu1 %v6426_v38, %s6664_s29 }
 0x323   : > { %2362 = vrot.lane.b32.xlu0 %v6428_v25, %s6664_s29 }
 0x325   : > { %v6430_v49 = vpop.eup %6429 }
 0x326   : > { %v6432_v16 = vpop.eup %6431  ;;  %2364 = vrot.lane.b32.xlu1 %v6430_v49, %s6664_s29 }
 0x327   : > { %2366 = vrot.lane.b32.xlu0 %v6432_v16, %s6664_s29 }
 0x329   : > { %v6434_v27 = vpop.eup %6433 }
 0x32a   : > { %v6436_v54 = vpop.eup %6435  ;;  %2368 = vrot.lane.b32.xlu1 %v6434_v27, %s6664_s29 }
 0x32b   : > { %2370 = vrot.lane.b32.xlu0 %v6436_v54, %s6664_s29 }
 0x32d   : > { %v6438_v36 = vpop.eup %6437 }
 0x32e   : > { %2372 = vrot.lane.b32.xlu1 %v6438_v36, %s6664_s29 }
 0x32f   : > { %v2279_v2 = vpop.permute.xlu0 %2278 }
 0x330   : > { %v2316_v59 = vadd.f32 %v2279_v2, %v2156_v1 }
 0x332   : > { %6439 = vtanh.f32 %v2316_v59 }
 0x333   : > { %v2281_v9 = vpop.permute.xlu1 %2280 }
 0x334   : > { %v2317_v18 = vadd.f32 %v2281_v9, %v2157_v17 }
 0x336   : > { %6441 = vtanh.f32 %v2317_v18 }
 0x33f   : > { %v6440_v15 = vpop.eup %6439 }
 0x340   : > { %2374 = vrot.lane.b32.xlu0 %v6440_v15, %s6664_s29 }
 0x343   : > { %v6442_v61 = vpop.eup %6441 }
 0x344   : > { %2376 = vrot.lane.b32.xlu1 %v6442_v61, %s6664_s29 }
 0x347   : > { %v2283_v55 = vpop.permute.xlu0 %2282 }
 0x348   : > { %v2318_v11 = vadd.f32 %v2283_v55, %v2158_v45 }
 0x34a   : > { %6443 = vtanh.f32 %v2318_v11 }
 0x34b   : > { %v2285_v3 = vpop.permute.xlu1 %2284 }
 0x34c   : > { %v2319_v47 = vadd.f32 %v2285_v3, %v2159_v26 }
 0x34e   : > { %6445 = vtanh.f32 %v2319_v47 }
 0x357   : > { %v6444_v0 = vpop.eup %6443 }
 0x358   : > { %2378 = vrot.lane.b32.xlu0 %v6444_v0, %s6664_s29 }
 0x35b   : > { %v6446_v22 = vpop.eup %6445 }
 0x35c   : > { %2380 = vrot.lane.b32.xlu1 %v6446_v22, %s6664_s29 }
 0x35e   : > { %v2287_v40 = vpop.permute.xlu0 %2286 }
 0x35f   : > { %v2320_v24 = vadd.f32 %v2287_v40, %v2160_v12 }
 0x361   : > { %6447 = vtanh.f32 %v2320_v24 }
 0x362   : > { %v2289_v32 = vpop.permute.xlu1 %2288 }
 0x363   : > { %v2321_v63 = vadd.f32 %v2289_v32, %v2161_v41 }
 0x365   : > { %6449 = vtanh.f32 %v2321_v63 }
 0x36e   : > { %v6448_v48 = vpop.eup %6447 }
 0x36f   : > { %2382 = vrot.lane.b32.xlu0 %v6448_v48, %s6664_s29 }
 0x372   : > { %v6450_v56 = vpop.eup %6449 }
 0x373   : > { %2384 = vrot.lane.b32.xlu1 %v6450_v56, %s6664_s29  ;;  %2438 = vrot.lane.b32.xlu0 %v7799_v20, %s6666_s16 }
 0x377   : > { %2440 = vrot.lane.b32.xlu1 %v7805_v28, %s6666_s16  ;;  %2442 = vrot.lane.b32.xlu0 %v7807_v35, %s6666_s16 }
 0x37b   : > { %2444 = vrot.lane.b32.xlu1 %v7813_v6, %s6666_s16  ;;  %2446 = vrot.lane.b32.xlu0 %v7815_v46, %s6666_s16 }
 0x37e   : > { %v2435_v34 = vpop.permute.xlu0 %2434 }
 0x37f   : > { %2482 = vst.msk [vmem:[#allocation3] sm:$0xff] %vm1719_vm3, %v2435_v34  ;;  %2448 = vrot.lane.b32.xlu1 %v7821_v5, %s6666_s16  ;;  %2450 = vrot.lane.b32.xlu0 %v7823_v10, %s6666_s16 }
 0x382   : > { %v2437_v13 = vpop.permute.xlu1 %2436 }
 0x383   : > { %2483 = vst.msk [vmem:[#allocation3 + $0x8] sm:$0xff] %vm1719_vm3, %v2437_v13  ;;  %2452 = vrot.lane.b32.xlu1 %v7829_v37, %s6666_s16  ;;  %2454 = vrot.lane.b32.xlu0 %v2316_v59, %s6666_s16 }
 0x387   : > { %2456 = vrot.lane.b32.xlu1 %v2317_v18, %s6666_s16  ;;  %2458 = vrot.lane.b32.xlu0 %v2318_v11, %s6666_s16 }
 0x38b   : > { %2460 = vrot.lane.b32.xlu1 %v2319_v47, %s6666_s16  ;;  %2462 = vrot.lane.b32.xlu0 %v2320_v24, %s6666_s16 }
 0x38c   : > { %v2355_v20 = vpop.permute.xlu0 %2354 }
 0x38d   : > { %v2402_v28 = vmul.f32 %v7710_v29, %v2355_v20 }
 0x38f   : > { %2464 = vrot.lane.b32.xlu1 %v2321_v63, %s6666_s16  ;;  %2514 = vrot.lane.b32.xlu0 %v2402_v28, %s6665_s30 }
 0x390   : > { %v2357_v35 = vpop.permute.xlu1 %2356 }
 0x391   : > { %v2403_v6 = vmul.f32 %v7714_v39, %v2357_v35  ;;  %v2359_v46 = vpop.permute.xlu0 %2358 }
 0x392   : > { %v2404_v57 = vmul.f32 %v7719_v50, %v2359_v46 }
 0x393   : > { %2516 = vrot.lane.b32.xlu1 %v2403_v6, %s6665_s30 }
 0x394   : > { %2518 = vrot.lane.b32.xlu0 %v2404_v57, %s6665_s30  ;;  %v2361_v62 = vpop.permute.xlu1 %2360 }
 0x395   : > { %v2405_v4 = vmul.f32 %v7723_v60, %v2361_v62  ;;  %v2363_v5 = vpop.permute.xlu0 %2362 }
 0x396   : > { %v2406_v29 = vmul.f32 %v7727_v23, %v2363_v5 }
 0x397   : > { %2520 = vrot.lane.b32.xlu1 %v2405_v4, %s6665_s30 }
 0x398   : > { %2522 = vrot.lane.b32.xlu0 %v2406_v29, %s6665_s30  ;;  %v2365_v10 = vpop.permute.xlu1 %2364 }
 0x399   : > { %v2407_v39 = vmul.f32 %v7731_v7, %v2365_v10  ;;  %v2367_v43 = vpop.permute.xlu0 %2366 }
 0x39a   : > { %v2408_v50 = vmul.f32 %v7735_v8, %v2367_v43 }
 0x39b   : > { %2524 = vrot.lane.b32.xlu1 %v2407_v39, %s6665_s30 }
 0x39c   : > { %2526 = vrot.lane.b32.xlu0 %v2408_v50, %s6665_s30  ;;  %v2369_v53 = vpop.permute.xlu1 %2368 }
 0x39d   : > { %v2409_v60 = vmul.f32 %v7739_v42, %v2369_v53  ;;  %v2371_v30 = vpop.permute.xlu0 %2370 }
 0x39e   : > { %v2410_v23 = vmul.f32 %v7743_v51, %v2371_v30 }
 0x39f   : > { %2528 = vrot.lane.b32.xlu1 %v2409_v60, %s6665_s30 }
 0x3a0   : > { %2530 = vrot.lane.b32.xlu0 %v2410_v23, %s6665_s30  ;;  %v2373_v31 = vpop.permute.xlu1 %2372 }
 0x3a1   : > { %v2411_v7 = vmul.f32 %v7747_v19, %v2373_v31 }
 0x3a3   : > { %2532 = vrot.lane.b32.xlu1 %v2411_v7, %s6665_s30 }
 0x3b2   : > { %v2375_v8 = vpop.permute.xlu0 %2374 }
 0x3b3   : > { %v2412_v37 = vmul.f32 %v7755_v44, %v2375_v8 }
 0x3b5   : > { %2534 = vrot.lane.b32.xlu0 %v2412_v37, %s6665_s30 }
 0x3b6   : > { %v2377_v38 = vpop.permute.xlu1 %2376 }
 0x3b7   : > { %v2413_v42 = vmul.f32 %v7758_v33, %v2377_v38 }
 0x3b9   : > { %2536 = vrot.lane.b32.xlu1 %v2413_v42, %s6665_s30 }
 0x3ca   : > { %v2379_v51 = vpop.permute.xlu0 %2378 }
 0x3cb   : > { %v2414_v25 = vmul.f32 %v7765_v52, %v2379_v51 }
 0x3cd   : > { %2538 = vrot.lane.b32.xlu0 %v2414_v25, %s6665_s30 }
 0x3ce   : > { %v2381_v49 = vpop.permute.xlu1 %2380 }
 0x3cf   : > { %v2415_v19 = vmul.f32 %v7768_v58, %v2381_v49 }
 0x3d1   : > { %2540 = vrot.lane.b32.xlu1 %v2415_v19, %s6665_s30 }
 0x3e1   : > { %v2383_v16 = vpop.permute.xlu0 %2382 }
 0x3e2   : > { %v2416_v44 = vmul.f32 %v7773_v14, %v2383_v16 }
 0x3e4   : > { %2542 = vrot.lane.b32.xlu0 %v2416_v44, %s6665_s30 }
 0x3e5   : > { %v2385_v27 = vpop.permute.xlu1 %2384  ;;  %v2439_v54 = vpop.permute.xlu0 %2438 }
 0x3e6   : > { %v2417_v33 = vmul.f32 %v7777_v21, %v2385_v27  ;;  %2484 = vst.msk [vmem:[#allocation3 + $0x10] sm:$0xff] %vm1719_vm3, %v2439_v54 }
 0x3e8   : > { %2544 = vrot.lane.b32.xlu1 %v2417_v33, %s6665_s30 }
 0x3e9   : > { %v2441_v52 = vpop.permute.xlu1 %2440  ;;  %v2443_v36 = vpop.permute.xlu0 %2442 }
 0x3ea   : > { %2485 = vst.msk [vmem:[#allocation3 + $0x18] sm:$0xff] %vm1719_vm3, %v2441_v52  ;;  %2486 = vst.msk [vmem:[#allocation3 + $0x20] sm:$0xff] %vm1719_vm3, %v2443_v36 }
 0x3ed   : > { %v2445_v58 = vpop.permute.xlu1 %2444  ;;  %v2447_v1 = vpop.permute.xlu0 %2446 }
 0x3ee   : > { %2487 = vst.msk [vmem:[#allocation3 + $0x28] sm:$0xff] %vm1719_vm3, %v2445_v58  ;;  %2488 = vst.msk [vmem:[#allocation3 + $0x30] sm:$0xff] %vm1719_vm3, %v2447_v1 }
 0x3f1   : > { %v2449_v14 = vpop.permute.xlu1 %2448  ;;  %v2451_v2 = vpop.permute.xlu0 %2450 }
 0x3f2   : > { %2489 = vst.msk [vmem:[#allocation3 + $0x38] sm:$0xff] %vm1719_vm3, %v2449_v14  ;;  %2490 = vst.msk [vmem:[#allocation3 + $0x40] sm:$0xff] %vm1719_vm3, %v2451_v2 }
 0x3f5   : > { %v2453_v21 = vpop.permute.xlu1 %2452  ;;  %v2455_v59 = vpop.permute.xlu0 %2454 }
 0x3f6   : > { %2491 = vst.msk [vmem:[#allocation3 + $0x48] sm:$0xff] %vm1719_vm3, %v2453_v21  ;;  %2492 = vst.msk [vmem:[#allocation3 + $0x50] sm:$0xff] %vm1719_vm3, %v2455_v59 }
 0x3f9   : > { %v2457_v17 = vpop.permute.xlu1 %2456  ;;  %v2459_v9 = vpop.permute.xlu0 %2458 }
 0x3fa   : > { %2493 = vst.msk [vmem:[#allocation3 + $0x58] sm:$0xff] %vm1719_vm3, %v2457_v17  ;;  %2494 = vst.msk [vmem:[#allocation3 + $0x60] sm:$0xff] %vm1719_vm3, %v2459_v9 }
 0x3fd   : > { %v2461_v18 = vpop.permute.xlu1 %2460  ;;  %v2463_v15 = vpop.permute.xlu0 %2462 }
 0x3fe   : > { %2495 = vst.msk [vmem:[#allocation3 + $0x68] sm:$0xff] %vm1719_vm3, %v2461_v18  ;;  %2496 = vst.msk [vmem:[#allocation3 + $0x70] sm:$0xff] %vm1719_vm3, %v2463_v15 }
 0x401   : > { %v2465_v61 = vpop.permute.xlu1 %2464  ;;  %v2515_v45 = vpop.permute.xlu0 %2514 }
 0x402   : > { %2497 = vst.msk [vmem:[#allocation3 + $0x78] sm:$0xff] %vm1719_vm3, %v2465_v61  ;;  %5285 = vst.msk [vmem:[%s7930_s18 + $0x19] sm:$0xff] %vm1719_vm3, %v2515_v45 }
 0x405   : > { %v2517_v55 = vpop.permute.xlu1 %2516 }
 0x406   : > { %5286 = vst.msk [vmem:[%s7930_s18 + $0x21] sm:$0xff] %vm1719_vm3, %v2517_v55  ;;  %v2519_v11 = vpop.permute.xlu0 %2518 }
 0x407   : > { %5287 = vst.msk [vmem:[%s7930_s18 + $0x31] sm:$0xff] %vm1719_vm3, %v2519_v11 }
 0x409   : > { %v2521_v26 = vpop.permute.xlu1 %2520 }
 0x40a   : > { %5288 = vst.msk [vmem:[%s7930_s18 + $0x39] sm:$0xff] %vm1719_vm3, %v2521_v26  ;;  %v2523_v3 = vpop.permute.xlu0 %2522 }
 0x40b   : > { %5289 = vst.msk [vmem:[%s7930_s18 + $0x49] sm:$0xff] %vm1719_vm3, %v2523_v3 }
 0x40d   : > { %v2525_v47 = vpop.permute.xlu1 %2524 }
 0x40e   : > { %5290 = vst.msk [vmem:[%s7930_s18 + $0x51] sm:$0xff] %vm1719_vm3, %v2525_v47  ;;  %v2527_v0 = vpop.permute.xlu0 %2526 }
 0x40f   : > { %5291 = vst.msk [vmem:[%s7930_s18 + $0x61] sm:$0xff] %vm1719_vm3, %v2527_v0 }
 0x411   : > { %v2529_v22 = vpop.permute.xlu1 %2528 }
 0x412   : > { %5292 = vst.msk [vmem:[%s7930_s18 + $0x69] sm:$0xff] %vm1719_vm3, %v2529_v22  ;;  %v2531_v12 = vpop.permute.xlu0 %2530 }
 0x413   : > { %5293 = vst.msk [vmem:[%s7930_s18 + $0x79] sm:$0xff] %vm1719_vm3, %v2531_v12 }
 0x415   : > { %v2533_v40 = vpop.permute.xlu1 %2532 }
 0x416   : > { %5294 = vst.msk [vmem:[%s7930_s18 + $0x81] sm:$0xff] %vm1719_vm3, %v2533_v40 }
 0x427   : > { %v2535_v24 = vpop.permute.xlu0 %2534 }
 0x428   : > { %5295 = vst.msk [vmem:[%s7930_s18 + $0x91] sm:$0xff] %vm1719_vm3, %v2535_v24 }
 0x42b   : > { %v2537_v41 = vpop.permute.xlu1 %2536 }
 0x42c   : > { %5296 = vst.msk [vmem:[%s7930_s18 + $0x99] sm:$0xff] %vm1719_vm3, %v2537_v41 }
 0x43f   : > { %v2539_v32 = vpop.permute.xlu0 %2538 }
 0x440   : > { %5297 = vst.msk [vmem:[%s7930_s18 + $0xa9] sm:$0xff] %vm1719_vm3, %v2539_v32 }
 0x443   : > { %v2541_v63 = vpop.permute.xlu1 %2540 }
 0x444   : > { %5298 = vst.msk [vmem:[%s7930_s18 + $0xb1] sm:$0xff] %vm1719_vm3, %v2541_v63 }
 0x456   : > { %v2543_v48 = vpop.permute.xlu0 %2542 }
 0x457   : > { %5299 = vst.msk [vmem:[%s7930_s18 + $0xc1] sm:$0xff] %vm1719_vm3, %v2543_v48  ;;  %2583 = sbr.rel (%p5301_p9) target bundleno = 1124 (0x464), region = 36 }
 0x45a   : > { %v2545_v56 = vpop.permute.xlu1 %2544 }
 0x45b   : > { %5300 = vst.msk [vmem:[%s7930_s18 + $0xc9] sm:$0xff] %vm1719_vm3, %v2545_v56 }
 0x45c   : > { %2584 = vst.msk [vmem:[%s6719_s21] sm:$0xff] %vm1719_vm3, %v2515_v45  ;;  %2585 = vst.msk [vmem:[%s6719_s21 + $0x8] sm:$0xff] %vm1719_vm3, %v2517_v55 }
 0x45d   : > { %2586 = vst.msk [vmem:[%s6719_s21 + $0x10] sm:$0xff] %vm1719_vm3, %v2519_v11  ;;  %2587 = vst.msk [vmem:[%s6719_s21 + $0x18] sm:$0xff] %vm1719_vm3, %v2521_v26 }
 0x45e   : > { %2588 = vst.msk [vmem:[%s6719_s21 + $0x20] sm:$0xff] %vm1719_vm3, %v2523_v3  ;;  %2589 = vst.msk [vmem:[%s6719_s21 + $0x28] sm:$0xff] %vm1719_vm3, %v2525_v47 }
 0x45f   : > { %2590 = vst.msk [vmem:[%s6719_s21 + $0x30] sm:$0xff] %vm1719_vm3, %v2527_v0  ;;  %2591 = vst.msk [vmem:[%s6719_s21 + $0x38] sm:$0xff] %vm1719_vm3, %v2529_v22 }
 0x460   : > { %2592 = vst.msk [vmem:[%s6719_s21 + $0x40] sm:$0xff] %vm1719_vm3, %v2531_v12  ;;  %2593 = vst.msk [vmem:[%s6719_s21 + $0x48] sm:$0xff] %vm1719_vm3, %v2533_v40 }
 0x461   : > { %2594 = vst.msk [vmem:[%s6719_s21 + $0x50] sm:$0xff] %vm1719_vm3, %v2535_v24  ;;  %2595 = vst.msk [vmem:[%s6719_s21 + $0x58] sm:$0xff] %vm1719_vm3, %v2537_v41 }
 0x462   : > { %2596 = vst.msk [vmem:[%s6719_s21 + $0x60] sm:$0xff] %vm1719_vm3, %v2539_v32  ;;  %2597 = vst.msk [vmem:[%s6719_s21 + $0x68] sm:$0xff] %vm1719_vm3, %v2541_v63 }
 0x463   : > { %2598 = vst.msk [vmem:[%s6719_s21 + $0x70] sm:$0xff] %vm1719_vm3, %v2543_v48  ;;  %2599 = vst.msk [vmem:[%s6719_s21 + $0x78] sm:$0xff] %vm1719_vm3, %v2545_v56 }
 0x464 PF:  {}
 0x46a   : > { %v5462_v34 = vld [vmem:[%s7034_s25 + $0xda] sm:$0xff]  ;;  %v5463_v20 = vld [vmem:[%s7034_s25 + $0xe2] sm:$0xff]  ;;  %v8006_v46 = vld [vmem:[%s7034_s25 + $0xca] sm:$0xff] }
 0x46b   : > { %v5334_v13 = vld [vmem:[%s7034_s25 + $0xc1] sm:$0xff]  ;;  %v8002_v28 = vpack.c.bf16 %v5462_v34, %v5462_v34  ;;  %v5335_v6 = vld [vmem:[%s7034_s25 + $0xc9] sm:$0xff]  ;;  %v8011_v62 = vpack.c.bf16 %v5463_v20, %v5463_v20  ;;  %v5495_v5 = vld [vmem:[%s7034_s25 + $0xf8] sm:$0xff]  ;;  %v5853_v37 = vpack.c.bf16 %v8006_v46, %v8006_v46 }
 0x46c   : > { %v5836_v35 = vpack.c.bf16 %v5334_v13, %v5334_v13  ;;  %v8009_v57 = vld [vmem:[%s7034_s25 + $0xc2] sm:$0xff]  ;;  %v5837_v4 = vpack.c.bf16 %v5335_v6, %v5335_v6  ;;  %v5494_v29 = vld [vmem:[%s7034_s25 + $0xf0] sm:$0xff]  ;;  %v8019_v39 = vpack.c.bf16 %v5495_v5, %v5495_v5  ;;  %v5398_v53 = vld [vmem:[%s7034_s25 + $0xd8] sm:$0xff] }
 0x46d   : > { %v5399_v10 = vld [vmem:[%s7034_s25 + $0xe0] sm:$0xff]  ;;  %3244 = vrot.lane.b32.xlu1 %v8002_v28, %s6664_s29  ;;  %v8021_v43 = vpack.c.bf16 %v5494_v29, %v5494_v29  ;;  %v8027_v30 = vpack.c.bf16 %v5398_v53, %v5398_v53  ;;  %v5526_v31 = vld [vmem:[%s7034_s25 + $0xf1] sm:$0xff]  ;;  %v5852_v16 = vpack.c.bf16 %v8009_v57, %v8009_v57  ;;  %v5496_v33 = vld [vmem:[%s7034_s25 + $0x108] sm:$0xff] }
 0x46e   : > { %2762 = vrot.lane.b32.xlu0 %v5836_v35, %s6664_s29  ;;  %v8023_v50 = vpack.c.bf16 %v5399_v10, %v5399_v10  ;;  %v5527_v60 = vld [vmem:[%s7034_s25 + $0xf9] sm:$0xff]  ;;  %v5337_v7 = vld [vmem:[%s7034_s25 + $0xe1] sm:$0xff]  ;;  %v8036_v38 = vpack.c.bf16 %v5526_v31, %v5526_v31  ;;  %v5497_v19 = vld [vmem:[%s7034_s25 + $0x110] sm:$0xff]  ;;  %2687 = vst.msk [vmem:[#allocation4 + $0x3c] sm:$0xf] %vm407_vm2, %v8019_v39  ;;  %v8069_v58 = vpack.c.bf16 %v5496_v33, %v5496_v33 }
 0x46f   : > { %v8029_v23 = vpack.c.bf16 %v5527_v60, %v5527_v60  ;;  %v5336_v8 = vld [vmem:[%s7034_s25 + $0xd9] sm:$0xff]  ;;  %v8038_v42 = vpack.c.bf16 %v5337_v7, %v5337_v7  ;;  %2686 = vst.msk [vmem:[#allocation4 + $0x30] sm:$0xf] %vm407_vm2, %v8021_v43  ;;  %v8057_v54 = vpack.c.bf16 %v5497_v19, %v5497_v19  ;;  %v5529_v52 = vld [vmem:[%s7034_s25 + $0x111] sm:$0xff]  ;;  %v5528_v36 = vld [vmem:[%s7034_s25 + $0x109] sm:$0xff] }
 0x470   : > { %v8040_v51 = vpack.c.bf16 %v5336_v8, %v5336_v8  ;;  %v5465_v25 = vld [vmem:[%s7034_s25 + $0xfa] sm:$0xff]  ;;  %v5464_v49 = vld [vmem:[%s7034_s25 + $0xf2] sm:$0xff]  ;;  %2685 = vst.msk [vmem:[#allocation4 + $0x24] sm:$0xf] %vm407_vm2, %v8023_v50  ;;  %2684 = vst.msk [vmem:[#allocation4 + $0x18] sm:$0xf] %vm407_vm2, %v8027_v30  ;;  %v8071_v1 = vpack.c.bf16 %v5529_v52, %v5529_v52  ;;  %v8073_v14 = vpack.c.bf16 %v5528_v36, %v5528_v36 }
 0x471   : > { %v8053_v44 = vpack.c.bf16 %v5465_v25, %v5465_v25  ;;  %v8055_v27 = vpack.c.bf16 %v5464_v49, %v5464_v49  ;;  %3167 = vst.msk [vmem:[#allocation4 + $0x28] sm:$0xf] %vm407_vm2, %v8029_v23  ;;  %3246 = vrot.lane.b32.xlu1 %v8011_v62, %s6664_s29  ;;  %v5467_v2 = vld [vmem:[%s7034_s25 + $0x112] sm:$0xff]  ;;  %v5466_v21 = vld [vmem:[%s7034_s25 + $0x10a] sm:$0xff]  ;;  %3165 = vst.msk [vmem:[#allocation4 + $0x10] sm:$0xf] %vm407_vm2, %v8038_v42 }
 0x472   : > { %2764 = vrot.lane.b32.xlu0 %v5837_v4, %s6664_s29  ;;  %3164 = vst.msk [vmem:[#allocation4 + $0x4] sm:$0xf] %vm407_vm2, %v8040_v51  ;;  %3166 = vst.msk [vmem:[#allocation4 + $0x1c] sm:$0xf] %vm407_vm2, %v8036_v38  ;;  %v8083_v59 = vpack.c.bf16 %v5467_v2, %v5467_v2  ;;  %v8085_v17 = vpack.c.bf16 %v5466_v21, %v5466_v21  ;;  %v5499_v9 = vld [vmem:[%s7034_s25 + $0x128] sm:$0xff]  ;;  %v5498_v18 = vld [vmem:[%s7034_s25 + $0x120] sm:$0xff] }
 0x473   : > { %v5531_v15 = vld [vmem:[%s7034_s25 + $0x129] sm:$0xff]  ;;  %3646 = vst.msk [vmem:[#allocation4 + $0x8] sm:$0xf] %vm407_vm2, %v8055_v27  ;;  %3647 = vst.msk [vmem:[#allocation4 + $0x14] sm:$0xf] %vm407_vm2, %v8053_v44  ;;  %v8096_v61 = vpack.c.bf16 %v5499_v9, %v5499_v9  ;;  %v8098_v45 = vpack.c.bf16 %v5498_v18, %v5498_v18  ;;  %v5530_v11 = vld [vmem:[%s7034_s25 + $0x121] sm:$0xff] }
 0x474   : > { %2689 = vst.msk [vmem:[#allocation4 + $0x54] sm:$0xf] %vm407_vm2, %v8057_v54  ;;  %v8100_v55 = vpack.c.bf16 %v5531_v15, %v5531_v15  ;;  %v5469_v26 = vld [vmem:[%s7034_s25 + $0x12a] sm:$0xff]  ;;  %v5468_v3 = vld [vmem:[%s7034_s25 + $0x122] sm:$0xff]  ;;  %3169 = vst.msk [vmem:[#allocation4 + $0x40] sm:$0xf] %vm407_vm2, %v8071_v1  ;;  %v8111_v47 = vpack.c.bf16 %v5530_v11, %v5530_v11 }
 0x475   : > { %3168 = vst.msk [vmem:[#allocation4 + $0x34] sm:$0xf] %vm407_vm2, %v8073_v14  ;;  %2688 = vst.msk [vmem:[#allocation4 + $0x48] sm:$0xf] %vm407_vm2, %v8069_v58  ;;  %v8113_v0 = vpack.c.bf16 %v5469_v26, %v5469_v26  ;;  %v8115_v22 = vpack.c.bf16 %v5468_v3, %v5468_v3  ;;  %v5501_v12 = vld [vmem:[%s7034_s25 + $0x140] sm:$0xff]  ;;  %v5500_v40 = vld [vmem:[%s7034_s25 + $0x138] sm:$0xff]  ;;  %2892 = vrot.lane.b32.xlu1 %v5853_v37, %s6665_s30 }
 0x476   : > { %v5533_v24 = vld [vmem:[%s7034_s25 + $0x141] sm:$0xff]  ;;  %3648 = vst.msk [vmem:[#allocation4 + $0x20] sm:$0xf] %vm407_vm2, %v8085_v17  ;;  %3649 = vst.msk [vmem:[#allocation4 + $0x2c] sm:$0xf] %vm407_vm2, %v8083_v59  ;;  %2890 = vrot.lane.b32.xlu0 %v5852_v16, %s6665_s30  ;;  %v8126_v41 = vpack.c.bf16 %v5501_v12, %v5501_v12  ;;  %v8128_v32 = vpack.c.bf16 %v5500_v40, %v5500_v40  ;;  %v5532_v48 = vld [vmem:[%s7034_s25 + $0x139] sm:$0xff] }
 0x477   : > { %v8130_v63 = vpack.c.bf16 %v5533_v24, %v5533_v24  ;;  %v5471_v56 = vld [vmem:[%s7034_s25 + $0x142] sm:$0xff]  ;;  %3171 = vst.msk [vmem:[#allocation4 + $0x58] sm:$0xf] %vm407_vm2, %v8100_v55  ;;  %2691 = vst.msk [vmem:[#allocation4 + $0x6c] sm:$0xf] %vm407_vm2, %v8096_v61  ;;  %v8140_v34 = vpack.c.bf16 %v5532_v48, %v5532_v48  ;;  %v5470_v20 = vld [vmem:[%s7034_s25 + $0x13a] sm:$0xff] }
 0x478   : > { %2690 = vst.msk [vmem:[#allocation4 + $0x60] sm:$0xf] %vm407_vm2, %v8098_v45  ;;  %v8142_v13 = vpack.c.bf16 %v5471_v56, %v5471_v56  ;;  %v5503_v35 = vld [vmem:[%s7034_s25 + $0x158] sm:$0xff]  ;;  %v5502_v6 = vld [vmem:[%s7034_s25 + $0x150] sm:$0xff]  ;;  %3170 = vst.msk [vmem:[#allocation4 + $0x4c] sm:$0xf] %vm407_vm2, %v8111_v47  ;;  %v8153_v46 = vpack.c.bf16 %v5470_v20, %v5470_v20 }
 0x479   : > { %3650 = vst.msk [vmem:[#allocation4 + $0x38] sm:$0xf] %vm407_vm2, %v8115_v22  ;;  %3651 = vst.msk [vmem:[#allocation4 + $0x44] sm:$0xf] %vm407_vm2, %v8113_v0  ;;  %v8155_v57 = vpack.c.bf16 %v5503_v35, %v5503_v35  ;;  %v8157_v4 = vpack.c.bf16 %v5502_v6, %v5502_v6  ;;  %v6451_v5 = vld [vmem:[%s9008_s1 + $0x78] sm:$0xff]   ;;  %v5302_v29 = vld [vmem:[%s7034_s25 + $0xc0] sm:$0xff]  ;;  %3376 = vrot.lane.b32.xlu1 %v8019_v39, %s6665_s30 }
 0x47a   : > { %3173 = vst.msk [vmem:[#allocation4 + $0x70] sm:$0xf] %vm407_vm2, %v8130_v63  ;;  %2693 = vst.msk [vmem:[#allocation4 + $0x84] sm:$0xf] %vm407_vm2, %v8126_v41  ;;  %3374 = vrot.lane.b32.xlu0 %v8021_v43, %s6665_s30  ;;  %v5820_v10 = vpack.c.bf16 %v5302_v29, %v5302_v29  ;;  %v6452_v53 = vld [vmem:[%s9008_s1 + $0x38] sm:$0xff]   ;;  %6117 = vmatprep.subr.bf16.mxu1 %v6451_v5  ;;  %v6453_v37 = vld [vmem:[%s9008_s1 + $0x70] sm:$0xff]  }
 0x47b   : > { %2692 = vst.msk [vmem:[#allocation4 + $0x78] sm:$0xf] %vm407_vm2, %v8128_v32  ;;  %3653 = vst.msk [vmem:[#allocation4 + $0x5c] sm:$0xf] %vm407_vm2, %v8142_v13  ;;  %v5535_v60 = vld [vmem:[%s7034_s25 + $0x159] sm:$0xff]  ;;  %v5534_v7 = vld [vmem:[%s7034_s25 + $0x151] sm:$0xff]  ;;  %6118 = vmatpush3.bf16.msra.mxu1 %v6452_v53 }
 0x47c   : > { %3172 = vst.msk [vmem:[#allocation4 + $0x64] sm:$0xf] %vm407_vm2, %v8140_v34  ;;  %3652 = vst.msk [vmem:[#allocation4 + $0x50] sm:$0xf] %vm407_vm2, %v8153_v46  ;;  %v8187_v31 = vpack.c.bf16 %v5535_v60, %v5535_v60  ;;  %v8191_v8 = vpack.c.bf16 %v5534_v7, %v5534_v7  ;;  %v5303_v25 = vld [vmem:[%s7034_s25 + $0xc8] sm:$0xff]  ;;  %v6454_v19 = vld [vmem:[%s9008_s1 + $0x30] sm:$0xff]   ;;  %6119 = vmatprep.subr.bf16.mxu1 %v6453_v37 }
 0x47d   : > { %2695 = vst.msk [vmem:[#allocation4 + $0x9c] sm:$0xf] %vm407_vm2, %v8155_v57  ;;  %2694 = vst.msk [vmem:[#allocation4 + $0x90] sm:$0xf] %vm407_vm2, %v8157_v4  ;;  %v5821_v49 = vpack.c.bf16 %v5303_v25, %v5303_v25  ;;  %3022 = vrot.lane.b32.xlu1 %v8023_v50, %s6666_s16  ;;  %v6455_v16 = vld [vmem:[%s9008_s1 + $0x68] sm:$0xff]   ;;  %v6457_v2 = vld [vmem:[%s9008_s1 + $0x60] sm:$0xff]  }
 0x47e   : > { %2682 = vst.msk [vmem:[#allocation4] sm:$0xf] %vm407_vm2, %v5820_v10  ;;  %3175 = vst.msk [vmem:[#allocation4 + $0x88] sm:$0xf] %vm407_vm2, %v8187_v31  ;;  %3020 = vrot.lane.b32.xlu0 %v8027_v30, %s6666_s16  ;;  %v6456_v33 = vld [vmem:[%s9008_s1 + $0x28] sm:$0xff]   ;;  %v6458_v9 = vld [vmem:[%s9008_s1 + $0x20] sm:$0xff]  }
 0x47f   : > { %3174 = vst.msk [vmem:[#allocation4 + $0x7c] sm:$0xf] %vm407_vm2, %v8191_v8  ;;  %2683 = vst.msk [vmem:[#allocation4 + $0xc] sm:$0xf] %vm407_vm2, %v5821_v49  ;;  %6120 = vmatpush3.bf16.msra.mxu1 %v6454_v19  ;;  %v5473_v52 = vld [vmem:[%s7034_s25 + $0x15a] sm:$0xff]  ;;  %v5472_v50 = vld [vmem:[%s7034_s25 + $0x152] sm:$0xff] }
 0x480   : > { %6121 = vmatprep.subr.bf16.mxu1 %v6455_v16  ;;  %v8217_v30 = vpack.c.bf16 %v5473_v52, %v5473_v52  ;;  %v8219_v36 = vpack.c.bf16 %v5472_v50, %v5472_v50  ;;  %v6472_v21 = vld [vmem:[#allocation4 + $0x8] ss:$12 sps:$4 sm:$0xff]   ;;  %v6459_v18 = vld [vmem:[%s9008_s1 + $0x58] sm:$0xff]   ;;  %v8293_v6 = vld [vmem:[%s9008_s1 + $0x80] sm:$0xff]  }
 0x481   : > { %3504 = vrot.lane.b32.xlu1 %v8029_v23, %s6666_s16  ;;  %6215 = vmatprep.mubr.msk.bf16.mxu0 %vm1719_vm3, %v6472_v21  ;;  %v5505_v15 = vld [vmem:[%s7034_s25 + $0x170] sm:$0xff]  ;;  %v5504_v11 = vld [vmem:[%s7034_s25 + $0x168] sm:$0xff] }
 0x482   : > { %3502 = vrot.lane.b32.xlu0 %v8036_v38, %s6666_s16  ;;  %3654 = vst.msk [vmem:[#allocation4 + $0x68] sm:$0xf] %vm407_vm2, %v8219_v36  ;;  %3655 = vst.msk [vmem:[#allocation4 + $0x74] sm:$0xf] %vm407_vm2, %v8217_v30  ;;  %v8245_v26 = vpack.c.bf16 %v5505_v15, %v5505_v15  ;;  %v8247_v3 = vpack.c.bf16 %v5504_v11, %v5504_v11  ;;  %v6460_v12 = vld [vmem:[%s9008_s1 + $0x18] sm:$0xff]   ;;  %v6462_v48 = vld [vmem:[%s9008_s1 + $0x10] sm:$0xff]  }
 0x483   : > { %6122 = vmatpush3.bf16.msra.mxu1 %v6456_v33  ;;  %v5537_v40 = vld [vmem:[%s7034_s25 + $0x171] sm:$0xff]  ;;  %v5536_v24 = vld [vmem:[%s7034_s25 + $0x169] sm:$0xff]  ;;  %v5538_v37 = vld [vmem:[%s7034_s25 + $0x181] sm:$0xff] }
 0x484   : > { %6123 = vmatprep.subr.bf16.mxu1 %v6457_v2  ;;  %2697 = vst.msk [vmem:[#allocation4 + $0xb4] sm:$0xf] %vm407_vm2, %v8245_v26  ;;  %2696 = vst.msk [vmem:[#allocation4 + $0xa8] sm:$0xf] %vm407_vm2, %v8247_v3  ;;  %v8273_v56 = vpack.c.bf16 %v5537_v40, %v5537_v40  ;;  %v8275_v20 = vpack.c.bf16 %v5536_v24, %v5536_v24  ;;  %v6463_v35 = vld [vmem:[%s9008_s1 + $0x48] sm:$0xff]   ;;  %v8316_v25 = vpack.c.bf16 %v5538_v37, %v5538_v37  ;;  %v6467_v19 = vld [vmem:[%s9008_s1] sm:$0xff]  }
 0x485   : > { %2768 = vrot.lane.b32.xlu1 %v8038_v42, %s6664_s29  ;;  %v6461_v42 = vld [vmem:[%s9008_s1 + $0x50] sm:$0xff]   ;;  %v6473_v49 = vld [vmem:[#allocation4 + $0x20] ss:$12 sps:$4 sm:$0xff]  }
 0x486   : > { %2766 = vrot.lane.b32.xlu0 %v8040_v51, %s6664_s29  ;;  %v8266_v51 = vld [vmem:[%s9008_s1 + $0x88] sm:$0xff]   ;;  %3177 = vst.msk [vmem:[#allocation4 + $0xa0] sm:$0xf] %vm407_vm2, %v8273_v56  ;;  %3176 = vst.msk [vmem:[#allocation4 + $0x94] sm:$0xf] %vm407_vm2, %v8275_v20 }
 0x487   : > { %6124 = vmatpush3.bf16.msra.mxu1 %v6458_v9  ;;  %6211 = vmatprep.subr.bf16.mxu0 %v8266_v51  ;;  %v5475_v5 = vld [vmem:[%s7034_s25 + $0x172] sm:$0xff]  ;;  %v5474_v29 = vld [vmem:[%s7034_s25 + $0x16a] sm:$0xff]  ;;  %3178 = vst.msk [vmem:[#allocation4 + $0xac] sm:$0xf] %vm407_vm2, %v8316_v25  ;;  %v5476_v33 = vld [vmem:[%s7034_s25 + $0x182] sm:$0xff] }
 0x488   : > { %6125 = vmatprep.subr.bf16.mxu1 %v6459_v18  ;;  %6212 = vmatpush3.bf16.msra.mxu0 %v8266_v51  ;;  %v8303_v10 = vpack.c.bf16 %v5475_v5, %v5475_v5  ;;  %v8305_v53 = vpack.c.bf16 %v5474_v29, %v5474_v29  ;;  %v5539_v60 = vld [vmem:[%s7034_s25 + $0x189] sm:$0xff]  ;;  %v8339_v50 = vpack.c.bf16 %v5476_v33, %v5476_v33 }
 0x489   : > { %3250 = vrot.lane.b32.xlu1 %v8053_v44, %s6664_s29  ;;  %6213 = vmatprep.subr.bf16.mxu0 %v8293_v6  ;;  %v8309_v7 = vpack.c.bf16 %v5539_v60, %v5539_v60  ;;  %v5477_v16 = vld [vmem:[%s7034_s25 + $0x18a] sm:$0xff]  ;;  %v5541_v60 = vld [vmem:[%s7034_s25 + $0x1a1] sm:$0xff] }
 0x48a   : > { %3248 = vrot.lane.b32.xlu0 %v8055_v27, %s6664_s29  ;;  %3656 = vst.msk [vmem:[#allocation4 + $0x80] sm:$0xf] %vm407_vm2, %v8305_v53  ;;  %3657 = vst.msk [vmem:[#allocation4 + $0x8c] sm:$0xf] %vm407_vm2, %v8303_v10  ;;  %v8337_v52 = vpack.c.bf16 %v5477_v16, %v5477_v16  ;;  %v5947_v16 = vpack.c.bf16 %v5541_v60, %v5541_v60 }
 0x48b   : > { %6126 = vmatpush3.bf16.msra.mxu1 %v6460_v12  ;;  %3179 = vst.msk [vmem:[#allocation4 + $0xb8] sm:$0xf] %vm407_vm2, %v8309_v7  ;;  %3658 = vst.msk [vmem:[#allocation4 + $0x98] sm:$0xf] %vm407_vm2, %v8339_v50 }
 0x48c   : > { %6127 = vmatprep.subr.bf16.mxu1 %v6461_v42  ;;  %6214 = vmatpush3.bf16.msra.mxu0 %v8293_v6  ;;  %3659 = vst.msk [vmem:[#allocation4 + $0xa4] sm:$0xf] %vm407_vm2, %v8337_v52 }
 0x48d   : > { %2896 = vrot.lane.b32.xlu1 %v8011_v62, %s6665_s30  ;;  %v6466_v62 = vld [vmem:[%s9008_s1 + $0x40] sm:$0xff]  }
 0x48e   : > { %2894 = vrot.lane.b32.xlu0 %v8002_v28, %s6665_s30  ;;  %v6464_v28 = vld [vmem:[%s9008_s1 + $0x8] sm:$0xff]  }
 0x48f   : > { %6128 = vmatpush3.bf16.msra.mxu1 %v6462_v48  ;;  %6216 = vmatmul.mubr.msk.bf16.vlgmr.msra.gmra.mxu0 %vm1719_vm3, %v6473_v49  ;;  %v5573_v49 = vld [vmem:[%s7034_s25 + $0x1a2] sm:$0xff] }
 0x490   : > { %6129 = vmatprep.subr.bf16.mxu1 %v6463_v35  ;;  %v5509_v35 = vld [vmem:[%s7034_s25 + $0x1a0] sm:$0xff] }
 0x491   : > { %3380 = vrot.lane.b32.xlu1 %v8057_v54, %s6665_s30  ;;  %v5931_v5 = vpack.c.bf16 %v5509_v35, %v5509_v35 }
 0x492   : > { %3378 = vrot.lane.b32.xlu0 %v8069_v58, %s6665_s30 }
 0x493   : > { %6130 = vmatpush3.bf16.msra.mxu1 %v6464_v28 }
 0x494   : > { %6131 = vmatprep.subr.bf16.mxu1 %v6466_v62 }
 0x495   : > { %3026 = vrot.lane.b32.xlu1 %v8019_v39, %s6666_s16  ;;  %v6478_v39 = vld [vmem:[#allocation4 + $0x38] ss:$12 sps:$4 sm:$0xff]  }
 0x496   : > { %3024 = vrot.lane.b32.xlu0 %v8021_v43, %s6666_s16  ;;  %v6479_v43 = vld [vmem:[#allocation4 + $0x50] ss:$12 sps:$4 sm:$0xff]   ;;  %6219 = vmatprep.mubr.msk.bf16.mxu0 %vm1719_vm3, %v6478_v39  ;;  %v4336_v39 = vld [vmem:[#allocation3 + $0x80] sm:$0xff] }
 0x497   : > { %6132 = vmatpush3.bf16.msra.mxu1 %v6467_v19  ;;  %6220 = vmatmul.mubr.msk.bf16.gmra.mxu0 %vm1719_vm3, %v6479_v43  ;;  %v5963_v19 = vpack.c.bf16 %v5573_v49, %v5573_v49  ;;  %v4337_v43 = vld [vmem:[#allocation3 + $0x88] sm:$0xff] }
 0x498   : > { %6231 = vmatprep.subr.bf16.mxu1 %v8266_v51 }
 0x499   : > { %3508 = vrot.lane.b32.xlu1 %v8071_v1, %s6666_s16  ;;  %3661 = vst.msk [vmem:[#allocation4 + $0xbc] sm:$0xf] %vm407_vm2, %v5963_v19 }
 0x49a   : > { %3506 = vrot.lane.b32.xlu0 %v8073_v14, %s6666_s16 }
 0x49d   : > { %2772 = vrot.lane.b32.xlu1 %v8029_v23, %s6664_s29  ;;  %v6484_v23 = vld [vmem:[#allocation4 + $0x68] ss:$12 sps:$4 sm:$0xff]  }
 0x49e   : > { %2770 = vrot.lane.b32.xlu0 %v8036_v38, %s6664_s29  ;;  %6223 = vmatprep.mubr.msk.bf16.mxu0 %vm1719_vm3, %v6484_v23 }
 0x4a1   : > { %3254 = vrot.lane.b32.xlu1 %v8083_v59, %s6664_s29 }
 0x4a2   : > { %3252 = vrot.lane.b32.xlu0 %v8085_v17, %s6664_s29 }
 0x4a5   : > { %2900 = vrot.lane.b32.xlu1 %v8053_v44, %s6665_s30 }
 0x4a6   : > { %2898 = vrot.lane.b32.xlu0 %v8055_v27, %s6665_s30  ;;  %v6485_v27 = vld [vmem:[#allocation4 + $0x80] ss:$12 sps:$4 sm:$0xff]  }
 0x4a7   : > { %6224 = vmatmul.mubr.msk.bf16.gmra.mxu0 %vm1719_vm3, %v6485_v27 }
 0x4a9   : > { %3384 = vrot.lane.b32.xlu1 %v8096_v61, %s6665_s30 }
 0x4aa   : > { %3382 = vrot.lane.b32.xlu0 %v8098_v45, %s6665_s30 }
 0x4ad   : > { %3030 = vrot.lane.b32.xlu1 %v8057_v54, %s6666_s16 }
 0x4ae   : > { %3028 = vrot.lane.b32.xlu0 %v8069_v58, %s6666_s16 }
 0x4b1   : > { %3512 = vrot.lane.b32.xlu1 %v8100_v55, %s6666_s16 }
 0x4b2   : > { %3510 = vrot.lane.b32.xlu0 %v8111_v47, %s6666_s16 }
 0x4b5   : > { %2776 = vrot.lane.b32.xlu1 %v8071_v1, %s6664_s29 }
 0x4b6   : > { %2774 = vrot.lane.b32.xlu0 %v8073_v14, %s6664_s29 }
 0x4b9   : > { %3258 = vrot.lane.b32.xlu1 %v8113_v0, %s6664_s29 }
 0x4ba   : > { %3256 = vrot.lane.b32.xlu0 %v8115_v22, %s6664_s29 }
 0x4bd   : > { %2904 = vrot.lane.b32.xlu1 %v8083_v59, %s6665_s30 }
 0x4be   : > { %2902 = vrot.lane.b32.xlu0 %v8085_v17, %s6665_s30 }
 0x4c1   : > { %3388 = vrot.lane.b32.xlu1 %v8126_v41, %s6665_s30 }
 0x4c2   : > { %3386 = vrot.lane.b32.xlu0 %v8128_v32, %s6665_s30 }
 0x4c5   : > { %3034 = vrot.lane.b32.xlu1 %v8096_v61, %s6666_s16 }
 0x4c6   : > { %3032 = vrot.lane.b32.xlu0 %v8098_v45, %s6666_s16 }
 0x4c9   : > { %3516 = vrot.lane.b32.xlu1 %v8130_v63, %s6666_s16 }
 0x4ca   : > { %3514 = vrot.lane.b32.xlu0 %v8140_v34, %s6666_s16 }
 0x4cd   : > { %2780 = vrot.lane.b32.xlu1 %v8100_v55, %s6664_s29 }
 0x4ce   : > { %2778 = vrot.lane.b32.xlu0 %v8111_v47, %s6664_s29 }
 0x4d1   : > { %3262 = vrot.lane.b32.xlu1 %v8142_v13, %s6664_s29 }
 0x4d2   : > { %3260 = vrot.lane.b32.xlu0 %v8153_v46, %s6664_s29 }
 0x4d5   : > { %2908 = vrot.lane.b32.xlu1 %v8113_v0, %s6665_s30 }
 0x4d6   : > { %2906 = vrot.lane.b32.xlu0 %v8115_v22, %s6665_s30 }
 0x4d9   : > { %3392 = vrot.lane.b32.xlu1 %v8155_v57, %s6665_s30 }
 0x4da   : > { %3390 = vrot.lane.b32.xlu0 %v8157_v4, %s6665_s30 }
 0x4dd   : > { %3038 = vrot.lane.b32.xlu1 %v8126_v41, %s6666_s16 }
 0x4de   : > { %3036 = vrot.lane.b32.xlu0 %v8128_v32, %s6666_s16 }
 0x4df   : > { %v3245_v38 = vpop.permute.xlu1 %3244 }
 0x4e0   : > { %v2763_v44 = vpop.permute.xlu0 %2762  ;;  %3292 = vst.msk [vmem:[#allocation4 + $0x4] sm:$0xf] %vm536_vm4, %v3245_v38 }
 0x4e1   : > { %2810 = vst.msk [vmem:[#allocation4] sm:$0xf] %vm536_vm4, %v2763_v44  ;;  %3520 = vrot.lane.b32.xlu1 %v8187_v31, %s6666_s16 }
 0x4e2   : > { %3518 = vrot.lane.b32.xlu0 %v8191_v8, %s6666_s16 }
 0x4e3   : > { %v3247_v54 = vpop.permute.xlu1 %3246 }
 0x4e4   : > { %v2765_v58 = vpop.permute.xlu0 %2764  ;;  %3293 = vst.msk [vmem:[#allocation4 + $0x10] sm:$0xf] %vm536_vm4, %v3247_v54 }
 0x4e5   : > { %2811 = vst.msk [vmem:[#allocation4 + $0xc] sm:$0xf] %vm536_vm4, %v2765_v58  ;;  %2784 = vrot.lane.b32.xlu1 %v8130_v63, %s6664_s29 }
 0x4e6   : > { %2782 = vrot.lane.b32.xlu0 %v8140_v34, %s6664_s29 }
 0x4e7   : > { %v2893_v1 = vpop.permute.xlu1 %2892 }
 0x4e8   : > { %v2891_v14 = vpop.permute.xlu0 %2890  ;;  %2939 = vst.msk [vmem:[#allocation4 + $0xc] sm:$0xf] %vm665_vm5, %v2893_v1 }
 0x4e9   : > { %2938 = vst.msk [vmem:[#allocation4] sm:$0xf] %vm665_vm5, %v2891_v14  ;;  %3266 = vrot.lane.b32.xlu1 %v8217_v30, %s6664_s29 }
 0x4ea   : > { %3264 = vrot.lane.b32.xlu0 %v8219_v36, %s6664_s29 }
 0x4eb   : > { %v3377_v59 = vpop.permute.xlu1 %3376 }
 0x4ec   : > { %v3375_v17 = vpop.permute.xlu0 %3374  ;;  %3423 = vst.msk [vmem:[#allocation4 + $0x10] sm:$0xf] %vm665_vm5, %v3377_v59 }
 0x4ed   : > { %3422 = vst.msk [vmem:[#allocation4 + $0x4] sm:$0xf] %vm665_vm5, %v3375_v17  ;;  %2912 = vrot.lane.b32.xlu1 %v8142_v13, %s6665_s30 }
 0x4ee   : > { %2910 = vrot.lane.b32.xlu0 %v8153_v46, %s6665_s30 }
 0x4ef   : > { %v3023_v61 = vpop.permute.xlu1 %3022 }
 0x4f0   : > { %v3021_v45 = vpop.permute.xlu0 %3020  ;;  %3069 = vst.msk [vmem:[#allocation4 + $0xc] sm:$0xf] %vm796_vm6, %v3023_v61 }
 0x4f1   : > { %3068 = vst.msk [vmem:[#allocation4] sm:$0xf] %vm796_vm6, %v3021_v45  ;;  %3396 = vrot.lane.b32.xlu1 %v8245_v26, %s6665_s30 }
 0x4f2   : > { %3394 = vrot.lane.b32.xlu0 %v8247_v3, %s6665_s30 }
 0x4f3   : > { %v3505_v55 = vpop.permute.xlu1 %3504 }
 0x4f4   : > { %v3503_v47 = vpop.permute.xlu0 %3502  ;;  %3551 = vst.msk [vmem:[#allocation4 + $0x10] sm:$0xf] %vm796_vm6, %v3505_v55 }
 0x4f5   : > { %3550 = vst.msk [vmem:[#allocation4 + $0x4] sm:$0xf] %vm796_vm6, %v3503_v47  ;;  %3042 = vrot.lane.b32.xlu1 %v8155_v57, %s6666_s16  ;;  %v5507_v57 = vld [vmem:[%s7034_s25 + $0x188] sm:$0xff] }
 0x4f6   : > { %3040 = vrot.lane.b32.xlu0 %v8157_v4, %s6666_s16  ;;  %v5506_v4 = vld [vmem:[%s7034_s25 + $0x180] sm:$0xff]  ;;  %v8487_v2 = vpack.c.bf16 %v5507_v57, %v5507_v57 }
 0x4f7   : > { %v2769_v0 = vpop.permute.xlu1 %2768  ;;  %v8489_v21 = vpack.c.bf16 %v5506_v4, %v5506_v4 }
 0x4f8   : > { %v2767_v22 = vpop.permute.xlu0 %2766  ;;  %2813 = vst.msk [vmem:[#allocation4 + $0x24] sm:$0xf] %vm536_vm4, %v2769_v0  ;;  %v6469_v63 = vld [vmem:[#allocation4] ss:$12 sps:$4 sm:$0xff]  }
 0x4f9   : > { %2812 = vst.msk [vmem:[#allocation4 + $0x18] sm:$0xf] %vm536_vm4, %v2767_v22  ;;  %3524 = vrot.lane.b32.xlu1 %v8273_v56, %s6666_s16 }
 0x4fa   : > { %3522 = vrot.lane.b32.xlu0 %v8275_v20, %s6666_s16 }
 0x4fb   : > { %v3251_v41 = vpop.permute.xlu1 %3250 }
 0x4fc   : > { %v3249_v32 = vpop.permute.xlu0 %3248  ;;  %3295 = vst.msk [vmem:[#allocation4 + $0x28] sm:$0xf] %vm536_vm4, %v3251_v41  ;;  %v6471_v34 = vld [vmem:[#allocation4 + $0x4] ss:$12 sps:$4 sm:$0xff]  }
 0x4fd   : > { %3294 = vst.msk [vmem:[#allocation4 + $0x1c] sm:$0xf] %vm536_vm4, %v3249_v32  ;;  %2788 = vrot.lane.b32.xlu1 %v8187_v31, %s6664_s29  ;;  %4046 = vmatprep.mubr.bf16.mxu1 %v6471_v34 }
 0x4fe   : > { %2786 = vrot.lane.b32.xlu0 %v8191_v8, %s6664_s29  ;;  %4047 = vmatmul.mubr.bf16.vlgmr.msra.gmra.mxu1 %v6469_v63 }
 0x4ff   : > { %v2897_v13 = vpop.permute.xlu1 %2896  ;;  %6233 = vmatpush3.bf16.msra.mxu1 %v8266_v51 }
 0x500   : > { %v2895_v46 = vpop.permute.xlu0 %2894  ;;  %2941 = vst.msk [vmem:[#allocation4 + $0x24] sm:$0xf] %vm665_vm5, %v2897_v13  ;;  %6232 = vmatprep.subr.bf16.mxu1 %v8293_v6 }
 0x501   : > { %2940 = vst.msk [vmem:[#allocation4 + $0x18] sm:$0xf] %vm665_vm5, %v2895_v46  ;;  %3270 = vrot.lane.b32.xlu1 %v8303_v10, %s6664_s29 }
 0x502   : > { %3268 = vrot.lane.b32.xlu0 %v8305_v53, %s6664_s29 }
 0x503   : > { %v3381_v31 = vpop.permute.xlu1 %3380  ;;  %6234 = vmatpush3.bf16.msra.mxu1 %v8293_v6 }
 0x504   : > { %v3379_v8 = vpop.permute.xlu0 %3378  ;;  %3425 = vst.msk [vmem:[#allocation4 + $0x28] sm:$0xf] %vm665_vm5, %v3381_v31 }
 0x505   : > { %3424 = vst.msk [vmem:[#allocation4 + $0x1c] sm:$0xf] %vm665_vm5, %v3379_v8  ;;  %2916 = vrot.lane.b32.xlu1 %v8217_v30, %s6665_s30 }
 0x506   : > { %2914 = vrot.lane.b32.xlu0 %v8219_v36, %s6665_s30 }
 0x507   : > { %v3027_v9 = vpop.permute.xlu1 %3026 }
 0x508   : > { %v3025_v18 = vpop.permute.xlu0 %3024  ;;  %3071 = vst.msk [vmem:[#allocation4 + $0x24] sm:$0xf] %vm796_vm6, %v3027_v9 }
 0x509   : > { %3070 = vst.msk [vmem:[#allocation4 + $0x18] sm:$0xf] %vm796_vm6, %v3025_v18  ;;  %3400 = vrot.lane.b32.xlu1 %v8487_v2, %s6665_s30 }
 0x50a   : > { %3398 = vrot.lane.b32.xlu0 %v8489_v21, %s6665_s30 }
 0x50b   : > { %v3509_v30 = vpop.permute.xlu1 %3508 }
 0x50c   : > { %v3507_v15 = vpop.permute.xlu0 %3506  ;;  %3553 = vst.msk [vmem:[#allocation4 + $0x28] sm:$0xf] %vm796_vm6, %v3509_v30 }
 0x50d   : > { %3552 = vst.msk [vmem:[#allocation4 + $0x1c] sm:$0xf] %vm796_vm6, %v3507_v15  ;;  %3046 = vrot.lane.b32.xlu1 %v8245_v26, %s6666_s16 }
 0x50e   : > { %3044 = vrot.lane.b32.xlu0 %v8247_v3, %s6666_s16 }
 0x50f   : > { %v2773_v36 = vpop.permute.xlu1 %2772 }
 0x510   : > { %v2771_v11 = vpop.permute.xlu0 %2770  ;;  %2815 = vst.msk [vmem:[#allocation4 + $0x3c] sm:$0xf] %vm536_vm4, %v2773_v36 }
 0x511   : > { %2814 = vst.msk [vmem:[#allocation4 + $0x30] sm:$0xf] %vm536_vm4, %v2771_v11  ;;  %3528 = vrot.lane.b32.xlu1 %v8309_v7, %s6666_s16  ;;  %v5540_v7 = vld [vmem:[%s7034_s25 + $0x199] sm:$0xff] }
 0x512   : > { %3526 = vrot.lane.b32.xlu0 %v8316_v25, %s6666_s16  ;;  %v5946_v33 = vpack.c.bf16 %v5540_v7, %v5540_v7 }
 0x513   : > { %v3255_v12 = vpop.permute.xlu1 %3254  ;;  %v3700_v26 = vld [vmem:[#allocation4 + $0x24] sm:$0xff] }
 0x514   : > { %v3253_v42 = vpop.permute.xlu0 %3252  ;;  %v3698_v51 = vld [vmem:[#allocation4 + $0x18] sm:$0xff]  ;;  %3297 = vst.msk [vmem:[#allocation4 + $0x40] sm:$0xf] %vm536_vm4, %v3255_v12 }
 0x515   : > { %v6474_v40 = vld [vmem:[#allocation4 + $0x1c] ss:$12 sps:$4 sm:$0xff]   ;;  %3296 = vst.msk [vmem:[#allocation4 + $0x34] sm:$0xf] %vm536_vm4, %v3253_v42  ;;  %v5593_v3 = vcombine.low %v3698_v51, %v3700_v26  ;;  %2792 = vrot.lane.b32.xlu1 %v8273_v56, %s6664_s29 }
 0x516   : > { %2790 = vrot.lane.b32.xlu0 %v8275_v20, %s6664_s29  ;;  %4054 = vmatprep.mubr.bf16.mxu1 %v6474_v40  ;;  %v5508_v56 = vld [vmem:[%s7034_s25 + $0x198] sm:$0xff] }
 0x517   : > { %v2901_v24 = vpop.permute.xlu1 %2900  ;;  %4055 = vmatmul.mubr.bf16.gmra.mxu1 %v5593_v3  ;;  %v5930_v29 = vpack.c.bf16 %v5508_v56, %v5508_v56 }
 0x518   : > { %v2899_v48 = vpop.permute.xlu0 %2898  ;;  %2943 = vst.msk [vmem:[#allocation4 + $0x3c] sm:$0xf] %vm665_vm5, %v2901_v24 }
 0x519   : > { %2942 = vst.msk [vmem:[#allocation4 + $0x30] sm:$0xf] %vm665_vm5, %v2899_v48  ;;  %3274 = vrot.lane.b32.xlu1 %v8337_v52, %s6664_s29 }
 0x51a   : > { %3272 = vrot.lane.b32.xlu0 %v8339_v50, %s6664_s29 }
 0x51b   : > { %v3385_v6 = vpop.permute.xlu1 %3384 }
 0x51c   : > { %v3383_v20 = vpop.permute.xlu0 %3382  ;;  %3427 = vst.msk [vmem:[#allocation4 + $0x40] sm:$0xf] %vm665_vm5, %v3385_v6 }
 0x51d   : > { %3426 = vst.msk [vmem:[#allocation4 + $0x34] sm:$0xf] %vm665_vm5, %v3383_v20  ;;  %2920 = vrot.lane.b32.xlu1 %v8303_v10, %s6665_s30  ;;  %v5572_v10 = vld [vmem:[%s7034_s25 + $0x19a] sm:$0xff] }
 0x51e   : > { %2918 = vrot.lane.b32.xlu0 %v8305_v53, %s6665_s30  ;;  %v5962_v53 = vpack.c.bf16 %v5572_v10, %v5572_v10 }
 0x51f   : > { %v3031_v28 = vpop.permute.xlu1 %3030 }
 0x520   : > { %v3029_v62 = vpop.permute.xlu0 %3028  ;;  %3073 = vst.msk [vmem:[#allocation4 + $0x3c] sm:$0xf] %vm796_vm6, %v3031_v28 }
 0x521   : > { %3072 = vst.msk [vmem:[#allocation4 + $0x30] sm:$0xf] %vm796_vm6, %v3029_v62  ;;  %3404 = vrot.lane.b32.xlu1 %v5931_v5, %s6665_s30 }
 0x522   : > { %3402 = vrot.lane.b32.xlu0 %v5930_v29, %s6665_s30  ;;  %3660 = vst.msk [vmem:[#allocation4 + $0xb0] sm:$0xf] %vm407_vm2, %v5962_v53 }
 0x523   : > { %v3513_v37 = vpop.permute.xlu1 %3512 }
 0x524   : > { %v3511_v25 = vpop.permute.xlu0 %3510  ;;  %3555 = vst.msk [vmem:[#allocation4 + $0x40] sm:$0xf] %vm796_vm6, %v3513_v37 }
 0x525   : > { %3554 = vst.msk [vmem:[#allocation4 + $0x34] sm:$0xf] %vm796_vm6, %v3511_v25  ;;  %3050 = vrot.lane.b32.xlu1 %v8487_v2, %s6666_s16 }
 0x526   : > { %3048 = vrot.lane.b32.xlu0 %v8489_v21, %s6666_s16 }
 0x527   : > { %v2777_v52 = vpop.permute.xlu1 %2776 }
 0x528   : > { %v2775_v50 = vpop.permute.xlu0 %2774  ;;  %2817 = vst.msk [vmem:[#allocation4 + $0x54] sm:$0xf] %vm536_vm4, %v2777_v52 }
 0x529   : > { %2816 = vst.msk [vmem:[#allocation4 + $0x48] sm:$0xf] %vm536_vm4, %v2775_v50  ;;  %3532 = vrot.lane.b32.xlu1 %v5947_v16, %s6666_s16 }
 0x52a   : > { %3530 = vrot.lane.b32.xlu0 %v5946_v33, %s6666_s16 }
 0x52b   : > { %v3259_v23 = vpop.permute.xlu1 %3258  ;;  %v3704_v27 = vld [vmem:[#allocation4 + $0x3c] sm:$0xff] }
 0x52c   : > { %v3257_v38 = vpop.permute.xlu0 %3256  ;;  %v3702_v44 = vld [vmem:[#allocation4 + $0x30] sm:$0xff]  ;;  %3299 = vst.msk [vmem:[#allocation4 + $0x58] sm:$0xf] %vm536_vm4, %v3259_v23 }
 0x52d   : > { %v6476_v54 = vld [vmem:[#allocation4 + $0x34] ss:$12 sps:$4 sm:$0xff]   ;;  %3298 = vst.msk [vmem:[#allocation4 + $0x4c] sm:$0xf] %vm536_vm4, %v3257_v38  ;;  %v5596_v58 = vcombine.low %v3702_v44, %v3704_v27  ;;  %4370 = vrot.lane.b32.xlu1 %v4337_v43, %s6664_s29 }
 0x52e   : > { %4062 = vmatprep.mubr.bf16.mxu1 %v6476_v54  ;;  %4368 = vrot.lane.b32.xlu0 %v4336_v39, %s6664_s29 }
 0x52f   : > { %4063 = vmatmul.mubr.bf16.gmra.mxu1 %v5596_v58  ;;  %v2905_v1 = vpop.permute.xlu1 %2904 }
 0x530   : > { %v2903_v14 = vpop.permute.xlu0 %2902  ;;  %2945 = vst.msk [vmem:[#allocation4 + $0x54] sm:$0xf] %vm665_vm5, %v2905_v1 }
 0x531   : > { %2944 = vst.msk [vmem:[#allocation4 + $0x48] sm:$0xf] %vm665_vm5, %v2903_v14 }
 0x533   : > { %v3389_v59 = vpop.permute.xlu1 %3388 }
 0x534   : > { %v3387_v17 = vpop.permute.xlu0 %3386  ;;  %3429 = vst.msk [vmem:[#allocation4 + $0x58] sm:$0xf] %vm665_vm5, %v3389_v59 }
 0x535   : > { %3428 = vst.msk [vmem:[#allocation4 + $0x4c] sm:$0xf] %vm665_vm5, %v3387_v17 }
 0x537   : > { %v3035_v61 = vpop.permute.xlu1 %3034 }
 0x538   : > { %v3033_v45 = vpop.permute.xlu0 %3032  ;;  %3075 = vst.msk [vmem:[#allocation4 + $0x54] sm:$0xf] %vm796_vm6, %v3035_v61 }
 0x539   : > { %3074 = vst.msk [vmem:[#allocation4 + $0x48] sm:$0xf] %vm796_vm6, %v3033_v45 }
 0x53b   : > { %v3517_v55 = vpop.permute.xlu1 %3516 }
 0x53c   : > { %v3515_v47 = vpop.permute.xlu0 %3514  ;;  %3557 = vst.msk [vmem:[#allocation4 + $0x58] sm:$0xf] %vm796_vm6, %v3517_v55 }
 0x53d   : > { %3556 = vst.msk [vmem:[#allocation4 + $0x4c] sm:$0xf] %vm796_vm6, %v3515_v47 }
 0x53f   : > { %v2781_v0 = vpop.permute.xlu1 %2780 }
 0x540   : > { %v2779_v22 = vpop.permute.xlu0 %2778  ;;  %2819 = vst.msk [vmem:[#allocation4 + $0x6c] sm:$0xf] %vm536_vm4, %v2781_v0  ;;  %v6493_v0 = vld [vmem:[#allocation4 + $0x98] ss:$12 sps:$4 sm:$0xff]  }
 0x541   : > { %2818 = vst.msk [vmem:[#allocation4 + $0x60] sm:$0xf] %vm536_vm4, %v2779_v22 }
 0x543   : > { %v3263_v41 = vpop.permute.xlu1 %3262  ;;  %v3708_v34 = vld [vmem:[#allocation4 + $0x54] sm:$0xff] }
 0x544   : > { %v3261_v32 = vpop.permute.xlu0 %3260  ;;  %v3706_v63 = vld [vmem:[#allocation4 + $0x48] sm:$0xff]  ;;  %3301 = vst.msk [vmem:[#allocation4 + $0x70] sm:$0xf] %vm536_vm4, %v3263_v41 }
 0x545   : > { %v6480_v13 = vld [vmem:[#allocation4 + $0x4c] ss:$12 sps:$4 sm:$0xff]   ;;  %3300 = vst.msk [vmem:[#allocation4 + $0x64] sm:$0xf] %vm536_vm4, %v3261_v32  ;;  %v5599_v46 = vcombine.low %v3706_v63, %v3708_v34  ;;  %v6494_v32 = vld [vmem:[#allocation4 + $0xb0] ss:$12 sps:$4 sm:$0xff]  }
 0x546   : > { %4070 = vmatprep.mubr.bf16.mxu1 %v6480_v13 }
 0x547   : > { %4071 = vmatmul.mubr.bf16.gmra.mxu1 %v5599_v46  ;;  %v2909_v57 = vpop.permute.xlu1 %2908  ;;  %v6035_v46 = vld [vmem:[%s6724_s26 + $0x40] sm:$0xff]  }
 0x548   : > { %v2907_v4 = vpop.permute.xlu0 %2906  ;;  %2947 = vst.msk [vmem:[#allocation4 + $0x6c] sm:$0xf] %vm665_vm5, %v2909_v57 }
 0x549   : > { %2946 = vst.msk [vmem:[#allocation4 + $0x60] sm:$0xf] %vm665_vm5, %v2907_v4 }
 0x54b   : > { %v3393_v31 = vpop.permute.xlu1 %3392 }
 0x54c   : > { %v3391_v8 = vpop.permute.xlu0 %3390  ;;  %3431 = vst.msk [vmem:[#allocation4 + $0x70] sm:$0xf] %vm665_vm5, %v3393_v31 }
 0x54d   : > { %3430 = vst.msk [vmem:[#allocation4 + $0x64] sm:$0xf] %vm665_vm5, %v3391_v8  ;;  %v5998_v8 = vunpack.c.l.bf16 %v6035_v46 }
 0x54f   : > { %v3039_v2 = vpop.permute.xlu1 %3038  ;;  %v6217_v63 = vpop.f32.mrf.mxu0 }
 0x550   : > { %v3037_v21 = vpop.permute.xlu0 %3036  ;;  %3077 = vst.msk [vmem:[#allocation4 + $0x6c] sm:$0xf] %vm796_vm6, %v3039_v2 }
 0x551   : > { %3076 = vst.msk [vmem:[#allocation4 + $0x60] sm:$0xf] %vm796_vm6, %v3037_v21  ;;  %v4145_v34 = vpop.f32.mrf.mxu0 }
 0x553   : > { %v3521_v9 = vpop.permute.xlu1 %3520  ;;  %v6218_v4 = vpop.f32.mrf.mxu0 }
 0x554   : > { %v3519_v18 = vpop.permute.xlu0 %3518  ;;  %3559 = vst.msk [vmem:[#allocation4 + $0x70] sm:$0xf] %vm796_vm6, %v3521_v9 }
 0x555   : > { %3558 = vst.msk [vmem:[#allocation4 + $0x64] sm:$0xf] %vm796_vm6, %v3519_v18  ;;  %v4148_v18 = vpop.f32.mrf.mxu0 }
 0x557   : > { %v2785_v30 = vpop.permute.xlu1 %2784 }
 0x558   : > { %v2783_v15 = vpop.permute.xlu0 %2782  ;;  %2821 = vst.msk [vmem:[#allocation4 + $0x84] sm:$0xf] %vm536_vm4, %v2785_v30 }
 0x559   : > { %2820 = vst.msk [vmem:[#allocation4 + $0x78] sm:$0xf] %vm536_vm4, %v2783_v15 }
 0x55b   : > { %v3267_v36 = vpop.permute.xlu1 %3266  ;;  %v3712_v42 = vld [vmem:[#allocation4 + $0x6c] sm:$0xff] }
 0x55c   : > { %v3265_v11 = vpop.permute.xlu0 %3264  ;;  %v3710_v12 = vld [vmem:[#allocation4 + $0x60] sm:$0xff]  ;;  %3303 = vst.msk [vmem:[#allocation4 + $0x88] sm:$0xf] %vm536_vm4, %v3267_v36  ;;  %v5999_v36 = vunpack.c.h.bf16 %v6035_v46 }
 0x55d   : > { %v6482_v51 = vld [vmem:[#allocation4 + $0x64] ss:$12 sps:$4 sm:$0xff]   ;;  %3302 = vst.msk [vmem:[#allocation4 + $0x7c] sm:$0xf] %vm536_vm4, %v3265_v11  ;;  %v5602_v26 = vcombine.low %v3710_v12, %v3712_v42 }
 0x55e   : > { %4078 = vmatprep.mubr.bf16.mxu1 %v6482_v51 }
 0x55f   : > { %4079 = vmatmul.mubr.bf16.gmra.mxu1 %v5602_v26  ;;  %v2913_v40 = vpop.permute.xlu1 %2912  ;;  %v6036_v26 = vld [vmem:[%s6724_s26 + $0x48] sm:$0xff]  }
 0x560   : > { %v2911_v3 = vpop.permute.xlu0 %2910  ;;  %2949 = vst.msk [vmem:[#allocation4 + $0x84] sm:$0xf] %vm665_vm5, %v2913_v40 }
 0x561   : > { %2948 = vst.msk [vmem:[#allocation4 + $0x78] sm:$0xf] %vm665_vm5, %v2911_v3 }
 0x563   : > { %v3397_v24 = vpop.permute.xlu1 %3396 }
 0x564   : > { %v3395_v48 = vpop.permute.xlu0 %3394  ;;  %3433 = vst.msk [vmem:[#allocation4 + $0x88] sm:$0xf] %vm665_vm5, %v3397_v24  ;;  %v6002_v24 = vunpack.c.l.bf16 %v6036_v26 }
 0x565   : > { %3432 = vst.msk [vmem:[#allocation4 + $0x7c] sm:$0xf] %vm665_vm5, %v3395_v48 }
 0x567   : > { %v3043_v35 = vpop.permute.xlu1 %3042 }
 0x568   : > { %v3041_v56 = vpop.permute.xlu0 %3040  ;;  %3079 = vst.msk [vmem:[#allocation4 + $0x84] sm:$0xf] %vm796_vm6, %v3043_v35 }
 0x569   : > { %3078 = vst.msk [vmem:[#allocation4 + $0x78] sm:$0xf] %vm796_vm6, %v3041_v56 }
 0x56b   : > { %v3525_v6 = vpop.permute.xlu1 %3524 }
 0x56c   : > { %v3523_v20 = vpop.permute.xlu0 %3522  ;;  %3561 = vst.msk [vmem:[#allocation4 + $0x88] sm:$0xf] %vm796_vm6, %v3525_v6 }
 0x56d   : > { %3560 = vst.msk [vmem:[#allocation4 + $0x7c] sm:$0xf] %vm796_vm6, %v3523_v20 }
 0x56f   : > { %v2789_v5 = vpop.permute.xlu1 %2788 }
 0x570   : > { %v2787_v29 = vpop.permute.xlu0 %2786  ;;  %2823 = vst.msk [vmem:[#allocation4 + $0x9c] sm:$0xf] %vm536_vm4, %v2789_v5  ;;  %v6003_v5 = vunpack.c.h.bf16 %v6036_v26 }
 0x571   : > { %2822 = vst.msk [vmem:[#allocation4 + $0x90] sm:$0xf] %vm536_vm4, %v2787_v29 }
 0x573   : > { %v3271_v28 = vpop.permute.xlu1 %3270  ;;  %v3716_v7 = vld [vmem:[#allocation4 + $0x84] sm:$0xff] }
 0x574   : > { %v3269_v62 = vpop.permute.xlu0 %3268  ;;  %v3714_v60 = vld [vmem:[#allocation4 + $0x78] sm:$0xff]  ;;  %3305 = vst.msk [vmem:[#allocation4 + $0xa0] sm:$0xf] %vm536_vm4, %v3271_v28 }
 0x575   : > { %v6486_v37 = vld [vmem:[#allocation4 + $0x7c] ss:$12 sps:$4 sm:$0xff]   ;;  %3304 = vst.msk [vmem:[#allocation4 + $0x94] sm:$0xf] %vm536_vm4, %v3269_v62  ;;  %v5605_v25 = vcombine.low %v3714_v60, %v3716_v7  ;;  %v6221_v60 = vpop.f32.mrf.mxu0 }
 0x576   : > { %4086 = vmatprep.mubr.bf16.mxu1 %v6486_v37 }
 0x577   : > { %4087 = vmatmul.mubr.bf16.gmra.mxu1 %v5605_v25  ;;  %v2917_v10 = vpop.permute.xlu1 %2916  ;;  %v4161_v7 = vpop.f32.mrf.mxu0 }
 0x578   : > { %v2915_v49 = vpop.permute.xlu0 %2914  ;;  %2951 = vst.msk [vmem:[#allocation4 + $0x9c] sm:$0xf] %vm665_vm5, %v2917_v10  ;;  %v6037_v10 = vld [vmem:[%s6724_s26 + $0x50] sm:$0xff]  }
 0x579   : > { %2950 = vst.msk [vmem:[#allocation4 + $0x90] sm:$0xf] %vm665_vm5, %v2915_v49 }
 0x57b   : > { %v3401_v53 = vpop.permute.xlu1 %3400 }
 0x57c   : > { %v3399_v19 = vpop.permute.xlu0 %3398  ;;  %3435 = vst.msk [vmem:[#allocation4 + $0xa0] sm:$0xf] %vm665_vm5, %v3401_v53  ;;  %v6222_v53 = vpop.f32.mrf.mxu0 }
 0x57d   : > { %3434 = vst.msk [vmem:[#allocation4 + $0x94] sm:$0xf] %vm665_vm5, %v3399_v19 }
 0x57f   : > { %v3047_v16 = vpop.permute.xlu1 %3046 }
 0x580   : > { %v3045_v33 = vpop.permute.xlu0 %3044  ;;  %3081 = vst.msk [vmem:[#allocation4 + $0x9c] sm:$0xf] %vm796_vm6, %v3047_v16 }
 0x581   : > { %3080 = vst.msk [vmem:[#allocation4 + $0x90] sm:$0xf] %vm796_vm6, %v3045_v33  ;;  %v6006_v33 = vunpack.c.l.bf16 %v6037_v10 }
 0x583   : > { %v3529_v52 = vpop.permute.xlu1 %3528 }
 0x584   : > { %v3527_v50 = vpop.permute.xlu0 %3526  ;;  %3563 = vst.msk [vmem:[#allocation4 + $0xa0] sm:$0xf] %vm796_vm6, %v3529_v52 }
 0x585   : > { %3562 = vst.msk [vmem:[#allocation4 + $0x94] sm:$0xf] %vm796_vm6, %v3527_v50 }
 0x587   : > { %v2793_v39 = vpop.permute.xlu1 %2792 }
 0x588   : > { %v2791_v43 = vpop.permute.xlu0 %2790  ;;  %2825 = vst.msk [vmem:[#allocation4 + $0xb4] sm:$0xf] %vm536_vm4, %v2793_v39 }
 0x589   : > { %2824 = vst.msk [vmem:[#allocation4 + $0xa8] sm:$0xf] %vm536_vm4, %v2791_v43  ;;  %v4164_v43 = vpop.f32.mrf.mxu0 }
 0x58b   : > { %v3275_v23 = vpop.permute.xlu1 %3274  ;;  %v3720_v27 = vld [vmem:[#allocation4 + $0x9c] sm:$0xff] }
 0x58c   : > { %v3273_v38 = vpop.permute.xlu0 %3272  ;;  %v3718_v44 = vld [vmem:[#allocation4 + $0x90] sm:$0xff]  ;;  %3307 = vst.msk [vmem:[#allocation4 + $0xb8] sm:$0xf] %vm536_vm4, %v3275_v23 }
 0x58d   : > { %v6488_v54 = vld [vmem:[#allocation4 + $0x94] ss:$12 sps:$4 sm:$0xff]   ;;  %3306 = vst.msk [vmem:[#allocation4 + $0xac] sm:$0xf] %vm536_vm4, %v3273_v38  ;;  %v5608_v58 = vcombine.low %v3718_v44, %v3720_v27  ;;  %v6007_v44 = vunpack.c.h.bf16 %v6037_v10 }
 0x58e   : > { %4094 = vmatprep.mubr.bf16.mxu1 %v6488_v54 }
 0x58f   : > { %4095 = vmatmul.mubr.bf16.gmra.mxu1 %v5608_v58  ;;  %v2921_v1 = vpop.permute.xlu1 %2920 }
 0x590   : > { %v2919_v14 = vpop.permute.xlu0 %2918  ;;  %2953 = vst.msk [vmem:[#allocation4 + $0xb4] sm:$0xf] %vm665_vm5, %v2921_v1 }
 0x591   : > { %2952 = vst.msk [vmem:[#allocation4 + $0xa8] sm:$0xf] %vm665_vm5, %v2919_v14  ;;  %v6038_v14 = vld [vmem:[%s6724_s26 + $0x58] sm:$0xff]  }
 0x593   : > { %v3405_v59 = vpop.permute.xlu1 %3404 }
 0x594   : > { %v3403_v17 = vpop.permute.xlu0 %3402  ;;  %3437 = vst.msk [vmem:[#allocation4 + $0xb8] sm:$0xf] %vm665_vm5, %v3405_v59 }
 0x595   : > { %3436 = vst.msk [vmem:[#allocation4 + $0xac] sm:$0xf] %vm665_vm5, %v3403_v17 }
 0x597   : > { %v3051_v61 = vpop.permute.xlu1 %3050 }
 0x598   : > { %v3049_v45 = vpop.permute.xlu0 %3048  ;;  %3083 = vst.msk [vmem:[#allocation4 + $0xb4] sm:$0xf] %vm796_vm6, %v3051_v61  ;;  %v6010_v61 = vunpack.c.l.bf16 %v6038_v14 }
 0x599   : > { %3082 = vst.msk [vmem:[#allocation4 + $0xa8] sm:$0xf] %vm796_vm6, %v3049_v45 }
 0x59b   : > { %v3533_v55 = vpop.permute.xlu1 %3532 }
 0x59c   : > { %v3531_v47 = vpop.permute.xlu0 %3530  ;;  %3565 = vst.msk [vmem:[#allocation4 + $0xb8] sm:$0xf] %vm796_vm6, %v3533_v55 }
 0x59d   : > { %3564 = vst.msk [vmem:[#allocation4 + $0xac] sm:$0xf] %vm796_vm6, %v3531_v47 }
 0x5a0   : > { %v6492_v41 = vld [vmem:[#allocation4 + $0xa8] ss:$12 sps:$4 sm:$0xff]  }
 0x5a4   : > { %v6490_v22 = vld [vmem:[#allocation4 + $0xac] ss:$12 sps:$4 sm:$0xff]  }
 0x5a5   : > { %4102 = vmatprep.mubr.bf16.mxu1 %v6490_v22 }
 0x5a6   : > { %4103 = vmatmul.mubr.bf16.gmra.mxu1 %v6492_v41  ;;  %v6011_v41 = vunpack.c.h.bf16 %v6038_v14  ;;  %v6041_v14 = vld [vmem:[%s6724_s26 + $0x70] sm:$0xff]  }
 0x5a7   : > { %6227 = vmatprep.mubr.msk.bf16.mxu1 %vm1719_vm3, %v6493_v0 }
 0x5ae   : > { %6228 = vmatmul.mubr.msk.bf16.vlgmr.msra.gmra.mxu1 %vm1719_vm3, %v6494_v32 }
 0x5be   : > { %v6133_v13 = vpop.f32.mrf.mxu1 }
 0x5c0   : > { %v6134_v57 = vpop.f32.mrf.mxu1 }
 0x5c1   : > { %v6135_v31 = vadd.f32 %v6134_v57, %v6133_v13  ;;  %v6225_v13 = vpop.f32.mrf.mxu0 }
 0x5c2   : > { %v6136_v2 = vpop.f32.mrf.mxu1 }
 0x5c3   : > { %v4146_v21 = vadd.f32 %v6135_v31, %v4145_v34  ;;  %v4177_v57 = vpop.f32.mrf.mxu0  ;;  %v6039_v31 = vld [vmem:[%s6724_s26 + $0x60] sm:$0xff]  }
 0x5c4   : > { %v6137_v9 = vpop.f32.mrf.mxu1 }
 0x5c5   : > { %v8612_v30 = vadd.f32 %v5998_v8, %v4146_v21  ;;  %v6138_v15 = vadd.f32 %v6137_v9, %v6136_v2  ;;  %v6226_v21 = vpop.f32.mrf.mxu0 }
 0x5c7   : > { %6495 = vtanh.f32 %v8612_v30  ;;  %v4149_v11 = vadd.f32 %v6138_v15, %v4148_v18  ;;  %v6014_v18 = vunpack.c.l.bf16 %v6039_v31 }
 0x5c9   : > { %v8615_v12 = vadd.f32 %v5999_v36, %v4149_v11 }
 0x5cb   : > { %6497 = vtanh.f32 %v8615_v12 }
 0x5d4   : > { %v6496_v42 = vpop.eup %6495 }
 0x5d5   : > { %4448 = vrot.lane.b32.xlu0 %v6496_v42, %s6664_s29  ;;  %v4180_v42 = vpop.f32.mrf.mxu0 }
 0x5d7   : > { %v6139_v51 = vpop.f32.mrf.mxu1 }
 0x5d8   : > { %v6498_v40 = vpop.eup %6497 }
 0x5d9   : > { %v6140_v3 = vpop.f32.mrf.mxu1  ;;  %4450 = vrot.lane.b32.xlu1 %v6498_v40, %s6664_s29  ;;  %v6015_v40 = vunpack.c.h.bf16 %v6039_v31 }
 0x5da   : > { %v6141_v48 = vadd.f32 %v6140_v3, %v6139_v51 }
 0x5db   : > { %v6142_v35 = vpop.f32.mrf.mxu1 }
 0x5dc   : > { %v4154_v56 = vadd.f32 %v6217_v63, %v6141_v48 }
 0x5dd   : > { %v6143_v6 = vpop.f32.mrf.mxu1 }
 0x5de   : > { %v8621_v20 = vadd.f32 %v6002_v24, %v4154_v56  ;;  %v6144_v29 = vadd.f32 %v6143_v6, %v6142_v35  ;;  %v6040_v56 = vld [vmem:[%s6724_s26 + $0x68] sm:$0xff]  }
 0x5df   : > { %v6019_v10 = vunpack.c.h.bf16 %v6040_v56 }
 0x5e0   : > { %6499 = vtanh.f32 %v8621_v20  ;;  %v4157_v28 = vadd.f32 %v6218_v4, %v6144_v29  ;;  %v6018_v29 = vunpack.c.l.bf16 %v6040_v56  ;;  %v4339_v56 = vld [vmem:[#allocation3 + $0x98] sm:$0xff] }
 0x5e2   : > { %v8624_v62 = vadd.f32 %v6003_v5, %v4157_v28 }
 0x5e4   : > { %6501 = vtanh.f32 %v8624_v62 }
 0x5ed   : > { %v6500_v37 = vpop.eup %6499 }
 0x5ee   : > { %4452 = vrot.lane.b32.xlu0 %v6500_v37, %s6664_s29 }
 0x5ef   : > { %v6145_v25 = vpop.f32.mrf.mxu1 }
 0x5f1   : > { %v6146_v49 = vpop.f32.mrf.mxu1  ;;  %v6502_v19 = vpop.eup %6501 }
 0x5f2   : > { %v6147_v16 = vadd.f32 %v6146_v49, %v6145_v25  ;;  %4454 = vrot.lane.b32.xlu1 %v6502_v19, %s6664_s29 }
 0x5f3   : > { %v6148_v52 = vpop.f32.mrf.mxu1 }
 0x5f4   : > { %v4162_v50 = vadd.f32 %v6147_v16, %v4161_v7 }
 0x5f5   : > { %v6149_v39 = vpop.f32.mrf.mxu1 }
 0x5f6   : > { %v8630_v23 = vadd.f32 %v6006_v33, %v4162_v50  ;;  %v6150_v38 = vadd.f32 %v6149_v39, %v6148_v52 }
 0x5f8   : > { %6503 = vtanh.f32 %v8630_v23  ;;  %v4165_v27 = vadd.f32 %v6150_v38, %v4164_v43 }
 0x5fa   : > { %v8633_v54 = vadd.f32 %v6007_v44, %v4165_v27 }
 0x5fc   : > { %6505 = vtanh.f32 %v8633_v54 }
 0x605   : > { %v6504_v58 = vpop.eup %6503 }
 0x606   : > { %4456 = vrot.lane.b32.xlu0 %v6504_v58, %s6664_s29  ;;  %v6042_v58 = vld [vmem:[%s6724_s26 + $0x78] sm:$0xff]  }
 0x607   : > { %v6151_v1 = vpop.f32.mrf.mxu1 }
 0x609   : > { %v6506_v59 = vpop.eup %6505  ;;  %v6152_v17 = vpop.f32.mrf.mxu1 }
 0x60a   : > { %v6153_v45 = vadd.f32 %v6152_v17, %v6151_v1  ;;  %4458 = vrot.lane.b32.xlu1 %v6506_v59, %s6664_s29  ;;  %v6026_v17 = vunpack.c.l.bf16 %v6042_v58 }
 0x60b   : > { %v6154_v55 = vpop.f32.mrf.mxu1 }
 0x60c   : > { %v4170_v47 = vadd.f32 %v6221_v60, %v6153_v45 }
 0x60d   : > { %v6155_v0 = vpop.f32.mrf.mxu1 }
 0x60e   : > { %v8639_v22 = vadd.f32 %v6010_v61, %v4170_v47  ;;  %v6156_v32 = vadd.f32 %v6155_v0, %v6154_v55  ;;  %v6022_v47 = vunpack.c.l.bf16 %v6041_v14 }
 0x610   : > { %6507 = vtanh.f32 %v8639_v22  ;;  %v4173_v63 = vadd.f32 %v6222_v53, %v6156_v32 }
 0x612   : > { %v8642_v34 = vadd.f32 %v6011_v41, %v4173_v63 }
 0x614   : > { %6509 = vtanh.f32 %v8642_v34 }
 0x61d   : > { %v6508_v46 = vpop.eup %6507 }
 0x61e   : > { %4460 = vrot.lane.b32.xlu0 %v6508_v46, %s6664_s29 }
 0x61f   : > { %v6157_v4 = vpop.f32.mrf.mxu1 }
 0x621   : > { %v6510_v8 = vpop.eup %6509  ;;  %v6158_v2 = vpop.f32.mrf.mxu1 }
 0x622   : > { %v6159_v9 = vadd.f32 %v6158_v2, %v6157_v4  ;;  %4462 = vrot.lane.b32.xlu1 %v6510_v8, %s6664_s29  ;;  %v6023_v8 = vunpack.c.h.bf16 %v6041_v14 }
 0x623   : > { %v6160_v15 = vpop.f32.mrf.mxu1 }
 0x624   : > { %v4178_v36 = vadd.f32 %v6159_v9, %v4177_v57 }
 0x625   : > { %v6161_v11 = vpop.f32.mrf.mxu1 }
 0x626   : > { %v8648_v51 = vadd.f32 %v6014_v18, %v4178_v36  ;;  %v6162_v26 = vadd.f32 %v6161_v11, %v6160_v15  ;;  %v5640_v15 = vmul.f32 -1.442695, %v8612_v30  ;;  %v5642_v11 = vmul.f32 -1.442695, %v8621_v20  ;;  %v4338_v30 = vld [vmem:[#allocation3 + $0x90] sm:$0xff] }
 0x627   : > { %v5645_v20 = vmul.f32 -1.442695, %v8633_v54  ;;  %v4342_v54 = vld [vmem:[#allocation3 + $0xb0] sm:$0xff] }
 0x628   : > { %6511 = vtanh.f32 %v8648_v51  ;;  %v4181_v3 = vadd.f32 %v6162_v26, %v4180_v42  ;;  %v5641_v42 = vmul.f32 -1.442695, %v8615_v12  ;;  %v5646_v12 = vmul.f32 -1.442695, %v8639_v22 }
 0x62a   : > { %v8651_v24 = vadd.f32 %v6015_v40, %v4181_v3  ;;  %v5643_v40 = vmul.f32 -1.442695, %v8624_v62  ;;  %v4340_v62 = vld [vmem:[#allocation3 + $0xa0] sm:$0xff] }
 0x62c   : > { %6513 = vtanh.f32 %v8651_v24 }
 0x635   : > { %v6512_v48 = vpop.eup %6511 }
 0x636   : > { %4464 = vrot.lane.b32.xlu0 %v6512_v48, %s6664_s29  ;;  %v5644_v48 = vmul.f32 -1.442695, %v8630_v23  ;;  %v5648_v23 = vmul.f32 -1.442695, %v8648_v51  ;;  %v4344_v51 = vld [vmem:[#allocation3 + $0xc0] sm:$0xff] }
 0x637   : > { %v6163_v35 = vpop.f32.mrf.mxu1 }
 0x639   : > { %v6514_v6 = vpop.eup %6513  ;;  %v6164_v5 = vpop.f32.mrf.mxu1 }
 0x63a   : > { %v6165_v28 = vadd.f32 %v6164_v5, %v6163_v35  ;;  %4466 = vrot.lane.b32.xlu1 %v6514_v6, %s6664_s29  ;;  %v5647_v5 = vmul.f32 -1.442695, %v8642_v34 }
 0x63b   : > { %v6166_v60 = vpop.f32.mrf.mxu1 }
 0x63c   : > { %v4186_v7 = vadd.f32 %v6225_v13, %v6165_v28  ;;  %v6027_v13 = vunpack.c.h.bf16 %v6042_v58 }
 0x63d   : > { %v6167_v37 = vpop.f32.mrf.mxu1 }
 0x63e   : > { %v8657_v25 = vadd.f32 %v6018_v29, %v4186_v7  ;;  %v6168_v49 = vadd.f32 %v6167_v37, %v6166_v60  ;;  %v4341_v29 = vld [vmem:[#allocation3 + $0xa8] sm:$0xff]  ;;  %v5649_v60 = vmul.f32 -1.442695, %v8651_v24  ;;  %v4343_v37 = vld [vmem:[#allocation3 + $0xb8] sm:$0xff] }
 0x640   : > { %6515 = vtanh.f32 %v8657_v25  ;;  %v4189_v53 = vadd.f32 %v6226_v21, %v6168_v49 }
 0x642   : > { %v8660_v19 = vadd.f32 %v6019_v10, %v4189_v53 }
 0x644   : > { %6517 = vtanh.f32 %v8660_v19 }
 0x64d   : > { %v6516_v16 = vpop.eup %6515 }
 0x64e   : > { %4468 = vrot.lane.b32.xlu0 %v6516_v16, %s6664_s29  ;;  %v4346_v16 = vld [vmem:[#allocation3 + $0xd0] sm:$0xff] }
 0x64f   : > { %v6169_v52 = vpop.f32.mrf.mxu1 }
 0x651   : > { %v6518_v33 = vpop.eup %6517  ;;  %v6170_v50 = vpop.f32.mrf.mxu1 }
 0x652   : > { %4470 = vrot.lane.b32.xlu1 %v6518_v33, %s6664_s29  ;;  %v6171_v45 = vadd.f32 %v6170_v50, %v6169_v52  ;;  %v4345_v33 = vld [vmem:[#allocation3 + $0xc8] sm:$0xff] }
 0x653   : > { %v6172_v39 = vpop.f32.mrf.mxu1 }
 0x655   : > { %v6173_v43 = vpop.f32.mrf.mxu1 }
 0x656   : > { %v6174_v57 = vadd.f32 %v6173_v43, %v6172_v39  ;;  %v5650_v43 = vmul.f32 -1.442695, %v8657_v25 }
 0x666   : > { %v6175_v38 = vpop.f32.mrf.mxu1 }
 0x668   : > { %v6176_v44 = vpop.f32.mrf.mxu1 }
 0x669   : > { %v6177_v59 = vadd.f32 %v6176_v44, %v6175_v38  ;;  %v4348_v38 = vld [vmem:[#allocation3 + $0xe0] sm:$0xff]  ;;  %v4347_v44 = vld [vmem:[#allocation3 + $0xd8] sm:$0xff] }
 0x66a   : > { %v6178_v27 = vpop.f32.mrf.mxu1 }
 0x66c   : > { %v6179_v1 = vpop.f32.mrf.mxu1 }
 0x66d   : > { %v6180_v41 = vadd.f32 %v6179_v1, %v6178_v27  ;;  %v8703_v27 = vpop.permute.xlu0 %4368 }
 0x66e   : > { %v6229_v61 = vpop.f32.mrf.mxu1 }
 0x66f   : > { %v4202_v55 = vadd.f32 %v6229_v61, %v6177_v59  ;;  %v5651_v59 = vmul.f32 -1.442695, %v8660_v19  ;;  %v4349_v61 = vld [vmem:[#allocation3 + $0xe8] sm:$0xff] }
 0x670   : > { %v4193_v0 = vpop.f32.mrf.mxu1 }
 0x671   : > { %v8667_v32 = vadd.f32 %v6026_v17, %v4202_v55  ;;  %v4194_v63 = vadd.f32 %v6171_v45, %v4193_v0  ;;  %v4350_v17 = vld [vmem:[#allocation3 + $0xf0] sm:$0xff]  ;;  %v4449_v45 = vpop.permute.xlu0 %4448  ;;  %v8708_v55 = vpop.permute.xlu1 %4370 }
 0x672   : > { %v6230_v46 = vpop.f32.mrf.mxu1 }
 0x673   : > { %6519 = vtanh.f32 %v8667_v32  ;;  %v8670_v4 = vadd.f32 %v6022_v47, %v4194_v63  ;;  %v4205_v31 = vadd.f32 %v6230_v46, %v6180_v41 }
 0x674   : > { %v4196_v2 = vpop.f32.mrf.mxu1 }
 0x675   : > { %v8672_v21 = vadd.f32 %v6027_v13, %v4205_v31  ;;  %v4197_v9 = vadd.f32 %v6174_v57, %v4196_v2  ;;  %6521 = vtanh.f32 %v8670_v4  ;;  %v4351_v13 = vld [vmem:[#allocation3 + $0xf8] sm:$0xff]  ;;  %v4453_v46 = vpop.permute.xlu0 %4452  ;;  %v4451_v57 = vpop.permute.xlu1 %4450 }
 0x677   : > { %6523 = vtanh.f32 %v8672_v21  ;;  %v8676_v18 = vadd.f32 %v6023_v8, %v4197_v9 }
 0x679   : > { %6525 = vtanh.f32 %v8676_v18 }
 0x67a   : > { %6527 = vpow2.f32 %v5640_v15 }
 0x67b   : > { %6529 = vpow2.f32 %v5642_v11 }
 0x67c   : > { %6531 = vpow2.f32 %v5641_v42  ;;  %v4455_v42 = vpop.permute.xlu1 %4454 }
 0x67d   : > { %6533 = vpow2.f32 %v5643_v40 }
 0x67e   : > { %6535 = vpow2.f32 %v5644_v48 }
 0x67f   : > { %6537 = vpow2.f32 %v5645_v20 }
 0x680   : > { %v6520_v36 = vpop.eup %6519  ;;  %6539 = vpow2.f32 %v5646_v12 }
 0x681   : > { %4476 = vrot.lane.b32.xlu0 %v6520_v36, %s6664_s29  ;;  %6541 = vpow2.f32 %v5648_v23  ;;  %v4457_v36 = vpop.permute.xlu0 %4456 }
 0x682   : > { %v6522_v26 = vpop.eup %6521  ;;  %6543 = vpow2.f32 %v5647_v5 }
 0x684   : > { %v6524_v3 = vpop.eup %6523 }
 0x685   : > { %4472 = vrot.lane.b32.xlu0 %v6522_v26, %s6664_s29  ;;  %4478 = vrot.lane.b32.xlu1 %v6524_v3, %s6664_s29 }
 0x686   : > { %v6526_v35 = vpop.eup %6525 }
 0x687   : > { %v6528_v6 = vpop.eup %6527 }
 0x688   : > { %v4272_v22 = vadd.f32 1.0, %v6528_v6  ;;  %v6530_v28 = vpop.eup %6529 }
 0x689   : > { %4372 = vrot.lane.b32.xlu0 %v4338_v30, %s6664_s29  ;;  %4474 = vrot.lane.b32.xlu1 %v6526_v35, %s6664_s29  ;;  %v6532_v7 = vpop.eup %6531  ;;  %v4274_v34 = vadd.f32 1.0, %v6530_v28  ;;  %v4459_v35 = vpop.permute.xlu1 %4458 }
 0x68a   : > { %v6534_v10 = vpop.eup %6533  ;;  %6545 = vrcp.f32 %v4272_v22  ;;  %v4273_v53 = vadd.f32 1.0, %v6532_v7 }
 0x68b   : > { %v6536_v49 = vpop.eup %6535  ;;  %6547 = vpow2.f32 %v5649_v60  ;;  %v4275_v52 = vadd.f32 1.0, %v6534_v10 }
 0x68c   : > { %v6538_v50 = vpop.eup %6537  ;;  %6549 = vrcp.f32 %v4274_v34  ;;  %v4276_v24 = vadd.f32 1.0, %v6536_v49 }
 0x68d   : > { %4376 = vrot.lane.b32.xlu0 %v4340_v62, %s6664_s29  ;;  %4374 = vrot.lane.b32.xlu1 %v4339_v56, %s6664_s29  ;;  %v6540_v39 = vpop.eup %6539  ;;  %6551 = vrcp.f32 %v4273_v53  ;;  %v4277_v58 = vadd.f32 1.0, %v6538_v50  ;;  %v5652_v50 = vmul.f32 -1.442695, %v8670_v4 }
 0x68e   : > { %6553 = vrcp.f32 %v4275_v52  ;;  %v4278_v1 = vadd.f32 1.0, %v6540_v39  ;;  %v6542_v14 = vpop.eup %6541  ;;  %v5653_v39 = vmul.f32 -1.442695, %v8676_v18 }
 0x68f   : > { %6555 = vrcp.f32 %v4276_v24  ;;  %v6544_v25 = vpop.eup %6543  ;;  %v4280_v47 = vadd.f32 1.0, %v6542_v14  ;;  %v5654_v24 = vmul.f32 -1.442695, %v8667_v32 }
 0x690   : > { %6557 = vpow2.f32 %v5650_v43  ;;  %v4279_v41 = vadd.f32 1.0, %v6544_v25  ;;  %v4461_v30 = vpop.permute.xlu0 %4460  ;;  %v5655_v43 = vmul.f32 -1.442695, %v8672_v21 }
 0x691   : > { %4380 = vrot.lane.b32.xlu0 %v4342_v54, %s6664_s29  ;;  %4378 = vrot.lane.b32.xlu1 %v4341_v29, %s6664_s29  ;;  %6559 = vrcp.f32 %v4277_v58 }
 0x692   : > { %6561 = vrcp.f32 %v4278_v1 }
 0x693   : > { %6563 = vpow2.f32 %v5651_v59 }
 0x694   : > { %6565 = vrcp.f32 %v4280_v47  ;;  %v4463_v54 = vpop.permute.xlu1 %4462 }
 0x695   : > { %4384 = vrot.lane.b32.xlu0 %v4344_v51, %s6664_s29  ;;  %4382 = vrot.lane.b32.xlu1 %v4343_v37, %s6664_s29  ;;  %6567 = vrcp.f32 %v4279_v41 }
 0x697   : > { %v8711_v0 = vpop.eup %6545 }
 0x698   : > { %v6548_v19 = vpop.eup %6547  ;;  %v4496_v63 = vmul.f32 %v8711_v0, %v4449_v45 }
 0x699   : > { %4388 = vrot.lane.b32.xlu0 %v4346_v16, %s6664_s29  ;;  %4386 = vrot.lane.b32.xlu1 %v4345_v33, %s6664_s29  ;;  %v8716_v31 = vpop.eup %6549  ;;  %v4281_v8 = vadd.f32 1.0, %v6548_v19 }
 0x69a   : > { %v8719_v2 = vpop.eup %6551  ;;  %v4498_v9 = vmul.f32 %v8716_v31, %v4453_v46 }
 0x69b   : > { %v4497_v15 = vmul.f32 %v8719_v2, %v4451_v57  ;;  %v8723_v11 = vpop.eup %6553  ;;  %6569 = vrcp.f32 %v4281_v8 }
 0x69c   : > { %v8726_v26 = vpop.eup %6555  ;;  %v4499_v48 = vmul.f32 %v8723_v11, %v4455_v42 }
 0x69d   : > { %4392 = vrot.lane.b32.xlu0 %v4348_v38, %s6664_s29  ;;  %4390 = vrot.lane.b32.xlu1 %v4347_v44, %s6664_s29  ;;  %v6558_v40 = vpop.eup %6557  ;;  %v4500_v3 = vmul.f32 %v8726_v26, %v4457_v36 }
 0x69e   : > { %v8731_v20 = vpop.eup %6559  ;;  %v4282_v62 = vadd.f32 1.0, %v6558_v40 }
 0x69f   : > { %v8734_v12 = vpop.eup %6561  ;;  %v4501_v6 = vmul.f32 %v8731_v20, %v4459_v35 }
 0x6a0   : > { %v6564_v56 = vpop.eup %6563  ;;  %v4502_v23 = vmul.f32 %v8734_v12, %v4461_v30  ;;  %6571 = vrcp.f32 %v4282_v62 }
 0x6a1   : > { %4396 = vrot.lane.b32.xlu0 %v4350_v17, %s6664_s29  ;;  %4394 = vrot.lane.b32.xlu1 %v4349_v61, %s6664_s29  ;;  %v8740_v29 = vpop.eup %6565  ;;  %v4283_v22 = vadd.f32 1.0, %v6564_v56 }
 0x6a2   : > { %v8743_v28 = vpop.eup %6567 }
 0x6a3   : > { %v4503_v51 = vmul.f32 %v8743_v28, %v4463_v54  ;;  %6573 = vrcp.f32 %v4283_v22 }
 0x6a4   : > { %6575 = vpow2.f32 %v5652_v50 }
 0x6a5   : > { %4528 = vrot.lane.b32.xlu0 %v4496_v63, %s6664_s29  ;;  %4398 = vrot.lane.b32.xlu1 %v4351_v13, %s6664_s29  ;;  %6577 = vpow2.f32 %v5654_v24 }
 0x6a6   : > { %6579 = vpow2.f32 %v5653_v39 }
 0x6a7   : > { %6581 = vpow2.f32 %v5655_v43 }
 0x6a8   : > { %v4465_v5 = vpop.permute.xlu0 %4464  ;;  %v8749_v37 = vpop.eup %6569 }
 0x6a9   : > { %4532 = vrot.lane.b32.xlu0 %v4498_v9, %s6664_s29  ;;  %4530 = vrot.lane.b32.xlu1 %v4497_v15, %s6664_s29  ;;  %v4504_v60 = vmul.f32 %v8740_v29, %v4465_v5 }
 0x6ac   : > { %v4467_v7 = vpop.permute.xlu1 %4466 }
 0x6ad   : > { %4536 = vrot.lane.b32.xlu0 %v4500_v3, %s6664_s29  ;;  %4534 = vrot.lane.b32.xlu1 %v4499_v48, %s6664_s29  ;;  %v4505_v10 = vmul.f32 %v8749_v37, %v4467_v7  ;;  %v8753_v34 = vpop.eup %6571 }
 0x6b0   : > { %v8757_v16 = vpop.eup %6573 }
 0x6b1   : > { %4540 = vrot.lane.b32.xlu0 %v4502_v23, %s6664_s29  ;;  %4538 = vrot.lane.b32.xlu1 %v4501_v6, %s6664_s29  ;;  %v6576_v38 = vpop.eup %6575  ;;  %v4416_v23 = vmul.f32 %v8711_v0, %v8703_v27 }
 0x6b2   : > { %v4284_v44 = vadd.f32 1.0, %v6576_v38  ;;  %v6578_v58 = vpop.eup %6577 }
 0x6b3   : > { %v6580_v1 = vpop.eup %6579  ;;  %v4286_v14 = vadd.f32 1.0, %v6578_v58 }
 0x6b4   : > { %6583 = vrcp.f32 %v4284_v44  ;;  %v4285_v59 = vadd.f32 1.0, %v6580_v1  ;;  %v6582_v17 = vpop.eup %6581 }
 0x6b5   : > { %4544 = vrot.lane.b32.xlu0 %v4504_v60, %s6664_s29  ;;  %4542 = vrot.lane.b32.xlu1 %v4503_v51, %s6664_s29  ;;  %6585 = vrcp.f32 %v4286_v14  ;;  %v4287_v4 = vadd.f32 1.0, %v6582_v17  ;;  %v4417_v60 = vmul.f32 %v8719_v2, %v8708_v55 }
 0x6b6   : > { %6587 = vrcp.f32 %v4285_v59 }
 0x6b7   : > { %6589 = vrcp.f32 %v4287_v4 }
 0x6b9   : > { %4546 = vrot.lane.b32.xlu1 %v4505_v10, %s6664_s29 }
 0x6c0   : > { %v4469_v49 = vpop.permute.xlu0 %4468 }
 0x6c1   : > { %v4506_v53 = vmul.f32 %v8753_v34, %v4469_v49  ;;  %v8765_v25 = vpop.eup %6583 }
 0x6c2   : > { %v8769_v45 = vpop.eup %6585 }
 0x6c3   : > { %4548 = vrot.lane.b32.xlu0 %v4506_v53, %s6664_s29  ;;  %v8771_v41 = vpop.eup %6587 }
 0x6c4   : > { %v4471_v33 = vpop.permute.xlu1 %4470  ;;  %v8777_v57 = vpop.eup %6589 }
 0x6c5   : > { %v4507_v52 = vmul.f32 %v8757_v16, %v4471_v33 }
 0x6c7   : > { %4550 = vrot.lane.b32.xlu1 %v4507_v52, %s6664_s29 }
 0x6f3   : > { %v4477_v32 = vpop.permute.xlu0 %4476 }
 0x6f4   : > { %v4510_v19 = vmul.f32 %v8769_v45, %v4477_v32 }
 0x6f7   : > { %v4473_v18 = vpop.permute.xlu0 %4472  ;;  %v4479_v61 = vpop.permute.xlu1 %4478 }
 0x6f8   : > { %v4508_v21 = vmul.f32 %v8765_v25, %v4473_v18  ;;  %v4511_v9 = vmul.f32 %v8777_v57, %v4479_v61 }
 0x6fa   : > { %4552 = vrot.lane.b32.xlu0 %v4508_v21, %s6664_s29 }
 0x6fb   : > { %v4373_v47 = vpop.permute.xlu0 %4372  ;;  %v4475_v63 = vpop.permute.xlu1 %4474 }
 0x6fc   : > { %v4509_v13 = vmul.f32 %v8771_v41, %v4475_v63  ;;  %v4418_v22 = vmul.f32 %v8716_v31, %v4373_v47 }
 0x6fe   : > { %4556 = vrot.lane.b32.xlu0 %v4510_v19, %s6664_s29  ;;  %4554 = vrot.lane.b32.xlu1 %v4509_v13, %s6664_s29 }
 0x6ff   : > { %v4377_v46 = vpop.permute.xlu0 %4376  ;;  %v4375_v8 = vpop.permute.xlu1 %4374 }
 0x700   : > { %v4420_v53 = vmul.f32 %v8726_v26, %v4377_v46  ;;  %v4419_v27 = vmul.f32 %v8723_v11, %v4375_v8 }
 0x702   : > { %4558 = vrot.lane.b32.xlu1 %v4511_v9, %s6664_s29 }
 0x703   : > { %v4381_v15 = vpop.permute.xlu0 %4380  ;;  %v4379_v36 = vpop.permute.xlu1 %4378 }
 0x704   : > { %v4422_v55 = vmul.f32 %v8734_v12, %v4381_v15  ;;  %v4421_v39 = vmul.f32 %v8731_v20, %v4379_v36 }
 0x707   : > { %v4385_v42 = vpop.permute.xlu0 %4384  ;;  %v4383_v40 = vpop.permute.xlu1 %4382 }
 0x708   : > { %v4424_v1 = vmul.f32 %v8740_v29, %v4385_v42  ;;  %v4423_v59 = vmul.f32 %v8743_v28, %v4383_v40 }
 0x70b   : > { %v4389_v3 = vpop.permute.xlu0 %4388  ;;  %v4387_v48 = vpop.permute.xlu1 %4386 }
 0x70c   : > { %v4425_v21 = vmul.f32 %v8749_v37, %v4387_v48  ;;  %v4426_v9 = vmul.f32 %v8753_v34, %v4389_v3 }
 0x70f   : > { %v8781_v30 = vpop.permute.xlu0 %4392  ;;  %v8783_v35 = vpop.permute.xlu1 %4390 }
 0x710   : > { %v4427_v48 = vmul.f32 %v8757_v16, %v8783_v35 }
 0x713   : > { %v8785_v62 = vpop.permute.xlu0 %4396  ;;  %v8787_v56 = vpop.permute.xlu1 %4394 }
 0x714   : > { %v4430_v35 = vmul.f32 %v8769_v45, %v8785_v62 }
 0x717   : > { %v4529_v6 = vpop.permute.xlu0 %4528  ;;  %v8791_v5 = vpop.permute.xlu1 %4398 }
 0x718   : > { %v4576_v54 = vadd.f32 %v4529_v6, %v4416_v23 }
 0x71a   : > { %6591 = vtanh.f32 %v4576_v54  ;;  %4704 = vrot.lane.b32.xlu0 %v4576_v54, %s6666_s16 }
 0x71b   : > { %v4533_v51 = vpop.permute.xlu0 %4532  ;;  %v4531_v7 = vpop.permute.xlu1 %4530 }
 0x71c   : > { %v8797_v10 = vadd.f32 %v4533_v51, %v4418_v22  ;;  %v4577_v49 = vadd.f32 %v4531_v7, %v4417_v60 }
 0x71e   : > { %6593 = vtanh.f32 %v8797_v10  ;;  %4706 = vrot.lane.b32.xlu1 %v4577_v49, %s6666_s16 }
 0x71f   : > { %6595 = vtanh.f32 %v4577_v49  ;;  %v4537_v33 = vpop.permute.xlu0 %4536  ;;  %v4535_v52 = vpop.permute.xlu1 %4534  ;;  %v4428_v49 = vmul.f32 %v8765_v25, %v8781_v30 }
 0x720   : > { %v8803_v50 = vadd.f32 %v4537_v33, %v4420_v53  ;;  %v8805_v24 = vadd.f32 %v4535_v52, %v4419_v27  ;;  %v4431_v52 = vmul.f32 %v8777_v57, %v8791_v5 }
 0x722   : > { %6597 = vtanh.f32 %v8803_v50 }
 0x723   : > { %6599 = vtanh.f32 %v8805_v24  ;;  %v4541_v43 = vpop.permute.xlu0 %4540  ;;  %v4539_v38 = vpop.permute.xlu1 %4538 }
 0x724   : > { %v8811_v44 = vadd.f32 %v4541_v43, %v4422_v55  ;;  %v8813_v58 = vadd.f32 %v4539_v38, %v4421_v39  ;;  %v4429_v39 = vmul.f32 %v8771_v41, %v8787_v56 }
 0x726   : > { %6601 = vtanh.f32 %v8811_v44 }
 0x727   : > { %v6592_v14 = vpop.eup %6591  ;;  %6603 = vtanh.f32 %v8813_v58  ;;  %v4545_v17 = vpop.permute.xlu0 %4544 }
 0x728   : > { %v4543_v4 = vpop.permute.xlu1 %4542  ;;  %v8819_v32 = vadd.f32 %v4545_v17, %v4424_v1  ;;  %4624 = vrot.lane.b32.xlu0 %v6592_v14, %s6664_s29 }
 0x729   : > { %v8822_v18 = vadd.f32 %v4543_v4, %v4423_v59 }
 0x72a   : > { %6605 = vtanh.f32 %v8819_v32 }
 0x72b   : > { %v6594_v61 = vpop.eup %6593  ;;  %6607 = vtanh.f32 %v8822_v18 }
 0x72c   : > { %v6596_v47 = vpop.eup %6595  ;;  %v4547_v19 = vpop.permute.xlu1 %4546  ;;  %4628 = vrot.lane.b32.xlu0 %v6594_v61, %s6664_s29 }
 0x72d   : > { %v8828_v63 = vadd.f32 %v4547_v19, %v4425_v21  ;;  %4626 = vrot.lane.b32.xlu1 %v6596_v47, %s6664_s29 }
 0x72f   : > { %v6598_v13 = vpop.eup %6597  ;;  %6609 = vtanh.f32 %v8828_v63 }
 0x730   : > { %v6600_v46 = vpop.eup %6599  ;;  %4632 = vrot.lane.b32.xlu0 %v6598_v13, %s6664_s29 }
 0x731   : > { %4630 = vrot.lane.b32.xlu1 %v6600_v46, %s6664_s29 }
 0x733   : > { %v6602_v8 = vpop.eup %6601 }
 0x734   : > { %v6604_v15 = vpop.eup %6603  ;;  %4636 = vrot.lane.b32.xlu0 %v6602_v8, %s6664_s29 }
 0x735   : > { %v4549_v36 = vpop.permute.xlu0 %4548  ;;  %4634 = vrot.lane.b32.xlu1 %v6604_v15, %s6664_s29 }
 0x736   : > { %v4586_v42 = vadd.f32 %v4549_v36, %v4426_v9 }
 0x737   : > { %v6606_v40 = vpop.eup %6605 }
 0x738   : > { %6611 = vtanh.f32 %v4586_v42  ;;  %v6608_v23 = vpop.eup %6607  ;;  %4640 = vrot.lane.b32.xlu0 %v6606_v40, %s6664_s29 }
 0x739   : > { %v4551_v6 = vpop.permute.xlu1 %4550  ;;  %4638 = vrot.lane.b32.xlu1 %v6608_v23, %s6664_s29 }
 0x73a   : > { %v4587_v54 = vadd.f32 %v4551_v6, %v4427_v48 }
 0x73c   : > { %6613 = vtanh.f32 %v4587_v54  ;;  %v6610_v3 = vpop.eup %6609 }
 0x73d   : > { %4642 = vrot.lane.b32.xlu1 %v6610_v3, %s6664_s29 }
 0x745   : > { %v6612_v22 = vpop.eup %6611 }
 0x746   : > { %4644 = vrot.lane.b32.xlu0 %v6612_v22, %s6664_s29 }
 0x749   : > { %v6614_v60 = vpop.eup %6613 }
 0x74a   : > { %4646 = vrot.lane.b32.xlu1 %v6614_v60, %s6664_s29 }
 0x76c   : > { %v4553_v51 = vpop.permute.xlu0 %4552 }
 0x76d   : > { %v4588_v33 = vadd.f32 %v4553_v51, %v4428_v49 }
 0x770   : > { %v4557_v7 = vpop.permute.xlu0 %4556  ;;  %v4555_v53 = vpop.permute.xlu1 %4554 }
 0x771   : > { %v4590_v27 = vadd.f32 %v4557_v7, %v4430_v35  ;;  %v4589_v38 = vadd.f32 %v4555_v53, %v4429_v39 }
 0x773   : > { %6615 = vtanh.f32 %v4590_v27 }
 0x774   : > { %v4559_v55 = vpop.permute.xlu1 %4558  ;;  %6617 = vtanh.f32 %v4588_v33 }
 0x775   : > { %v4591_v43 = vadd.f32 %v4559_v55, %v4431_v52 }
 0x777   : > { %6619 = vtanh.f32 %v4591_v43 }
 0x778   : > { %6621 = vtanh.f32 %v4589_v38 }
 0x780   : > { %v6616_v62 = vpop.eup %6615 }
 0x781   : > { %4652 = vrot.lane.b32.xlu0 %v6616_v62, %s6664_s29  ;;  %v6618_v30 = vpop.eup %6617 }
 0x784   : > { %v6620_v1 = vpop.eup %6619 }
 0x785   : > { %4648 = vrot.lane.b32.xlu0 %v6618_v30, %s6664_s29  ;;  %4654 = vrot.lane.b32.xlu1 %v6620_v1, %s6664_s29  ;;  %v6622_v14 = vpop.eup %6621 }
 0x789   : > { %4708 = vrot.lane.b32.xlu0 %v8797_v10, %s6666_s16  ;;  %4650 = vrot.lane.b32.xlu1 %v6622_v14, %s6664_s29 }
 0x78c   : > { %v4705_v56 = vpop.permute.xlu0 %4704 }
 0x78d   : > { %4752 = vst.msk [vmem:[#allocation3 + $0x80] sm:$0xff] %vm1719_vm3, %v4705_v56  ;;  %4712 = vrot.lane.b32.xlu0 %v8803_v50, %s6666_s16  ;;  %4710 = vrot.lane.b32.xlu1 %v8805_v24, %s6666_s16 }
 0x790   : > { %v4707_v5 = vpop.permute.xlu1 %4706 }
 0x791   : > { %4716 = vrot.lane.b32.xlu0 %v8811_v44, %s6666_s16  ;;  %4753 = vst.msk [vmem:[#allocation3 + $0x88] sm:$0xff] %vm1719_vm3, %v4707_v5  ;;  %4714 = vrot.lane.b32.xlu1 %v8813_v58, %s6666_s16 }
 0x795   : > { %4720 = vrot.lane.b32.xlu0 %v8819_v32, %s6666_s16  ;;  %4718 = vrot.lane.b32.xlu1 %v8822_v18, %s6666_s16 }
 0x799   : > { %4724 = vrot.lane.b32.xlu0 %v4586_v42, %s6666_s16  ;;  %4722 = vrot.lane.b32.xlu1 %v8828_v63, %s6666_s16 }
 0x79a   : > { %v4625_v10 = vpop.permute.xlu0 %4624 }
 0x79b   : > { %v4672_v44 = vmul.f32 %v8711_v0, %v4625_v10 }
 0x79d   : > { %4728 = vrot.lane.b32.xlu0 %v4588_v33, %s6666_s16  ;;  %4726 = vrot.lane.b32.xlu1 %v4587_v54, %s6666_s16 }
 0x79e   : > { %v4629_v50 = vpop.permute.xlu0 %4628 }
 0x79f   : > { %v4627_v24 = vpop.permute.xlu1 %4626  ;;  %v4674_v17 = vmul.f32 %v8716_v31, %v4629_v50 }
 0x7a0   : > { %v4673_v4 = vmul.f32 %v8719_v2, %v4627_v24 }
 0x7a1   : > { %4732 = vrot.lane.b32.xlu0 %v4590_v27, %s6666_s16  ;;  %4730 = vrot.lane.b32.xlu1 %v4589_v38, %s6666_s16 }
 0x7a2   : > { %v4633_v59 = vpop.permute.xlu0 %4632 }
 0x7a3   : > { %v4631_v58 = vpop.permute.xlu1 %4630  ;;  %v4676_v61 = vmul.f32 %v8726_v26, %v4633_v59 }
 0x7a4   : > { %v4675_v0 = vmul.f32 %v8723_v11, %v4631_v58 }
 0x7a5   : > { %4784 = vrot.lane.b32.xlu0 %v4672_v44, %s6665_s30  ;;  %4734 = vrot.lane.b32.xlu1 %v4591_v43, %s6666_s16 }
 0x7a6   : > { %v4637_v18 = vpop.permute.xlu0 %4636 }
 0x7a7   : > { %v4635_v32 = vpop.permute.xlu1 %4634  ;;  %v4678_v21 = vmul.f32 %v8734_v12, %v4637_v18 }
 0x7a8   : > { %v4677_v31 = vmul.f32 %v8731_v20, %v4635_v32 }
 0x7a9   : > { %4788 = vrot.lane.b32.xlu0 %v4674_v17, %s6665_s30  ;;  %4786 = vrot.lane.b32.xlu1 %v4673_v4, %s6665_s30 }
 0x7aa   : > { %v4641_v2 = vpop.permute.xlu0 %4640 }
 0x7ab   : > { %v4639_v47 = vpop.permute.xlu1 %4638  ;;  %v4680_v19 = vmul.f32 %v8740_v29, %v4641_v2 }
 0x7ac   : > { %v4679_v26 = vmul.f32 %v8743_v28, %v4639_v47 }
 0x7ad   : > { %4792 = vrot.lane.b32.xlu0 %v4676_v61, %s6665_s30  ;;  %4790 = vrot.lane.b32.xlu1 %v4675_v0, %s6665_s30 }
 0x7af   : > { %v4643_v63 = vpop.permute.xlu1 %4642 }
 0x7b0   : > { %v4681_v12 = vmul.f32 %v8749_v37, %v4643_v63 }
 0x7b1   : > { %4796 = vrot.lane.b32.xlu0 %v4678_v21, %s6665_s30  ;;  %4794 = vrot.lane.b32.xlu1 %v4677_v31, %s6665_s30 }
 0x7b5   : > { %4800 = vrot.lane.b32.xlu0 %v4680_v19, %s6665_s30  ;;  %4798 = vrot.lane.b32.xlu1 %v4679_v26, %s6665_s30 }
 0x7b8   : > { %v4645_v11 = vpop.permute.xlu0 %4644 }
 0x7b9   : > { %v4682_v13 = vmul.f32 %v8753_v34, %v4645_v11  ;;  %4802 = vrot.lane.b32.xlu1 %v4681_v12, %s6665_s30 }
 0x7bb   : > { %4804 = vrot.lane.b32.xlu0 %v4682_v13, %s6665_s30 }
 0x7bc   : > { %v4647_v20 = vpop.permute.xlu1 %4646 }
 0x7bd   : > { %v4683_v46 = vmul.f32 %v8757_v16, %v4647_v20 }
 0x7bf   : > { %4806 = vrot.lane.b32.xlu1 %v4683_v46, %s6665_s30 }
 0x7f3   : > { %v4653_v29 = vpop.permute.xlu0 %4652 }
 0x7f4   : > { %v4686_v37 = vmul.f32 %v8769_v45, %v4653_v29 }
 0x7f7   : > { %v4649_v28 = vpop.permute.xlu0 %4648  ;;  %v4655_v8 = vpop.permute.xlu1 %4654 }
 0x7f8   : > { %v4684_v9 = vmul.f32 %v8765_v25, %v4649_v28  ;;  %v4687_v25 = vmul.f32 %v8777_v57, %v4655_v8 }
 0x7fa   : > { %4808 = vrot.lane.b32.xlu0 %v4684_v9, %s6665_s30 }
 0x7fb   : > { %v4709_v15 = vpop.permute.xlu0 %4708  ;;  %v4651_v34 = vpop.permute.xlu1 %4650 }
 0x7fc   : > { %4754 = vst.msk [vmem:[#allocation3 + $0x90] sm:$0xff] %vm1719_vm3, %v4709_v15  ;;  %v4685_v36 = vmul.f32 %v8771_v41, %v4651_v34 }
 0x7fe   : > { %4812 = vrot.lane.b32.xlu0 %v4686_v37, %s6665_s30  ;;  %4810 = vrot.lane.b32.xlu1 %v4685_v36, %s6665_s30 }
 0x7ff   : > { %v4713_v16 = vpop.permute.xlu0 %4712  ;;  %v4711_v42 = vpop.permute.xlu1 %4710 }
 0x800   : > { %4756 = vst.msk [vmem:[#allocation3 + $0xa0] sm:$0xff] %vm1719_vm3, %v4713_v16  ;;  %4755 = vst.msk [vmem:[#allocation3 + $0x98] sm:$0xff] %vm1719_vm3, %v4711_v42 }
 0x802   : > { %4814 = vrot.lane.b32.xlu1 %v4687_v25, %s6665_s30 }
 0x803   : > { %v4717_v45 = vpop.permute.xlu0 %4716  ;;  %v4715_v40 = vpop.permute.xlu1 %4714 }
 0x804   : > { %4758 = vst.msk [vmem:[#allocation3 + $0xb0] sm:$0xff] %vm1719_vm3, %v4717_v45  ;;  %4757 = vst.msk [vmem:[#allocation3 + $0xa8] sm:$0xff] %vm1719_vm3, %v4715_v40 }
 0x807   : > { %v4721_v41 = vpop.permute.xlu0 %4720  ;;  %v4719_v48 = vpop.permute.xlu1 %4718 }
 0x808   : > { %4760 = vst.msk [vmem:[#allocation3 + $0xc0] sm:$0xff] %vm1719_vm3, %v4721_v41  ;;  %4759 = vst.msk [vmem:[#allocation3 + $0xb8] sm:$0xff] %vm1719_vm3, %v4719_v48 }
 0x80b   : > { %v4725_v23 = vpop.permute.xlu0 %4724  ;;  %v4723_v6 = vpop.permute.xlu1 %4722 }
 0x80c   : > { %4762 = vst.msk [vmem:[#allocation3 + $0xd0] sm:$0xff] %vm1719_vm3, %v4725_v23  ;;  %4761 = vst.msk [vmem:[#allocation3 + $0xc8] sm:$0xff] %vm1719_vm3, %v4723_v6 }
 0x80f   : > { %v4729_v57 = vpop.permute.xlu0 %4728  ;;  %v4727_v54 = vpop.permute.xlu1 %4726 }
 0x810   : > { %4764 = vst.msk [vmem:[#allocation3 + $0xe0] sm:$0xff] %vm1719_vm3, %v4729_v57  ;;  %4763 = vst.msk [vmem:[#allocation3 + $0xd8] sm:$0xff] %vm1719_vm3, %v4727_v54 }
 0x813   : > { %v4733_v3 = vpop.permute.xlu0 %4732  ;;  %v4731_v22 = vpop.permute.xlu1 %4730 }
 0x814   : > { %4766 = vst.msk [vmem:[#allocation3 + $0xf0] sm:$0xff] %vm1719_vm3, %v4733_v3  ;;  %4765 = vst.msk [vmem:[#allocation3 + $0xe8] sm:$0xff] %vm1719_vm3, %v4731_v22 }
 0x817   : > { %v4785_v60 = vpop.permute.xlu0 %4784  ;;  %v4735_v51 = vpop.permute.xlu1 %4734 }
 0x818   : > { %5656 = vst.msk [vmem:[%s7930_s18 + $0xd9] sm:$0xff] %vm1719_vm3, %v4785_v60  ;;  %4767 = vst.msk [vmem:[#allocation3 + $0xf8] sm:$0xff] %vm1719_vm3, %v4735_v51 }
 0x81b   : > { %v4789_v35 = vpop.permute.xlu0 %4788  ;;  %v4787_v7 = vpop.permute.xlu1 %4786 }
 0x81c   : > { %5658 = vst.msk [vmem:[%s7930_s18 + $0xf1] sm:$0xff] %vm1719_vm3, %v4789_v35  ;;  %5657 = vst.msk [vmem:[%s7930_s18 + $0xe1] sm:$0xff] %vm1719_vm3, %v4787_v7 }
 0x81f   : > { %v4793_v49 = vpop.permute.xlu0 %4792  ;;  %v4791_v53 = vpop.permute.xlu1 %4790 }
 0x820   : > { %5660 = vst.msk [vmem:[%s7930_s18 + $0x109] sm:$0xff] %vm1719_vm3, %v4793_v49  ;;  %5659 = vst.msk [vmem:[%s7930_s18 + $0xf9] sm:$0xff] %vm1719_vm3, %v4791_v53 }
 0x823   : > { %v4797_v27 = vpop.permute.xlu0 %4796  ;;  %v4795_v33 = vpop.permute.xlu1 %4794 }
 0x824   : > { %5662 = vst.msk [vmem:[%s7930_s18 + $0x121] sm:$0xff] %vm1719_vm3, %v4797_v27  ;;  %5661 = vst.msk [vmem:[%s7930_s18 + $0x111] sm:$0xff] %vm1719_vm3, %v4795_v33 }
 0x827   : > { %v4801_v52 = vpop.permute.xlu0 %4800  ;;  %v4799_v55 = vpop.permute.xlu1 %4798 }
 0x828   : > { %5664 = vst.msk [vmem:[%s7930_s18 + $0x139] sm:$0xff] %vm1719_vm3, %v4801_v52  ;;  %5663 = vst.msk [vmem:[%s7930_s18 + $0x129] sm:$0xff] %vm1719_vm3, %v4799_v55 }
 0x82b   : > { %v4803_v39 = vpop.permute.xlu1 %4802 }
 0x82c   : > { %5665 = vst.msk [vmem:[%s7930_s18 + $0x141] sm:$0xff] %vm1719_vm3, %v4803_v39 }
 0x82d   : > { %v4805_v43 = vpop.permute.xlu0 %4804 }
 0x82e   : > { %5666 = vst.msk [vmem:[%s7930_s18 + $0x151] sm:$0xff] %vm1719_vm3, %v4805_v43 }
 0x831   : > { %v4807_v38 = vpop.permute.xlu1 %4806 }
 0x832   : > { %5667 = vst.msk [vmem:[%s7930_s18 + $0x159] sm:$0xff] %vm1719_vm3, %v4807_v38 }
 0x86c   : > { %v4809_v62 = vpop.permute.xlu0 %4808 }
 0x86d   : > { %5668 = vst.msk [vmem:[%s7930_s18 + $0x169] sm:$0xff] %vm1719_vm3, %v4809_v62 }
 0x870   : > { %v4813_v30 = vpop.permute.xlu0 %4812  ;;  %v4811_v1 = vpop.permute.xlu1 %4810 }
 0x871   : > { %5670 = vst.msk [vmem:[%s7930_s18 + $0x181] sm:$0xff] %vm1719_vm3, %v4813_v30  ;;  %5669 = vst.msk [vmem:[%s7930_s18 + $0x171] sm:$0xff] %vm1719_vm3, %v4811_v1  ;;  %4852 = sbr.rel (%p5301_p9) target bundleno = 2174 (0x87e), region = 40 }
 0x874   : > { %v4815_v14 = vpop.permute.xlu1 %4814 }
 0x875   : > { %5671 = vst.msk [vmem:[%s7930_s18 + $0x189] sm:$0xff] %vm1719_vm3, %v4815_v14 }
 0x876   : > { %4853 = vst.msk [vmem:[%s6719_s21 + $0x80] sm:$0xff] %vm1719_vm3, %v4785_v60  ;;  %4854 = vst.msk [vmem:[%s6719_s21 + $0x88] sm:$0xff] %vm1719_vm3, %v4787_v7 }
 0x877   : > { %4855 = vst.msk [vmem:[%s6719_s21 + $0x90] sm:$0xff] %vm1719_vm3, %v4789_v35  ;;  %4856 = vst.msk [vmem:[%s6719_s21 + $0x98] sm:$0xff] %vm1719_vm3, %v4791_v53 }
 0x878   : > { %4857 = vst.msk [vmem:[%s6719_s21 + $0xa0] sm:$0xff] %vm1719_vm3, %v4793_v49  ;;  %4858 = vst.msk [vmem:[%s6719_s21 + $0xa8] sm:$0xff] %vm1719_vm3, %v4795_v33 }
 0x879   : > { %4859 = vst.msk [vmem:[%s6719_s21 + $0xb0] sm:$0xff] %vm1719_vm3, %v4797_v27  ;;  %4860 = vst.msk [vmem:[%s6719_s21 + $0xb8] sm:$0xff] %vm1719_vm3, %v4799_v55 }
 0x87a   : > { %4861 = vst.msk [vmem:[%s6719_s21 + $0xc0] sm:$0xff] %vm1719_vm3, %v4801_v52  ;;  %4862 = vst.msk [vmem:[%s6719_s21 + $0xc8] sm:$0xff] %vm1719_vm3, %v4803_v39 }
 0x87b   : > { %4863 = vst.msk [vmem:[%s6719_s21 + $0xd0] sm:$0xff] %vm1719_vm3, %v4805_v43  ;;  %4864 = vst.msk [vmem:[%s6719_s21 + $0xd8] sm:$0xff] %vm1719_vm3, %v4807_v38 }
 0x87c   : > { %4865 = vst.msk [vmem:[%s6719_s21 + $0xe0] sm:$0xff] %vm1719_vm3, %v4809_v62  ;;  %4866 = vst.msk [vmem:[%s6719_s21 + $0xe8] sm:$0xff] %vm1719_vm3, %v4811_v1 }
 0x87d   : > { %4867 = vst.msk [vmem:[%s6719_s21 + $0xf0] sm:$0xff] %vm1719_vm3, %v4813_v30  ;;  %4868 = vst.msk [vmem:[%s6719_s21 + $0xf8] sm:$0xff] %vm1719_vm3, %v4815_v14 }
 0x87e PF: > { %s12_s13 = sadd.s32 1, %s6661_s13   ;;  %s9010_s9 = smov %s6653_s11 }
 0x87f   : > { %p9_p10 = scmp.ge.s32.totalorder %s12_s13, 18   ;;  %s9011_s10 = smov %s6657_s12 }
 0x880   : > { %s9012_s11 = smov %s9015_s14  ;;  %s9013_s12 = smov %s9019_s15 }
 0x881   :  { %11 = sbr.rel (!%p9_p10) target bundleno = 3 (0x3), region = 78 }

</bundles_post_ra>
